<compile_context>
chip_gen: v5e
topology: v5e:2x2
jax: 0.10.0
libtpu: 0.0.40
codegen_flags: <defaults>
</compile_context>

<pallas_src>
import jax
import jax.numpy as jnp
import numpy as np
from jax.experimental import pallas as pl
from jax.experimental.pallas import tpu as pltpu


# ----------------------------------------------------------------------------
# Fused forward kernel (one grid step = one image)
# ----------------------------------------------------------------------------
def _net_kernel(x_ref, w1_ref, b1_ref, s1_ref, w2_ref, b2_ref, s2_ref,
                wf1_ref, bf1_ref, wf2_ref, bf2_ref, o_ref):
    f32, bf16 = jnp.float32, jnp.bfloat16

    # ---- conv1 (1->10, 5x5) on the VPU -----------------------------------
    # x_row: the 28x28 image flattened onto lanes (zero padded 784 -> 896 so
    # the 25 shifted taps never slice out of bounds).  Output is computed at
    # full width 28: column p = h*28 + w, only w < 24 is a real conv output.
    x_row = x_ref[0]                                  # (1, 896) f32
    w1 = w1_ref[...]                                  # (16, 25) f32, rows>=10 zero
    acc = None
    for k in range(25):
        off = (k // 5) * 28 + (k % 5)
        term = w1[:, k:k + 1] * x_row[:, off:off + 672]   # (16, 672) rank-1 MAC
        acc = term if acc is None else acc + term
    y1 = acc + b1_ref[...]                            # (16, 672) f32

    # maxpool(2) + relu: shifted max, then a selection matmul that keeps the
    # 144 pooled anchor columns (and drops the full-width garbage columns).
    u1 = jnp.maximum(jnp.maximum(y1[:, 0:640], y1[:, 1:641]),
                     jnp.maximum(y1[:, 28:668], y1[:, 29:669]))      # (16, 640)
    a1 = jnp.maximum(
        jnp.dot(u1.astype(bf16), s1_ref[...], preferred_element_type=f32), 0.0)
    # a1: (16, 160) f32; column q = h*12 + w for q < 144, zeros beyond.

    # ---- conv2 (10->20, 5x5) on the MXU -----------------------------------
    # One matmul over the 25 shifted copies of the pooled activation
    # (full width 12).  Dropout2d is identity in eval mode.
    taps = []
    for k in range(25):
        off = (k // 5) * 12 + (k % 5)
        taps.append(a1[:, off:off + 96])              # (16, 96) each
    p2 = jnp.concatenate(taps, axis=0).astype(bf16)   # (400, 96)
    y2 = jnp.dot(w2_ref[...], p2, preferred_element_type=f32) + b2_ref[...]
    # y2: (32, 96) f32; column p = h*12 + w (w < 8 valid); rows >= 20 zero.

    u2 = jnp.maximum(jnp.maximum(y2[:, 0:80], y2[:, 1:81]),
                     jnp.maximum(y2[:, 12:92], y2[:, 13:93]))        # (32, 80)
    a2 = jnp.maximum(
        jnp.dot(u2.astype(bf16), s2_ref[...], preferred_element_type=f32), 0.0)
    # a2: (32, 16) f32; [channel, h*4 + w]; rows >= 20 zero.

    # ---- flatten (PyTorch C,H,W order) -> fc1+relu -> fc2 -> log_softmax ---
    # TODO(synk): training-mode dropout (RNG masking) not implemented; the
    # eval-mode identity below matches the reference inference path.
    flat = jnp.concatenate([a2[c:c + 1, :] for c in range(20)],
                           axis=1).astype(bf16)       # (1, 320)
    h1 = jnp.maximum(
        jnp.dot(flat, wf1_ref[...], preferred_element_type=f32) + bf1_ref[...],
        0.0)                                          # (1, 64), cols >= 50 zero
    logits = (jnp.dot(h1.astype(bf16), wf2_ref[...], preferred_element_type=f32)
              + bf2_ref[...])                         # (1, 10)

    m = jnp.max(logits, axis=-1, keepdims=True)
    z = logits - m
    lse = jnp.log(jnp.sum(jnp.exp(z), axis=-1, keepdims=True))
    o_ref[0] = (z - lse).astype(o_ref.dtype)


def _const_spec(shape):
    """Full-array block with a constant index map (fetched once, stays in VMEM)."""
    return pl.BlockSpec(shape, lambda b: (0,) * len(shape))


def net_forward(x, packed):
    """x: (B, 1, 28, 28) f32, packed: dict from pack_params()."""
    B = x.shape[0]
    # Tiny input prep: flatten HxW onto lanes and zero-pad 784 -> 896 so the
    # 25 shifted conv1 taps stay in bounds (padding only feeds discarded
    # full-width columns).
    x_rows = jnp.pad(x.reshape(B, 1, 28 * 28), ((0, 0), (0, 0), (0, 112)))

    out = pl.pallas_call(
        _net_kernel,
        out_shape=jax.ShapeDtypeStruct((B, 1, 10), jnp.float32),
        grid=(B,),
        in_specs=[
            pl.BlockSpec((1, 1, 896), lambda b: (b, 0, 0)),   # image
            _const_spec((16, 25)),      # conv1 weights (f32, VPU)
            _const_spec((16, 1)),       # conv1 bias
            _const_spec((640, 160)),    # pool1 selection (bf16 0/1)
            _const_spec((32, 400)),     # conv2 weights (bf16)
            _const_spec((32, 1)),       # conv2 bias
            _const_spec((80, 16)),      # pool2 selection (bf16 0/1)
            _const_spec((320, 64)),     # fc1 weights (bf16)
            _const_spec((1, 64)),       # fc1 bias
            _const_spec((64, 10)),      # fc2 weights (bf16)
            _const_spec((1, 10)),       # fc2 bias
        ],
        out_specs=pl.BlockSpec((1, 1, 10), lambda b: (b, 0, 0)),
        compiler_params=pltpu.CompilerParams(
            dimension_semantics=("parallel",)),
    )(x_rows, packed["w1"], packed["b1"], packed["s1"], packed["w2"],
      packed["b2"], packed["s2"], packed["wf1"], packed["bf1"],
      packed["wf2"], packed["bf2"])
    return out.reshape(B, 10)


# ----------------------------------------------------------------------------
# One-time weight packing (outside the hot path)
# ----------------------------------------------------------------------------
def pack_params(params):
    f32, bf16 = jnp.float32, jnp.bfloat16

    # conv1: (10,1,5,5) -> (16, 25) f32, tap order k = di*5 + dj.
    w1 = jnp.zeros((16, 25), f32).at[:10].set(params["conv1_w"].reshape(10, 25))
    b1 = jnp.zeros((16, 1), f32).at[:10, 0].set(params["conv1_b"])

    # pool1 selection: picks column 56h + 2w of the 640-wide max-combined
    # conv1 output for pooled position q = h*12 + w (q < 144), zeros beyond.
    q1 = jnp.arange(144)
    r1 = 56 * (q1 // 12) + 2 * (q1 % 12)
    s1 = jnp.zeros((640, 160), f32).at[r1, q1].set(1.0).astype(bf16)

    # conv2: (20,10,5,5) -> (32, 400), row-blocks of 16 input channels per tap
    # (column index = (di*5 + dj)*16 + ci), zero padded.
    w2 = jnp.transpose(params["conv2_w"], (0, 2, 3, 1))        # (20,5,5,10)
    w2 = jnp.pad(w2, ((0, 12), (0, 0), (0, 0), (0, 6)))        # (32,5,5,16)
    w2 = w2.reshape(32, 400).astype(bf16)
    b2 = jnp.zeros((32, 1), f32).at[:20, 0].set(params["conv2_b"])

    # pool2 selection: column 24h + 2w for pooled q = h*4 + w.
    q2 = jnp.arange(16)
    r2 = 24 * (q2 // 4) + 2 * (q2 % 4)
    s2 = jnp.zeros((80, 16), f32).at[r2, q2].set(1.0).astype(bf16)

    # fc1: (50,320) -> (320,64); fc2: (10,50) -> (64,10); zero padded.
    wf1 = jnp.zeros((320, 64), f32).at[:, :50].set(params["fc1_w"].T).astype(bf16)
    bf1 = jnp.zeros((1, 64), f32).at[0, :50].set(params["fc1_b"])
    wf2 = jnp.zeros((64, 10), f32).at[:50].set(params["fc2_w"].T).astype(bf16)
    bf2 = params["fc2_b"].reshape(1, 10).astype(f32)

    return dict(w1=w1, b1=b1, s1=s1, w2=w2, b2=b2, s2=s2,
                wf1=wf1, bf1=bf1, wf2=wf2, bf2=bf2)


# ----------------------------------------------------------------------------
# Pure-JAX reference (f32, HIGHEST precision) for the correctness check
# ----------------------------------------------------------------------------
def net_forward_ref(x, params):
    dn = ("NCHW", "OIHW", "NCHW")
    prec = jax.lax.Precision.HIGHEST
    y = jax.lax.conv_general_dilated(
        x, params["conv1_w"], (1, 1), "VALID", dimension_numbers=dn,
        precision=prec) + params["conv1_b"][None, :, None, None]
    y = jax.nn.relu(jax.lax.reduce_window(
        y, -jnp.inf, jax.lax.max, (1, 1, 2, 2), (1, 1, 2, 2), "VALID"))
    y = jax.lax.conv_general_dilated(
        y, params["conv2_w"], (1, 1), "VALID", dimension_numbers=dn,
        precision=prec) + params["conv2_b"][None, :, None, None]
    y = jax.nn.relu(jax.lax.reduce_window(
        y, -jnp.inf, jax.lax.max, (1, 1, 2, 2), (1, 1, 2, 2), "VALID"))
    y = y.reshape(y.shape[0], 320)
    y = jax.nn.relu(jnp.dot(y, params["fc1_w"].T, precision=prec)
                    + params["fc1_b"])
    y = jnp.dot(y, params["fc2_w"].T, precision=prec) + params["fc2_b"]
    return jax.nn.log_softmax(y, axis=1)


# ----------------------------------------------------------------------------
# Deterministic parameter init + driver
# ----------------------------------------------------------------------------
def init_params(key):
    ks = jax.random.split(key, 8)

    def u(k, shape, fan_in):
        bound = 1.0 / np.sqrt(fan_in)
        return jax.random.uniform(k, shape, jnp.float32, -bound, bound)

    return {
        "conv1_w": u(ks[0], (10, 1, 5, 5), 1 * 5 * 5),
        "conv1_b": u(ks[1], (10,), 1 * 5 * 5),
        "conv2_w": u(ks[2], (20, 10, 5, 5), 10 * 5 * 5),
        "conv2_b": u(ks[3], (20,), 10 * 5 * 5),
        "fc1_w": u(ks[4], (50, 320), 320),
        "fc1_b": u(ks[5], (50,), 320),
        "fc2_w": u(ks[6], (10, 50), 50),
        "fc2_b": u(ks[7], (10,), 50),
    }


if __name__ == "__main__":
    key = jax.random.PRNGKey(0)
    pkey, xkey = jax.random.split(key)
    params = init_params(pkey)
    packed = jax.tree_util.tree_map(jax.block_until_ready, pack_params(params))

    # MNIST-style input implied by fc1 = Linear(320, 50): (B, 1, 28, 28)
    x = jax.random.normal(xkey, (2, 1, 28, 28), jnp.float32)

    out = jax.block_until_ready(jax.jit(net_forward)(x, packed))
    ref = jax.block_until_ready(jax.jit(net_forward_ref)(x, params))

    assert out.shape == (2, 10), out.shape
    # bf16 MXU operands vs f32 HIGHEST reference -> loose-but-meaningful tol.
    np.testing.assert_allclose(np.asarray(out), np.asarray(ref),
                               rtol=3e-2, atol=3e-2)
    # rows of log_softmax exponentiate to 1
    np.testing.assert_allclose(np.exp(np.asarray(out)).sum(axis=1), 1.0,
                               atol=1e-4)

    print("KERNEL_OK")
</pallas_src>

<mosaic_0001>
module attributes {stable_mosaic.version = 11 : i64} {
  func.func @_net_kernel(%arg0: i32, %arg1: memref<1x1x896xf32, #tpu.memory_space<vmem>>, %arg2: memref<16x25xf32, #tpu.memory_space<vmem>>, %arg3: memref<16x1xf32, #tpu.memory_space<vmem>>, %arg4: memref<640x160xbf16, #tpu.memory_space<vmem>>, %arg5: memref<32x400xbf16, #tpu.memory_space<vmem>>, %arg6: memref<32x1xf32, #tpu.memory_space<vmem>>, %arg7: memref<80x16xbf16, #tpu.memory_space<vmem>>, %arg8: memref<320x64xbf16, #tpu.memory_space<vmem>>, %arg9: memref<1x64xf32, #tpu.memory_space<vmem>>, %arg10: memref<64x10xbf16, #tpu.memory_space<vmem>>, %arg11: memref<1x10xf32, #tpu.memory_space<vmem>>, %arg12: memref<1x1x10xf32, #tpu.memory_space<vmem>>) attributes {dimension_semantics = [#tpu.dimension_semantics<parallel>], iteration_bounds = array<i64: 2>, scalar_prefetch = 0 : i64, scratch_operands = 0 : i64, tpu.core_type = #tpu.core_type<tc>, window_params = [{transform_indices = @transform_0, window_bounds = array<i64: 1, 1, 896>}, {pipeline_mode = #tpu.pipeline_mode<synchronous>, transform_indices = @transform_1, window_bounds = array<i64: 16, 25>}, {pipeline_mode = #tpu.pipeline_mode<synchronous>, transform_indices = @transform_2, window_bounds = array<i64: 16, 1>}, {pipeline_mode = #tpu.pipeline_mode<synchronous>, transform_indices = @transform_3, window_bounds = array<i64: 640, 160>}, {pipeline_mode = #tpu.pipeline_mode<synchronous>, transform_indices = @transform_4, window_bounds = array<i64: 32, 400>}, {pipeline_mode = #tpu.pipeline_mode<synchronous>, transform_indices = @transform_5, window_bounds = array<i64: 32, 1>}, {pipeline_mode = #tpu.pipeline_mode<synchronous>, transform_indices = @transform_6, window_bounds = array<i64: 80, 16>}, {pipeline_mode = #tpu.pipeline_mode<synchronous>, transform_indices = @transform_7, window_bounds = array<i64: 320, 64>}, {pipeline_mode = #tpu.pipeline_mode<synchronous>, transform_indices = @transform_8, window_bounds = array<i64: 1, 64>}, {pipeline_mode = #tpu.pipeline_mode<synchronous>, transform_indices = @transform_9, window_bounds = array<i64: 64, 10>}, {pipeline_mode = #tpu.pipeline_mode<synchronous>, transform_indices = @transform_10, window_bounds = array<i64: 1, 10>}, {transform_indices = @transform_11, window_bounds = array<i64: 1, 1, 10>}]} {
    %c0 = arith.constant 0 : index
    %c0_0 = arith.constant 0 : index
    %c0_1 = arith.constant 0 : index
    %0 = vector.load %arg1[%c0, %c0_0, %c0_1] : memref<1x1x896xf32, #tpu.memory_space<vmem>>, vector<1x1x896xf32>
    %1 = vector.shape_cast %0 : vector<1x1x896xf32> to vector<1x896xf32>
    %c0_2 = arith.constant 0 : index
    %c0_3 = arith.constant 0 : index
    %2 = vector.load %arg2[%c0_2, %c0_3] : memref<16x25xf32, #tpu.memory_space<vmem>>, vector<16x25xf32>
    %3 = vector.extract_strided_slice %2 {offsets = [0, 0], sizes = [16, 1], strides = [1, 1]} : vector<16x25xf32> to vector<16x1xf32>
    %4 = vector.extract_strided_slice %1 {offsets = [0, 0], sizes = [1, 672], strides = [1, 1]} : vector<1x896xf32> to vector<1x672xf32>
    %5 = vector.broadcast %3 : vector<16x1xf32> to vector<16x672xf32>
    %6 = vector.broadcast %4 : vector<1x672xf32> to vector<16x672xf32>
    %7 = arith.mulf %5, %6 : vector<16x672xf32>
    %8 = vector.extract_strided_slice %2 {offsets = [0, 1], sizes = [16, 1], strides = [1, 1]} : vector<16x25xf32> to vector<16x1xf32>
    %9 = vector.extract_strided_slice %1 {offsets = [0, 1], sizes = [1, 672], strides = [1, 1]} : vector<1x896xf32> to vector<1x672xf32>
    %10 = vector.broadcast %8 : vector<16x1xf32> to vector<16x672xf32>
    %11 = vector.broadcast %9 : vector<1x672xf32> to vector<16x672xf32>
    %12 = arith.mulf %10, %11 : vector<16x672xf32>
    %13 = arith.addf %7, %12 : vector<16x672xf32>
    %14 = vector.extract_strided_slice %2 {offsets = [0, 2], sizes = [16, 1], strides = [1, 1]} : vector<16x25xf32> to vector<16x1xf32>
    %15 = vector.extract_strided_slice %1 {offsets = [0, 2], sizes = [1, 672], strides = [1, 1]} : vector<1x896xf32> to vector<1x672xf32>
    %16 = vector.broadcast %14 : vector<16x1xf32> to vector<16x672xf32>
    %17 = vector.broadcast %15 : vector<1x672xf32> to vector<16x672xf32>
    %18 = arith.mulf %16, %17 : vector<16x672xf32>
    %19 = arith.addf %13, %18 : vector<16x672xf32>
    %20 = vector.extract_strided_slice %2 {offsets = [0, 3], sizes = [16, 1], strides = [1, 1]} : vector<16x25xf32> to vector<16x1xf32>
    %21 = vector.extract_strided_slice %1 {offsets = [0, 3], sizes = [1, 672], strides = [1, 1]} : vector<1x896xf32> to vector<1x672xf32>
    %22 = vector.broadcast %20 : vector<16x1xf32> to vector<16x672xf32>
    %23 = vector.broadcast %21 : vector<1x672xf32> to vector<16x672xf32>
    %24 = arith.mulf %22, %23 : vector<16x672xf32>
    %25 = arith.addf %19, %24 : vector<16x672xf32>
    %26 = vector.extract_strided_slice %2 {offsets = [0, 4], sizes = [16, 1], strides = [1, 1]} : vector<16x25xf32> to vector<16x1xf32>
    %27 = vector.extract_strided_slice %1 {offsets = [0, 4], sizes = [1, 672], strides = [1, 1]} : vector<1x896xf32> to vector<1x672xf32>
    %28 = vector.broadcast %26 : vector<16x1xf32> to vector<16x672xf32>
    %29 = vector.broadcast %27 : vector<1x672xf32> to vector<16x672xf32>
    %30 = arith.mulf %28, %29 : vector<16x672xf32>
    %31 = arith.addf %25, %30 : vector<16x672xf32>
    %32 = vector.extract_strided_slice %2 {offsets = [0, 5], sizes = [16, 1], strides = [1, 1]} : vector<16x25xf32> to vector<16x1xf32>
    %33 = vector.extract_strided_slice %1 {offsets = [0, 28], sizes = [1, 672], strides = [1, 1]} : vector<1x896xf32> to vector<1x672xf32>
    %34 = vector.broadcast %32 : vector<16x1xf32> to vector<16x672xf32>
    %35 = vector.broadcast %33 : vector<1x672xf32> to vector<16x672xf32>
    %36 = arith.mulf %34, %35 : vector<16x672xf32>
    %37 = arith.addf %31, %36 : vector<16x672xf32>
    %38 = vector.extract_strided_slice %2 {offsets = [0, 6], sizes = [16, 1], strides = [1, 1]} : vector<16x25xf32> to vector<16x1xf32>
    %39 = vector.extract_strided_slice %1 {offsets = [0, 29], sizes = [1, 672], strides = [1, 1]} : vector<1x896xf32> to vector<1x672xf32>
    %40 = vector.broadcast %38 : vector<16x1xf32> to vector<16x672xf32>
    %41 = vector.broadcast %39 : vector<1x672xf32> to vector<16x672xf32>
    %42 = arith.mulf %40, %41 : vector<16x672xf32>
    %43 = arith.addf %37, %42 : vector<16x672xf32>
    %44 = vector.extract_strided_slice %2 {offsets = [0, 7], sizes = [16, 1], strides = [1, 1]} : vector<16x25xf32> to vector<16x1xf32>
    %45 = vector.extract_strided_slice %1 {offsets = [0, 30], sizes = [1, 672], strides = [1, 1]} : vector<1x896xf32> to vector<1x672xf32>
    %46 = vector.broadcast %44 : vector<16x1xf32> to vector<16x672xf32>
    %47 = vector.broadcast %45 : vector<1x672xf32> to vector<16x672xf32>
    %48 = arith.mulf %46, %47 : vector<16x672xf32>
    %49 = arith.addf %43, %48 : vector<16x672xf32>
    %50 = vector.extract_strided_slice %2 {offsets = [0, 8], sizes = [16, 1], strides = [1, 1]} : vector<16x25xf32> to vector<16x1xf32>
    %51 = vector.extract_strided_slice %1 {offsets = [0, 31], sizes = [1, 672], strides = [1, 1]} : vector<1x896xf32> to vector<1x672xf32>
    %52 = vector.broadcast %50 : vector<16x1xf32> to vector<16x672xf32>
    %53 = vector.broadcast %51 : vector<1x672xf32> to vector<16x672xf32>
    %54 = arith.mulf %52, %53 : vector<16x672xf32>
    %55 = arith.addf %49, %54 : vector<16x672xf32>
    %56 = vector.extract_strided_slice %2 {offsets = [0, 9], sizes = [16, 1], strides = [1, 1]} : vector<16x25xf32> to vector<16x1xf32>
    %57 = vector.extract_strided_slice %1 {offsets = [0, 32], sizes = [1, 672], strides = [1, 1]} : vector<1x896xf32> to vector<1x672xf32>
    %58 = vector.broadcast %56 : vector<16x1xf32> to vector<16x672xf32>
    %59 = vector.broadcast %57 : vector<1x672xf32> to vector<16x672xf32>
    %60 = arith.mulf %58, %59 : vector<16x672xf32>
    %61 = arith.addf %55, %60 : vector<16x672xf32>
    %62 = vector.extract_strided_slice %2 {offsets = [0, 10], sizes = [16, 1], strides = [1, 1]} : vector<16x25xf32> to vector<16x1xf32>
    %63 = vector.extract_strided_slice %1 {offsets = [0, 56], sizes = [1, 672], strides = [1, 1]} : vector<1x896xf32> to vector<1x672xf32>
    %64 = vector.broadcast %62 : vector<16x1xf32> to vector<16x672xf32>
    %65 = vector.broadcast %63 : vector<1x672xf32> to vector<16x672xf32>
    %66 = arith.mulf %64, %65 : vector<16x672xf32>
    %67 = arith.addf %61, %66 : vector<16x672xf32>
    %68 = vector.extract_strided_slice %2 {offsets = [0, 11], sizes = [16, 1], strides = [1, 1]} : vector<16x25xf32> to vector<16x1xf32>
    %69 = vector.extract_strided_slice %1 {offsets = [0, 57], sizes = [1, 672], strides = [1, 1]} : vector<1x896xf32> to vector<1x672xf32>
    %70 = vector.broadcast %68 : vector<16x1xf32> to vector<16x672xf32>
    %71 = vector.broadcast %69 : vector<1x672xf32> to vector<16x672xf32>
    %72 = arith.mulf %70, %71 : vector<16x672xf32>
    %73 = arith.addf %67, %72 : vector<16x672xf32>
    %74 = vector.extract_strided_slice %2 {offsets = [0, 12], sizes = [16, 1], strides = [1, 1]} : vector<16x25xf32> to vector<16x1xf32>
    %75 = vector.extract_strided_slice %1 {offsets = [0, 58], sizes = [1, 672], strides = [1, 1]} : vector<1x896xf32> to vector<1x672xf32>
    %76 = vector.broadcast %74 : vector<16x1xf32> to vector<16x672xf32>
    %77 = vector.broadcast %75 : vector<1x672xf32> to vector<16x672xf32>
    %78 = arith.mulf %76, %77 : vector<16x672xf32>
    %79 = arith.addf %73, %78 : vector<16x672xf32>
    %80 = vector.extract_strided_slice %2 {offsets = [0, 13], sizes = [16, 1], strides = [1, 1]} : vector<16x25xf32> to vector<16x1xf32>
    %81 = vector.extract_strided_slice %1 {offsets = [0, 59], sizes = [1, 672], strides = [1, 1]} : vector<1x896xf32> to vector<1x672xf32>
    %82 = vector.broadcast %80 : vector<16x1xf32> to vector<16x672xf32>
    %83 = vector.broadcast %81 : vector<1x672xf32> to vector<16x672xf32>
    %84 = arith.mulf %82, %83 : vector<16x672xf32>
    %85 = arith.addf %79, %84 : vector<16x672xf32>
    %86 = vector.extract_strided_slice %2 {offsets = [0, 14], sizes = [16, 1], strides = [1, 1]} : vector<16x25xf32> to vector<16x1xf32>
    %87 = vector.extract_strided_slice %1 {offsets = [0, 60], sizes = [1, 672], strides = [1, 1]} : vector<1x896xf32> to vector<1x672xf32>
    %88 = vector.broadcast %86 : vector<16x1xf32> to vector<16x672xf32>
    %89 = vector.broadcast %87 : vector<1x672xf32> to vector<16x672xf32>
    %90 = arith.mulf %88, %89 : vector<16x672xf32>
    %91 = arith.addf %85, %90 : vector<16x672xf32>
    %92 = vector.extract_strided_slice %2 {offsets = [0, 15], sizes = [16, 1], strides = [1, 1]} : vector<16x25xf32> to vector<16x1xf32>
    %93 = vector.extract_strided_slice %1 {offsets = [0, 84], sizes = [1, 672], strides = [1, 1]} : vector<1x896xf32> to vector<1x672xf32>
    %94 = vector.broadcast %92 : vector<16x1xf32> to vector<16x672xf32>
    %95 = vector.broadcast %93 : vector<1x672xf32> to vector<16x672xf32>
    %96 = arith.mulf %94, %95 : vector<16x672xf32>
    %97 = arith.addf %91, %96 : vector<16x672xf32>
    %98 = vector.extract_strided_slice %2 {offsets = [0, 16], sizes = [16, 1], strides = [1, 1]} : vector<16x25xf32> to vector<16x1xf32>
    %99 = vector.extract_strided_slice %1 {offsets = [0, 85], sizes = [1, 672], strides = [1, 1]} : vector<1x896xf32> to vector<1x672xf32>
    %100 = vector.broadcast %98 : vector<16x1xf32> to vector<16x672xf32>
    %101 = vector.broadcast %99 : vector<1x672xf32> to vector<16x672xf32>
    %102 = arith.mulf %100, %101 : vector<16x672xf32>
    %103 = arith.addf %97, %102 : vector<16x672xf32>
    %104 = vector.extract_strided_slice %2 {offsets = [0, 17], sizes = [16, 1], strides = [1, 1]} : vector<16x25xf32> to vector<16x1xf32>
    %105 = vector.extract_strided_slice %1 {offsets = [0, 86], sizes = [1, 672], strides = [1, 1]} : vector<1x896xf32> to vector<1x672xf32>
    %106 = vector.broadcast %104 : vector<16x1xf32> to vector<16x672xf32>
    %107 = vector.broadcast %105 : vector<1x672xf32> to vector<16x672xf32>
    %108 = arith.mulf %106, %107 : vector<16x672xf32>
    %109 = arith.addf %103, %108 : vector<16x672xf32>
    %110 = vector.extract_strided_slice %2 {offsets = [0, 18], sizes = [16, 1], strides = [1, 1]} : vector<16x25xf32> to vector<16x1xf32>
    %111 = vector.extract_strided_slice %1 {offsets = [0, 87], sizes = [1, 672], strides = [1, 1]} : vector<1x896xf32> to vector<1x672xf32>
    %112 = vector.broadcast %110 : vector<16x1xf32> to vector<16x672xf32>
    %113 = vector.broadcast %111 : vector<1x672xf32> to vector<16x672xf32>
    %114 = arith.mulf %112, %113 : vector<16x672xf32>
    %115 = arith.addf %109, %114 : vector<16x672xf32>
    %116 = vector.extract_strided_slice %2 {offsets = [0, 19], sizes = [16, 1], strides = [1, 1]} : vector<16x25xf32> to vector<16x1xf32>
    %117 = vector.extract_strided_slice %1 {offsets = [0, 88], sizes = [1, 672], strides = [1, 1]} : vector<1x896xf32> to vector<1x672xf32>
    %118 = vector.broadcast %116 : vector<16x1xf32> to vector<16x672xf32>
    %119 = vector.broadcast %117 : vector<1x672xf32> to vector<16x672xf32>
    %120 = arith.mulf %118, %119 : vector<16x672xf32>
    %121 = arith.addf %115, %120 : vector<16x672xf32>
    %122 = vector.extract_strided_slice %2 {offsets = [0, 20], sizes = [16, 1], strides = [1, 1]} : vector<16x25xf32> to vector<16x1xf32>
    %123 = vector.extract_strided_slice %1 {offsets = [0, 112], sizes = [1, 672], strides = [1, 1]} : vector<1x896xf32> to vector<1x672xf32>
    %124 = vector.broadcast %122 : vector<16x1xf32> to vector<16x672xf32>
    %125 = vector.broadcast %123 : vector<1x672xf32> to vector<16x672xf32>
    %126 = arith.mulf %124, %125 : vector<16x672xf32>
    %127 = arith.addf %121, %126 : vector<16x672xf32>
    %128 = vector.extract_strided_slice %2 {offsets = [0, 21], sizes = [16, 1], strides = [1, 1]} : vector<16x25xf32> to vector<16x1xf32>
    %129 = vector.extract_strided_slice %1 {offsets = [0, 113], sizes = [1, 672], strides = [1, 1]} : vector<1x896xf32> to vector<1x672xf32>
    %130 = vector.broadcast %128 : vector<16x1xf32> to vector<16x672xf32>
    %131 = vector.broadcast %129 : vector<1x672xf32> to vector<16x672xf32>
    %132 = arith.mulf %130, %131 : vector<16x672xf32>
    %133 = arith.addf %127, %132 : vector<16x672xf32>
    %134 = vector.extract_strided_slice %2 {offsets = [0, 22], sizes = [16, 1], strides = [1, 1]} : vector<16x25xf32> to vector<16x1xf32>
    %135 = vector.extract_strided_slice %1 {offsets = [0, 114], sizes = [1, 672], strides = [1, 1]} : vector<1x896xf32> to vector<1x672xf32>
    %136 = vector.broadcast %134 : vector<16x1xf32> to vector<16x672xf32>
    %137 = vector.broadcast %135 : vector<1x672xf32> to vector<16x672xf32>
    %138 = arith.mulf %136, %137 : vector<16x672xf32>
    %139 = arith.addf %133, %138 : vector<16x672xf32>
    %140 = vector.extract_strided_slice %2 {offsets = [0, 23], sizes = [16, 1], strides = [1, 1]} : vector<16x25xf32> to vector<16x1xf32>
    %141 = vector.extract_strided_slice %1 {offsets = [0, 115], sizes = [1, 672], strides = [1, 1]} : vector<1x896xf32> to vector<1x672xf32>
    %142 = vector.broadcast %140 : vector<16x1xf32> to vector<16x672xf32>
    %143 = vector.broadcast %141 : vector<1x672xf32> to vector<16x672xf32>
    %144 = arith.mulf %142, %143 : vector<16x672xf32>
    %145 = arith.addf %139, %144 : vector<16x672xf32>
    %146 = vector.extract_strided_slice %2 {offsets = [0, 24], sizes = [16, 1], strides = [1, 1]} : vector<16x25xf32> to vector<16x1xf32>
    %147 = vector.extract_strided_slice %1 {offsets = [0, 116], sizes = [1, 672], strides = [1, 1]} : vector<1x896xf32> to vector<1x672xf32>
    %148 = vector.broadcast %146 : vector<16x1xf32> to vector<16x672xf32>
    %149 = vector.broadcast %147 : vector<1x672xf32> to vector<16x672xf32>
    %150 = arith.mulf %148, %149 : vector<16x672xf32>
    %151 = arith.addf %145, %150 : vector<16x672xf32>
    %c0_4 = arith.constant 0 : index
    %c0_5 = arith.constant 0 : index
    %152 = vector.load %arg3[%c0_4, %c0_5] : memref<16x1xf32, #tpu.memory_space<vmem>>, vector<16x1xf32>
    %153 = vector.broadcast %152 : vector<16x1xf32> to vector<16x672xf32>
    %154 = arith.addf %151, %153 : vector<16x672xf32>
    %155 = vector.extract_strided_slice %154 {offsets = [0, 0], sizes = [16, 640], strides = [1, 1]} : vector<16x672xf32> to vector<16x640xf32>
    %156 = vector.extract_strided_slice %154 {offsets = [0, 1], sizes = [16, 640], strides = [1, 1]} : vector<16x672xf32> to vector<16x640xf32>
    %157 = arith.maximumf %155, %156 : vector<16x640xf32>
    %158 = vector.extract_strided_slice %154 {offsets = [0, 28], sizes = [16, 640], strides = [1, 1]} : vector<16x672xf32> to vector<16x640xf32>
    %159 = vector.extract_strided_slice %154 {offsets = [0, 29], sizes = [16, 640], strides = [1, 1]} : vector<16x672xf32> to vector<16x640xf32>
    %160 = arith.maximumf %158, %159 : vector<16x640xf32>
    %161 = arith.maximumf %157, %160 : vector<16x640xf32>
    %162 = arith.truncf %161 : vector<16x640xf32> to vector<16x640xbf16>
    %c0_6 = arith.constant 0 : index
    %c0_7 = arith.constant 0 : index
    %163 = vector.load %arg4[%c0_6, %c0_7] : memref<640x160xbf16, #tpu.memory_space<vmem>>, vector<640x160xbf16>
    %cst = arith.constant dense<0.000000e+00> : vector<16x160xf32>
    %164 = tpu.matmul %162, %163, %cst {dimension_numbers = #tpu.dot_dimension_numbers<[1], [0], [0], [1], [0, 0, 1, 1], [], []>} : vector<16x640xbf16>, vector<640x160xbf16>, vector<16x160xf32> -> vector<16x160xf32>
    %cst_8 = arith.constant 0.000000e+00 : f32
    %165 = vector.broadcast %cst_8 : f32 to vector<16x160xf32>
    %166 = arith.maximumf %164, %165 : vector<16x160xf32>
    %167 = vector.extract_strided_slice %166 {offsets = [0, 0], sizes = [16, 96], strides = [1, 1]} : vector<16x160xf32> to vector<16x96xf32>
    %168 = vector.extract_strided_slice %166 {offsets = [0, 1], sizes = [16, 96], strides = [1, 1]} : vector<16x160xf32> to vector<16x96xf32>
    %169 = vector.extract_strided_slice %166 {offsets = [0, 2], sizes = [16, 96], strides = [1, 1]} : vector<16x160xf32> to vector<16x96xf32>
    %170 = vector.extract_strided_slice %166 {offsets = [0, 3], sizes = [16, 96], strides = [1, 1]} : vector<16x160xf32> to vector<16x96xf32>
    %171 = vector.extract_strided_slice %166 {offsets = [0, 4], sizes = [16, 96], strides = [1, 1]} : vector<16x160xf32> to vector<16x96xf32>
    %172 = vector.extract_strided_slice %166 {offsets = [0, 12], sizes = [16, 96], strides = [1, 1]} : vector<16x160xf32> to vector<16x96xf32>
    %173 = vector.extract_strided_slice %166 {offsets = [0, 13], sizes = [16, 96], strides = [1, 1]} : vector<16x160xf32> to vector<16x96xf32>
    %174 = vector.extract_strided_slice %166 {offsets = [0, 14], sizes = [16, 96], strides = [1, 1]} : vector<16x160xf32> to vector<16x96xf32>
    %175 = vector.extract_strided_slice %166 {offsets = [0, 15], sizes = [16, 96], strides = [1, 1]} : vector<16x160xf32> to vector<16x96xf32>
    %176 = vector.extract_strided_slice %166 {offsets = [0, 16], sizes = [16, 96], strides = [1, 1]} : vector<16x160xf32> to vector<16x96xf32>
    %177 = vector.extract_strided_slice %166 {offsets = [0, 24], sizes = [16, 96], strides = [1, 1]} : vector<16x160xf32> to vector<16x96xf32>
    %178 = vector.extract_strided_slice %166 {offsets = [0, 25], sizes = [16, 96], strides = [1, 1]} : vector<16x160xf32> to vector<16x96xf32>
    %179 = vector.extract_strided_slice %166 {offsets = [0, 26], sizes = [16, 96], strides = [1, 1]} : vector<16x160xf32> to vector<16x96xf32>
    %180 = vector.extract_strided_slice %166 {offsets = [0, 27], sizes = [16, 96], strides = [1, 1]} : vector<16x160xf32> to vector<16x96xf32>
    %181 = vector.extract_strided_slice %166 {offsets = [0, 28], sizes = [16, 96], strides = [1, 1]} : vector<16x160xf32> to vector<16x96xf32>
    %182 = vector.extract_strided_slice %166 {offsets = [0, 36], sizes = [16, 96], strides = [1, 1]} : vector<16x160xf32> to vector<16x96xf32>
    %183 = vector.extract_strided_slice %166 {offsets = [0, 37], sizes = [16, 96], strides = [1, 1]} : vector<16x160xf32> to vector<16x96xf32>
    %184 = vector.extract_strided_slice %166 {offsets = [0, 38], sizes = [16, 96], strides = [1, 1]} : vector<16x160xf32> to vector<16x96xf32>
    %185 = vector.extract_strided_slice %166 {offsets = [0, 39], sizes = [16, 96], strides = [1, 1]} : vector<16x160xf32> to vector<16x96xf32>
    %186 = vector.extract_strided_slice %166 {offsets = [0, 40], sizes = [16, 96], strides = [1, 1]} : vector<16x160xf32> to vector<16x96xf32>
    %187 = vector.extract_strided_slice %166 {offsets = [0, 48], sizes = [16, 96], strides = [1, 1]} : vector<16x160xf32> to vector<16x96xf32>
    %188 = vector.extract_strided_slice %166 {offsets = [0, 49], sizes = [16, 96], strides = [1, 1]} : vector<16x160xf32> to vector<16x96xf32>
    %189 = vector.extract_strided_slice %166 {offsets = [0, 50], sizes = [16, 96], strides = [1, 1]} : vector<16x160xf32> to vector<16x96xf32>
    %190 = vector.extract_strided_slice %166 {offsets = [0, 51], sizes = [16, 96], strides = [1, 1]} : vector<16x160xf32> to vector<16x96xf32>
    %191 = vector.extract_strided_slice %166 {offsets = [0, 52], sizes = [16, 96], strides = [1, 1]} : vector<16x160xf32> to vector<16x96xf32>
    %192 = tpu.concatenate %167, %168, %169, %170, %171, %172, %173, %174, %175, %176, %177, %178, %179, %180, %181, %182 in 0 : vector<16x96xf32>, vector<16x96xf32>, vector<16x96xf32>, vector<16x96xf32>, vector<16x96xf32>, vector<16x96xf32>, vector<16x96xf32>, vector<16x96xf32>, vector<16x96xf32>, vector<16x96xf32>, vector<16x96xf32>, vector<16x96xf32>, vector<16x96xf32>, vector<16x96xf32>, vector<16x96xf32>, vector<16x96xf32> -> vector<256x96xf32>
    %193 = tpu.concatenate %183, %184, %185, %186, %187, %188, %189, %190, %191 in 0 : vector<16x96xf32>, vector<16x96xf32>, vector<16x96xf32>, vector<16x96xf32>, vector<16x96xf32>, vector<16x96xf32>, vector<16x96xf32>, vector<16x96xf32>, vector<16x96xf32> -> vector<144x96xf32>
    %194 = tpu.concatenate %192, %193 in 0 : vector<256x96xf32>, vector<144x96xf32> -> vector<400x96xf32>
    %195 = arith.truncf %194 : vector<400x96xf32> to vector<400x96xbf16>
    %c0_9 = arith.constant 0 : index
    %c0_10 = arith.constant 0 : index
    %196 = vector.load %arg5[%c0_9, %c0_10] : memref<32x400xbf16, #tpu.memory_space<vmem>>, vector<32x400xbf16>
    %cst_11 = arith.constant dense<0.000000e+00> : vector<32x96xf32>
    %197 = tpu.matmul %196, %195, %cst_11 {dimension_numbers = #tpu.dot_dimension_numbers<[1], [0], [0], [1], [0, 0, 1, 1], [], []>} : vector<32x400xbf16>, vector<400x96xbf16>, vector<32x96xf32> -> vector<32x96xf32>
    %c0_12 = arith.constant 0 : index
    %c0_13 = arith.constant 0 : index
    %198 = vector.load %arg6[%c0_12, %c0_13] : memref<32x1xf32, #tpu.memory_space<vmem>>, vector<32x1xf32>
    %199 = vector.broadcast %198 : vector<32x1xf32> to vector<32x96xf32>
    %200 = arith.addf %197, %199 : vector<32x96xf32>
    %201 = vector.extract_strided_slice %200 {offsets = [0, 0], sizes = [32, 80], strides = [1, 1]} : vector<32x96xf32> to vector<32x80xf32>
    %202 = vector.extract_strided_slice %200 {offsets = [0, 1], sizes = [32, 80], strides = [1, 1]} : vector<32x96xf32> to vector<32x80xf32>
    %203 = arith.maximumf %201, %202 : vector<32x80xf32>
    %204 = vector.extract_strided_slice %200 {offsets = [0, 12], sizes = [32, 80], strides = [1, 1]} : vector<32x96xf32> to vector<32x80xf32>
    %205 = vector.extract_strided_slice %200 {offsets = [0, 13], sizes = [32, 80], strides = [1, 1]} : vector<32x96xf32> to vector<32x80xf32>
    %206 = arith.maximumf %204, %205 : vector<32x80xf32>
    %207 = arith.maximumf %203, %206 : vector<32x80xf32>
    %208 = arith.truncf %207 : vector<32x80xf32> to vector<32x80xbf16>
    %c0_14 = arith.constant 0 : index
    %c0_15 = arith.constant 0 : index
    %209 = vector.load %arg7[%c0_14, %c0_15] : memref<80x16xbf16, #tpu.memory_space<vmem>>, vector<80x16xbf16>
    %cst_16 = arith.constant dense<0.000000e+00> : vector<32x16xf32>
    %210 = tpu.matmul %208, %209, %cst_16 {dimension_numbers = #tpu.dot_dimension_numbers<[1], [0], [0], [1], [0, 0, 1, 1], [], []>} : vector<32x80xbf16>, vector<80x16xbf16>, vector<32x16xf32> -> vector<32x16xf32>
    %cst_17 = arith.constant 0.000000e+00 : f32
    %211 = vector.broadcast %cst_17 : f32 to vector<32x16xf32>
    %212 = arith.maximumf %210, %211 : vector<32x16xf32>
    %213 = vector.extract_strided_slice %212 {offsets = [0, 0], sizes = [1, 16], strides = [1, 1]} : vector<32x16xf32> to vector<1x16xf32>
    %214 = vector.extract_strided_slice %212 {offsets = [1, 0], sizes = [1, 16], strides = [1, 1]} : vector<32x16xf32> to vector<1x16xf32>
    %215 = vector.extract_strided_slice %212 {offsets = [2, 0], sizes = [1, 16], strides = [1, 1]} : vector<32x16xf32> to vector<1x16xf32>
    %216 = vector.extract_strided_slice %212 {offsets = [3, 0], sizes = [1, 16], strides = [1, 1]} : vector<32x16xf32> to vector<1x16xf32>
    %217 = vector.extract_strided_slice %212 {offsets = [4, 0], sizes = [1, 16], strides = [1, 1]} : vector<32x16xf32> to vector<1x16xf32>
    %218 = vector.extract_strided_slice %212 {offsets = [5, 0], sizes = [1, 16], strides = [1, 1]} : vector<32x16xf32> to vector<1x16xf32>
    %219 = vector.extract_strided_slice %212 {offsets = [6, 0], sizes = [1, 16], strides = [1, 1]} : vector<32x16xf32> to vector<1x16xf32>
    %220 = vector.extract_strided_slice %212 {offsets = [7, 0], sizes = [1, 16], strides = [1, 1]} : vector<32x16xf32> to vector<1x16xf32>
    %221 = vector.extract_strided_slice %212 {offsets = [8, 0], sizes = [1, 16], strides = [1, 1]} : vector<32x16xf32> to vector<1x16xf32>
    %222 = vector.extract_strided_slice %212 {offsets = [9, 0], sizes = [1, 16], strides = [1, 1]} : vector<32x16xf32> to vector<1x16xf32>
    %223 = vector.extract_strided_slice %212 {offsets = [10, 0], sizes = [1, 16], strides = [1, 1]} : vector<32x16xf32> to vector<1x16xf32>
    %224 = vector.extract_strided_slice %212 {offsets = [11, 0], sizes = [1, 16], strides = [1, 1]} : vector<32x16xf32> to vector<1x16xf32>
    %225 = vector.extract_strided_slice %212 {offsets = [12, 0], sizes = [1, 16], strides = [1, 1]} : vector<32x16xf32> to vector<1x16xf32>
    %226 = vector.extract_strided_slice %212 {offsets = [13, 0], sizes = [1, 16], strides = [1, 1]} : vector<32x16xf32> to vector<1x16xf32>
    %227 = vector.extract_strided_slice %212 {offsets = [14, 0], sizes = [1, 16], strides = [1, 1]} : vector<32x16xf32> to vector<1x16xf32>
    %228 = vector.extract_strided_slice %212 {offsets = [15, 0], sizes = [1, 16], strides = [1, 1]} : vector<32x16xf32> to vector<1x16xf32>
    %229 = vector.extract_strided_slice %212 {offsets = [16, 0], sizes = [1, 16], strides = [1, 1]} : vector<32x16xf32> to vector<1x16xf32>
    %230 = vector.extract_strided_slice %212 {offsets = [17, 0], sizes = [1, 16], strides = [1, 1]} : vector<32x16xf32> to vector<1x16xf32>
    %231 = vector.extract_strided_slice %212 {offsets = [18, 0], sizes = [1, 16], strides = [1, 1]} : vector<32x16xf32> to vector<1x16xf32>
    %232 = vector.extract_strided_slice %212 {offsets = [19, 0], sizes = [1, 16], strides = [1, 1]} : vector<32x16xf32> to vector<1x16xf32>
    %233 = tpu.concatenate %213, %214, %215, %216, %217, %218, %219, %220, %221, %222, %223, %224, %225, %226, %227, %228 in 1 : vector<1x16xf32>, vector<1x16xf32>, vector<1x16xf32>, vector<1x16xf32>, vector<1x16xf32>, vector<1x16xf32>, vector<1x16xf32>, vector<1x16xf32>, vector<1x16xf32>, vector<1x16xf32>, vector<1x16xf32>, vector<1x16xf32>, vector<1x16xf32>, vector<1x16xf32>, vector<1x16xf32>, vector<1x16xf32> -> vector<1x256xf32>
    %234 = tpu.concatenate %229, %230, %231, %232 in 1 : vector<1x16xf32>, vector<1x16xf32>, vector<1x16xf32>, vector<1x16xf32> -> vector<1x64xf32>
    %235 = tpu.concatenate %233, %234 in 1 : vector<1x256xf32>, vector<1x64xf32> -> vector<1x320xf32>
    %236 = arith.truncf %235 : vector<1x320xf32> to vector<1x320xbf16>
    %c0_18 = arith.constant 0 : index
    %c0_19 = arith.constant 0 : index
    %237 = vector.load %arg8[%c0_18, %c0_19] : memref<320x64xbf16, #tpu.memory_space<vmem>>, vector<320x64xbf16>
    %cst_20 = arith.constant dense<0.000000e+00> : vector<1x64xf32>
    %238 = tpu.matmul %236, %237, %cst_20 {dimension_numbers = #tpu.dot_dimension_numbers<[1], [0], [0], [1], [0, 0, 1, 1], [], []>} : vector<1x320xbf16>, vector<320x64xbf16>, vector<1x64xf32> -> vector<1x64xf32>
    %c0_21 = arith.constant 0 : index
    %c0_22 = arith.constant 0 : index
    %239 = vector.load %arg9[%c0_21, %c0_22] : memref<1x64xf32, #tpu.memory_space<vmem>>, vector<1x64xf32>
    %240 = arith.addf %238, %239 : vector<1x64xf32>
    %cst_23 = arith.constant 0.000000e+00 : f32
    %241 = vector.broadcast %cst_23 : f32 to vector<1x64xf32>
    %242 = arith.maximumf %240, %241 : vector<1x64xf32>
    %243 = arith.truncf %242 : vector<1x64xf32> to vector<1x64xbf16>
    %c0_24 = arith.constant 0 : index
    %c0_25 = arith.constant 0 : index
    %244 = vector.load %arg10[%c0_24, %c0_25] : memref<64x10xbf16, #tpu.memory_space<vmem>>, vector<64x10xbf16>
    %cst_26 = arith.constant dense<0.000000e+00> : vector<1x10xf32>
    %245 = tpu.matmul %243, %244, %cst_26 {dimension_numbers = #tpu.dot_dimension_numbers<[1], [0], [0], [1], [0, 0, 1, 1], [], []>} : vector<1x64xbf16>, vector<64x10xbf16>, vector<1x10xf32> -> vector<1x10xf32>
    %c0_27 = arith.constant 0 : index
    %c0_28 = arith.constant 0 : index
    %246 = vector.load %arg11[%c0_27, %c0_28] : memref<1x10xf32, #tpu.memory_space<vmem>>, vector<1x10xf32>
    %247 = arith.addf %245, %246 : vector<1x10xf32>
    %cst_29 = arith.constant dense<0xFF800000> : vector<1xf32>
    %248 = vector.multi_reduction <maximumf>, %247, %cst_29 [1] : vector<1x10xf32> to vector<1xf32>
    %249 = vector.shape_cast %248 : vector<1xf32> to vector<1x1xf32>
    %250 = vector.broadcast %249 : vector<1x1xf32> to vector<1x10xf32>
    %251 = arith.subf %247, %250 : vector<1x10xf32>
    %252 = math.exp %251 : vector<1x10xf32>
    %cst_30 = arith.constant dense<0.000000e+00> : vector<1xf32>
    %253 = vector.multi_reduction <add>, %252, %cst_30 [1] : vector<1x10xf32> to vector<1xf32>
    %254 = vector.shape_cast %253 : vector<1xf32> to vector<1x1xf32>
    %255 = math.log %254 : vector<1x1xf32>
    %256 = vector.broadcast %255 : vector<1x1xf32> to vector<1x10xf32>
    %257 = arith.subf %251, %256 : vector<1x10xf32>
    %c0_31 = arith.constant 0 : index
    %c0_32 = arith.constant 0 : index
    %c0_33 = arith.constant 0 : index
    %258 = vector.load %arg12[%c0_31, %c0_32, %c0_33] : memref<1x1x10xf32, #tpu.memory_space<vmem>>, vector<1x1x10xf32>
    %259 = vector.shape_cast %258 : vector<1x1x10xf32> to vector<1x10xf32>
    %260 = vector.shape_cast %257 : vector<1x10xf32> to vector<1x1x10xf32>
    tpu.vector_store %arg12[%c0_31, %c0_32, %c0_33], %260 {strides = array<i32>} : memref<1x1x10xf32, #tpu.memory_space<vmem>>, vector<1x1x10xf32>,
    return
  }
  func.func @transform_0(%arg0: i32) -> (i32, i32, i32) {
    %c0_i32 = arith.constant 0 : i32
    %c0_i32_0 = arith.constant 0 : i32
    %c0_i32_1 = arith.constant 0 : i32
    return %arg0, %c0_i32, %c0_i32_0 : i32, i32, i32
  }
  func.func @transform_1(%arg0: i32) -> (i32, i32) {
    %c0_i32 = arith.constant 0 : i32
    %c0_i32_0 = arith.constant 0 : i32
    %c0_i32_1 = arith.constant 0 : i32
    return %c0_i32, %c0_i32_0 : i32, i32
  }
  func.func @transform_2(%arg0: i32) -> (i32, i32) {
    %c0_i32 = arith.constant 0 : i32
    %c0_i32_0 = arith.constant 0 : i32
    %c0_i32_1 = arith.constant 0 : i32
    return %c0_i32, %c0_i32_0 : i32, i32
  }
  func.func @transform_3(%arg0: i32) -> (i32, i32) {
    %c0_i32 = arith.constant 0 : i32
    %c0_i32_0 = arith.constant 0 : i32
    %c0_i32_1 = arith.constant 0 : i32
    return %c0_i32, %c0_i32_0 : i32, i32
  }
  func.func @transform_4(%arg0: i32) -> (i32, i32) {
    %c0_i32 = arith.constant 0 : i32
    %c0_i32_0 = arith.constant 0 : i32
    %c0_i32_1 = arith.constant 0 : i32
    return %c0_i32, %c0_i32_0 : i32, i32
  }
  func.func @transform_5(%arg0: i32) -> (i32, i32) {
    %c0_i32 = arith.constant 0 : i32
    %c0_i32_0 = arith.constant 0 : i32
    %c0_i32_1 = arith.constant 0 : i32
    return %c0_i32, %c0_i32_0 : i32, i32
  }
  func.func @transform_6(%arg0: i32) -> (i32, i32) {
    %c0_i32 = arith.constant 0 : i32
    %c0_i32_0 = arith.constant 0 : i32
    %c0_i32_1 = arith.constant 0 : i32
    return %c0_i32, %c0_i32_0 : i32, i32
  }
  func.func @transform_7(%arg0: i32) -> (i32, i32) {
    %c0_i32 = arith.constant 0 : i32
    %c0_i32_0 = arith.constant 0 : i32
    %c0_i32_1 = arith.constant 0 : i32
    return %c0_i32, %c0_i32_0 : i32, i32
  }
  func.func @transform_8(%arg0: i32) -> (i32, i32) {
    %c0_i32 = arith.constant 0 : i32
    %c0_i32_0 = arith.constant 0 : i32
    %c0_i32_1 = arith.constant 0 : i32
    return %c0_i32, %c0_i32_0 : i32, i32
  }
  func.func @transform_9(%arg0: i32) -> (i32, i32) {
    %c0_i32 = arith.constant 0 : i32
    %c0_i32_0 = arith.constant 0 : i32
    %c0_i32_1 = arith.constant 0 : i32
    return %c0_i32, %c0_i32_0 : i32, i32
  }
  func.func @transform_10(%arg0: i32) -> (i32, i32) {
    %c0_i32 = arith.constant 0 : i32
    %c0_i32_0 = arith.constant 0 : i32
    %c0_i32_1 = arith.constant 0 : i32
    return %c0_i32, %c0_i32_0 : i32, i32
  }
  func.func @transform_11(%arg0: i32) -> (i32, i32, i32) {
    %c0_i32 = arith.constant 0 : i32
    %c0_i32_0 = arith.constant 0 : i32
    %c0_i32_1 = arith.constant 0 : i32
    return %arg0, %c0_i32, %c0_i32_0 : i32, i32, i32
  }
}

</mosaic_0001>

<bundles_post_ra>
// kernel: net_forward.1
= control target key start
LH: loop header
LB: loop body
LE: loop exit
PB: predicated region body
PF: predicated region fallthrough
CT: control target
= control target key end

     0   :  { %s9313_s0 = inlined_call_operand.vmem [shape: f32[2,1,896], index: 0, kind: input, shape index: {}]   ;;  %s9314_s1 = inlined_call_operand.vmem [shape: f32[16,25], index: 1, kind: input, shape index: {}]   ;;  %s9315_s2 = inlined_call_operand.vmem [shape: f32[16,1], index: 2, kind: input, shape index: {}]   ;;  %s9316_s3 = inlined_call_operand.vmem [shape: bf16[640,160], index: 3, kind: input, shape index: {}]   ;;  %s9317_s4 = inlined_call_operand.vmem [shape: bf16[32,400], index: 4, kind: input, shape index: {}]   ;;  %s9318_s5 = inlined_call_operand.vmem [shape: f32[32,1], index: 5, kind: input, shape index: {}]   ;;  %s9319_s6 = inlined_call_operand.vmem [shape: bf16[80,16], index: 6, kind: input, shape index: {}]   ;;  %s9320_s7 = inlined_call_operand.vmem [shape: bf16[320,64], index: 7, kind: input, shape index: {}]   ;;  %s9321_s8 = inlined_call_operand.vmem [shape: f32[1,64], index: 8, kind: input, shape index: {}]   ;;  %s9322_s9 = inlined_call_operand.vmem [shape: bf16[64,10], index: 9, kind: input, shape index: {}]   ;;  %s9323_s10 = inlined_call_operand.vmem [shape: f32[1,10], index: 10, kind: input, shape index: {}]   ;;  %s9324_s11 = inlined_call_operand.hbm [shape: f32[2,1,10], index: 11, kind: output, shape index: {}]  }
   0x1   :  { %9540 = sst [smem:[#allocation210_spill]] %s9313_s0 }
   0x2   :  { %9541 = sst [smem:[#allocation211_spill]] %s9314_s1 }
   0x3   :  { %16 = vsyncpa [#allocation3], 0 }
   0x4   :  { %18 = vsyncpa [#allocation3 + $0x1], 0  ;;  %s5686_s17 = smov 0   ;;  %s5688_s18 = smov 0  }
   0x5   :  { %s5690_s19 = smov 0   ;;  %s5692_s20 = smov 0  }
   0x6 LB: > { %s5707_s21 = sadd.s32 4294967295, %s5559_s20   ;;  %s4430_s22 = sadd.s32 4294967294, %s5559_s20   ;;  %s5559_s20 = sphi %s5692_s20, %s10099_s20   ;;  %s5555_s19 = sphi %s5690_s19, %s10098_s19   ;;  %s5551_s18 = sphi %s5688_s18, %s10097_s18   ;;  %s5547_s17 = sphi %s5686_s17, %s10096_s17  }
   0x7   : > { %s5711_s23 = sadd.s32 1, %s5559_s20   ;;  %s267_s24 = sadd.s32 1, %s5555_s19 }
   0x8   : > { %s264_s25 = ssub.s32 %s5559_s20, %s5711_s23  ;;  %p277_p0 = scmp.ne.s32.totalorder %s5555_s19, %s5551_s18 }
   0x9   : > { %p265_p1 = scmp.eq.s32.totalorder %s264_s25, 0  ;;  %p278_p2 = scmp.eq.s32.totalorder %s5707_s21, 1 }
   0xa   : > { %p283_p3 = scmp.ne.s32.totalorder %s5551_s18, %s5547_s17  ;;  %p284_p4 = scmp.eq.s32.totalorder %s4430_s22, 1 }
   0xb   : > { %s5722_s26 = scalar_select %p265_p1, %s5555_s19, %s267_s24  }
   0xc   : > { %p5724_p5 = por %p278_p2, %p277_p0  ;;  %p5728_p6 = por %p284_p4, %p283_p3 }
   0xd   : > { %p4433_p7 = scmp.ge.s32.totalorder %s5559_s20, 1  ;;  %p339_p8 = scmp.lt.s32.totalorder %s5559_s20, 3 }
   0xf   : > { %p340_p9 = pnand %p4433_p7, %p339_p8 }
  0x11   : > { %343 = sbr.rel (%p340_p9) target bundleno = 3610 (0xe1a), region = 64 }
  0x16   : > { %s9544_s1 = sld [smem:[#allocation211_spill]]  ;;  %v5561_v1 = vmov 1   ;;  %v5562_v2 = vmov 3   ;;  %v5563_v4 = vmov 2   ;;  %p377_p10 = scmp.lt.s32.totalorder %s5707_s21, 1  ;;  %v5566_v38 = vmov 4  }
  0x17   : > { %5132 = vset.pattern.permute.xlu1 %v5561_v1  ;;  %5135 = vset.pattern.permute.xlu0 %v5562_v2  ;;  %s9545_s0 = sld [smem:[#allocation210_spill]]  ;;  %s9533_s25 = smov 127   ;;  %vm476_vm0 = vcmask 1039360   ;;  %vm9528_vm1 = vcmask 1031168   ;;  %vm658_vm2 = vcmask 1022976   ;;  %vm749_vm3 = vcmask 1014784  }
  0x18   : > { %5134 = vset.pattern.permute.xlu2 %v5563_v4  ;;  %s378_s14 = scalar_select %p377_p10, %s5707_s21, 1  ;;  %vm840_vm4 = vcmask 818176   ;;  %vm931_vm5 = vcmask 809984   ;;  %vm1022_vm6 = vcmask 801792   ;;  %vm1113_vm7 = vcmask 793600  }
  0x19   : > { %s9535_s29 = smov 126   ;;  %s9537_s30 = smov 125   ;;  %vm1204_vm8 = vcmask 785408   ;;  %vm1295_vm9 = vcmask 588800   ;;  %vm1386_vm10 = vcmask 580608   ;;  %vm1477_vm11 = vcmask 572416  }
  0x1a   : > { %s5027_s15 = smul.u32 7, %s378_s14  ;;  %s9379_s12 = smov 124   ;;  %vm1568_vm12 = vcmask 564224   ;;  %vm2316_vm13 = vcmask 121856   ;;  %vm1659_vm14 = vcmask 556032   ;;  %vm1750_vm15 = vcmask 359424  }
  0x1b   : > { %s9539_s13 = smov 100   ;;  %s5573_s14 = smov 99  }
  0x1c   : > { %v5737_v0 = vld [vmem:[%s9544_s1] sm:$0xff]  ;;  %v5744_v3 = vld [vmem:[%s9544_s1 + $0x8] sm:$0xff]  ;;  %s5578_s16 = smov 97   ;;  %s9395_s22 = smov 96  }
  0x1d   : > { %421 = vperm.xlu1 %5132, %v5737_v0   ;;  %603 = vperm.xlu0 %5135, %v5737_v0   ;;  %s5755_s24 = scalar_lea.vmem %s9545_s0, %s5027_s15  ;;  %s5575_s15 = smov 98  }
  0x1e   : > { %516 = vperm.xlu2 %5134, %v5744_v3   ;;  %v382_v5 = vld [vmem:[%s5755_s24] sm:$0xff]  ;;  %s5613_s1 = smov 117   ;;  %s10090_s0 = smov 100  }
  0x1f   : > { %v5758_v6 = vperm.slane %v382_v5, 3  ;;  %v5760_v7 = vperm.slane %v382_v5, 2  ;;  %v5762_v8 = vperm.slane %v382_v5, 0  ;;  %v5770_v13 = vperm.slane %v382_v5, 5 }
  0x20   : > { %v5772_v14 = vperm.slane %v382_v5, 1  ;;  %v5780_v19 = vperm.slane %v382_v5, 4 }
  0x21   : > { %9546 = vst [vmem:[#allocation5_spill] sm:$0xff] %v5758_v6 }
  0x22   : > { %9547 = vst [vmem:[#allocation6_spill] sm:$0xff] %v5762_v8 }
  0x23   : > { %9548 = vst [vmem:[#allocation7_spill] sm:$0xff] %v5770_v13 }
  0x24   : > { %9549 = vst [vmem:[#allocation8_spill] sm:$0xff] %v5772_v14 }
  0x25   : > { %425 = vperm.xlu1 %5132, %v5744_v3   ;;  %5137 = vset.pattern.permute.xlu0 %v5566_v38 }
  0x2d   : > { %5133 = vset.pattern.permute.xlu1 %v5563_v4 }
  0x2e   : > { %512 = vperm.xlu1 %5133, %v5737_v0  }
  0x36   : > { %5136 = vset.pattern.permute.xlu1 %v5562_v2 }
  0x37   : > { %607 = vperm.xlu1 %5136, %v5744_v3  }
  0x3f   : > { %5138 = vset.pattern.permute.xlu1 %v5566_v38 }
  0x78   : > { %v517_v30 = vpop.permute.xlu2 %516 }
  0x79   : > { %v526_v31 = vmul.f32 %v517_v30, %v5772_v14  ;;  %v525_v34 = vmul.f32 %v517_v30, %v5762_v8  ;;  %v529_v35 = vmul.f32 %v517_v30, %v5780_v19  ;;  %v528_v40 = vmul.f32 %v517_v30, %v5758_v6 }
  0x7a   : > { %v527_v41 = vmul.f32 %v517_v30, %v5760_v7  ;;  %v530_v44 = vmul.f32 %v517_v30, %v5770_v13 }
  0x8f   : > { %v422_v9 = vpop.permute.xlu1 %421  ;;  %v604_v37 = vpop.permute.xlu0 %603 }
  0x90   : > { %v431_v10 = vmul.f32 %v422_v9, %v5758_v6  ;;  %v430_v11 = vmul.f32 %v422_v9, %v5760_v7  ;;  %v428_v12 = vmul.f32 %v422_v9, %v5762_v8  ;;  %v433_v16 = vmul.f32 %v422_v9, %v5770_v13 }
  0x91   : > { %v429_v18 = vmul.f32 %v422_v9, %v5772_v14  ;;  %v432_v22 = vmul.f32 %v422_v9, %v5780_v19  ;;  %v611_v39 = vmul.f32 %v604_v37, %v5772_v14  ;;  %v613_v42 = vmul.f32 %v604_v37, %v5758_v6 }
  0x92   : > { %458 = vrot.lane.b32.xlu1 %v431_v10, %s9533_s25  ;;  %456 = vrot.lane.b32.xlu0 %v430_v11, %s9533_s25  ;;  %v614_v43 = vmul.f32 %v604_v37, %v5780_v19  ;;  %v610_v48 = vmul.f32 %v604_v37, %v5762_v8  ;;  %v612_v51 = vmul.f32 %v604_v37, %v5760_v7 }
  0x93   : > { %452 = vrot.lane.b32.xlu2 %v428_v12, %s9533_s25  ;;  %v615_v52 = vmul.f32 %v604_v37, %v5770_v13 }
  0x97   : > { %v426_v15 = vpop.permute.xlu1 %425 }
  0x98   : > { %v434_v17 = vmul.f32 %v426_v15, %v5762_v8  ;;  %v436_v20 = vmul.f32 %v426_v15, %v5760_v7  ;;  %v437_v21 = vmul.f32 %v426_v15, %v5758_v6  ;;  %v439_v25 = vmul.f32 %v426_v15, %v5770_v13 }
  0x99   : > { %v435_v26 = vmul.f32 %v426_v15, %v5772_v14  ;;  %v438_v29 = vmul.f32 %v426_v15, %v5780_v19 }
  0x9a   : > { %462 = vrot.lane.b32.xlu0 %v433_v16, %s9533_s25  ;;  %464 = vrot.lane.b32.xlu1 %v434_v17, %s9533_s25 }
  0x9b   : > { %454 = vrot.lane.b32.xlu2 %v429_v18, %s9533_s25  ;;  %v5568_v18 = vmov 5  }
  0xa0   : > { %v513_v23 = vpop.permute.xlu1 %512 }
  0xa1   : > { %v520_v24 = vmul.f32 %v513_v23, %v5772_v14  ;;  %v519_v27 = vmul.f32 %v513_v23, %v5762_v8  ;;  %v523_v28 = vmul.f32 %v513_v23, %v5780_v19  ;;  %v522_v32 = vmul.f32 %v513_v23, %v5758_v6 }
  0xa2   : > { %468 = vrot.lane.b32.xlu0 %v436_v20, %s9533_s25  ;;  %470 = vrot.lane.b32.xlu1 %v437_v21, %s9533_s25  ;;  %v521_v33 = vmul.f32 %v513_v23, %v5760_v7  ;;  %v524_v36 = vmul.f32 %v513_v23, %v5770_v13 }
  0xa3   : > { %460 = vrot.lane.b32.xlu2 %v432_v22, %s9533_s25 }
  0xa9   : > { %v608_v45 = vpop.permute.xlu1 %607 }
  0xaa   : > { %474 = vrot.lane.b32.xlu0 %v439_v25, %s9533_s25  ;;  %545 = vrot.lane.b32.xlu1 %v520_v24, %s9535_s29  ;;  %v616_v46 = vmul.f32 %v608_v45, %v5762_v8  ;;  %v617_v47 = vmul.f32 %v608_v45, %v5772_v14  ;;  %v619_v49 = vmul.f32 %v608_v45, %v5758_v6 }
  0xab   : > { %466 = vrot.lane.b32.xlu2 %v435_v26, %s9533_s25  ;;  %v620_v50 = vmul.f32 %v608_v45, %v5780_v19  ;;  %v618_v53 = vmul.f32 %v608_v45, %v5760_v7  ;;  %v621_v54 = vmul.f32 %v608_v45, %v5770_v13 }
  0xb2   : > { %543 = vrot.lane.b32.xlu0 %v519_v27, %s9535_s29  ;;  %551 = vrot.lane.b32.xlu1 %v523_v28, %s9535_s29 }
  0xb3   : > { %472 = vrot.lane.b32.xlu2 %v438_v29, %s9533_s25 }
  0xba   : > { %549 = vrot.lane.b32.xlu0 %v522_v32, %s9535_s29  ;;  %557 = vrot.lane.b32.xlu1 %v526_v31, %s9535_s29 }
  0xbb   : > { %547 = vrot.lane.b32.xlu2 %v521_v33, %s9535_s29 }
  0xc2   : > { %555 = vrot.lane.b32.xlu0 %v525_v34, %s9535_s29  ;;  %563 = vrot.lane.b32.xlu1 %v529_v35, %s9535_s29 }
  0xc3   : > { %553 = vrot.lane.b32.xlu2 %v524_v36, %s9535_s29 }
  0xca   : > { %561 = vrot.lane.b32.xlu0 %v528_v40, %s9535_s29  ;;  %636 = vrot.lane.b32.xlu1 %v611_v39, %s9537_s30  ;;  %v5570_v40 = vmov 6  }
  0xcb   : > { %559 = vrot.lane.b32.xlu2 %v527_v41, %s9535_s29 }
  0xd2   : > { %640 = vrot.lane.b32.xlu0 %v613_v42, %s9537_s30  ;;  %642 = vrot.lane.b32.xlu1 %v614_v43, %s9537_s30 }
  0xd3   : > { %565 = vrot.lane.b32.xlu2 %v530_v44, %s9535_s29  ;;  %s5612_s29 = smov 116  }
  0xda   : > { %646 = vrot.lane.b32.xlu0 %v616_v46, %s9537_s30  ;;  %648 = vrot.lane.b32.xlu1 %v617_v47, %s9537_s30 }
  0xdb   : > { %634 = vrot.lane.b32.xlu2 %v610_v48, %s9537_s30 }
  0xe2   : > { %652 = vrot.lane.b32.xlu0 %v619_v49, %s9537_s30  ;;  %654 = vrot.lane.b32.xlu1 %v620_v50, %s9537_s30 }
  0xe3   : > { %638 = vrot.lane.b32.xlu2 %v612_v51, %s9537_s30 }
  0xea   : > { %694 = vperm.xlu0 %5137, %v5737_v0   ;;  %698 = vperm.xlu1 %5138, %v5744_v3  }
  0xeb   : > { %644 = vrot.lane.b32.xlu2 %v615_v52, %s9537_s30 }
  0xf2   : > { %5139 = vset.pattern.permute.xlu0 %v5568_v18  ;;  %5140 = vset.pattern.permute.xlu1 %v5568_v18 }
  0xf3   : > { %650 = vrot.lane.b32.xlu2 %v618_v53, %s9537_s30 }
  0xfb   : > { %656 = vrot.lane.b32.xlu2 %v621_v54, %s9537_s30  ;;  %s5616_s30 = smov 101  }
 0x104   : > { %v5844_v55 = vpop.permute.xlu1 %458  ;;  %v5846_v56 = vpop.permute.xlu0 %456 }
 0x10c   : > { %v5848_v57 = vpop.permute.xlu0 %462  ;;  %v5850_v58 = vpop.permute.xlu1 %464 }
 0x10d   : > { %9550 = vst [vmem:[#allocation9_spill] sm:$0xff] %v5848_v57 }
 0x114   : > { %v5852_v59 = vpop.permute.xlu0 %468  ;;  %v5854_v60 = vpop.permute.xlu1 %470 }
 0x11c   : > { %v5856_v61 = vpop.permute.xlu0 %474  ;;  %v5858_v62 = vpop.permute.xlu1 %545 }
 0x124   : > { %v5860_v63 = vpop.permute.xlu0 %543  ;;  %v5862_v1 = vpop.permute.xlu1 %551 }
 0x12c   : > { %v5864_v2 = vpop.permute.xlu0 %549  ;;  %v5866_v4 = vpop.permute.xlu1 %557 }
 0x134   : > { %v5868_v5 = vpop.permute.xlu0 %555  ;;  %v5870_v9 = vpop.permute.xlu1 %563 }
 0x135   : > { %9551 = vst [vmem:[#allocation10_spill] sm:$0xff] %v5870_v9 }
 0x13c   : > { %v5872_v10 = vpop.permute.xlu0 %561  ;;  %v5874_v11 = vpop.permute.xlu1 %636 }
 0x13d   : > { %9552 = vst [vmem:[#allocation11_spill] sm:$0xff] %v5872_v10 }
 0x13e   : > { %9553 = vst [vmem:[#allocation12_spill] sm:$0xff] %v5874_v11 }
 0x144   : > { %v5876_v12 = vpop.permute.xlu0 %640  ;;  %v5878_v15 = vpop.permute.xlu1 %642 }
 0x145   : > { %9554 = vst [vmem:[#allocation13_spill] sm:$0xff] %v5876_v12 }
 0x146   : > { %9555 = vst [vmem:[#allocation14_spill] sm:$0xff] %v5878_v15 }
 0x14c   : > { %v5880_v16 = vpop.permute.xlu0 %646  ;;  %v5882_v17 = vpop.permute.xlu1 %648 }
 0x14d   : > { %9556 = vst [vmem:[#allocation15_spill] sm:$0xff] %v5880_v16 }
 0x14e   : > { %9557 = vst [vmem:[#allocation16_spill] sm:$0xff] %v5882_v17 }
 0x154   : > { %v5884_v20 = vpop.permute.xlu0 %652  ;;  %v5886_v21 = vpop.permute.xlu1 %654 }
 0x155   : > { %9558 = vst [vmem:[#allocation17_spill] sm:$0xff] %v5884_v20 }
 0x156   : > { %9559 = vst [vmem:[#allocation18_spill] sm:$0xff] %v5886_v21 }
 0x15c   : > { %v695_v22 = vpop.permute.xlu0 %694  ;;  %v699_v26 = vpop.permute.xlu1 %698 }
 0x15d   : > { %v704_v23 = vmul.f32 %v695_v22, %v5758_v6  ;;  %v702_v24 = vmul.f32 %v695_v22, %v5772_v14  ;;  %v701_v25 = vmul.f32 %v695_v22, %v5762_v8  ;;  %v707_v27 = vmul.f32 %v699_v26, %v5762_v8 }
 0x15e   : > { %v705_v28 = vmul.f32 %v695_v22, %v5780_v19  ;;  %v703_v29 = vmul.f32 %v695_v22, %v5760_v7  ;;  %v708_v30 = vmul.f32 %v699_v26, %v5772_v14  ;;  %v710_v31 = vmul.f32 %v699_v26, %v5758_v6 }
 0x15f   : > { %731 = vrot.lane.b32.xlu0 %v704_v23, %s9379_s12  ;;  %727 = vrot.lane.b32.xlu1 %v702_v24, %s9379_s12  ;;  %v706_v32 = vmul.f32 %v695_v22, %v5770_v13  ;;  %v711_v33 = vmul.f32 %v699_v26, %v5780_v19  ;;  %v709_v34 = vmul.f32 %v699_v26, %v5760_v7 }
 0x160   : > { %725 = vrot.lane.b32.xlu2 %v701_v25, %s9379_s12  ;;  %v712_v35 = vmul.f32 %v699_v26, %v5770_v13 }
 0x167   : > { %733 = vrot.lane.b32.xlu1 %v705_v28, %s9379_s12  ;;  %737 = vrot.lane.b32.xlu0 %v707_v27, %s9379_s12  ;;  %v5572_v28 = vmov 7  }
 0x168   : > { %729 = vrot.lane.b32.xlu2 %v703_v29, %s9379_s12 }
 0x16f   : > { %739 = vrot.lane.b32.xlu1 %v708_v30, %s9379_s12  ;;  %743 = vrot.lane.b32.xlu0 %v710_v31, %s9379_s12 }
 0x170   : > { %735 = vrot.lane.b32.xlu2 %v706_v32, %s9379_s12 }
 0x177   : > { %745 = vrot.lane.b32.xlu1 %v711_v33, %s9379_s12  ;;  %785 = vperm.xlu0 %5139, %v5737_v0  }
 0x178   : > { %741 = vrot.lane.b32.xlu2 %v709_v34, %s9379_s12 }
 0x17f   : > { %789 = vperm.xlu1 %5140, %v5744_v3   ;;  %5141 = vset.pattern.permute.xlu0 %v5570_v40 }
 0x180   : > { %747 = vrot.lane.b32.xlu2 %v712_v35, %s9379_s12  ;;  %s5597_s12 = smov 70  }
 0x187   : > { %5142 = vset.pattern.permute.xlu1 %v5570_v40 }
 0x1d1   : > { %v5914_v36 = vpop.permute.xlu0 %731  ;;  %v5916_v37 = vpop.permute.xlu1 %727 }
 0x1d2   : > { %9560 = vst [vmem:[#allocation19_spill] sm:$0xff] %v5914_v36 }
 0x1d3   : > { %9561 = vst [vmem:[#allocation20_spill] sm:$0xff] %v5916_v37 }
 0x1d9   : > { %v5918_v38 = vpop.permute.xlu0 %737  ;;  %v5920_v39 = vpop.permute.xlu1 %733 }
 0x1da   : > { %9562 = vst [vmem:[#allocation21_spill] sm:$0xff] %v5918_v38  ;;  %v5588_v38 = vmov 24  }
 0x1db   : > { %9563 = vst [vmem:[#allocation22_spill] sm:$0xff] %v5920_v39 }
 0x1e1   : > { %v5922_v41 = vpop.permute.xlu0 %743  ;;  %v5924_v42 = vpop.permute.xlu1 %739 }
 0x1e2   : > { %9564 = vst [vmem:[#allocation23_spill] sm:$0xff] %v5922_v41 }
 0x1e3   : > { %9565 = vst [vmem:[#allocation24_spill] sm:$0xff] %v5924_v42 }
 0x1e9   : > { %v786_v43 = vpop.permute.xlu0 %785  ;;  %v5926_v44 = vpop.permute.xlu1 %745 }
 0x1ea   : > { %9566 = vst [vmem:[#allocation25_spill] sm:$0xff] %v5926_v44  ;;  %v795_v45 = vmul.f32 %v786_v43, %v5758_v6  ;;  %v793_v46 = vmul.f32 %v786_v43, %v5772_v14  ;;  %v792_v47 = vmul.f32 %v786_v43, %v5762_v8  ;;  %v796_v49 = vmul.f32 %v786_v43, %v5780_v19 }
 0x1eb   : > { %v794_v51 = vmul.f32 %v786_v43, %v5760_v7  ;;  %v797_v54 = vmul.f32 %v786_v43, %v5770_v13 }
 0x1ec   : > { %822 = vrot.lane.b32.xlu0 %v795_v45, %s9539_s13  ;;  %818 = vrot.lane.b32.xlu1 %v793_v46, %s9539_s13 }
 0x1ed   : > { %816 = vrot.lane.b32.xlu2 %v792_v47, %s9539_s13 }
 0x1f1   : > { %v790_v48 = vpop.permute.xlu1 %789 }
 0x1f2   : > { %v798_v50 = vmul.f32 %v790_v48, %v5762_v8  ;;  %v799_v52 = vmul.f32 %v790_v48, %v5772_v14  ;;  %v801_v53 = vmul.f32 %v790_v48, %v5758_v6  ;;  %v802_v18 = vmul.f32 %v790_v48, %v5780_v19 }
 0x1f3   : > { %v800_v22 = vmul.f32 %v790_v48, %v5760_v7  ;;  %v803_v23 = vmul.f32 %v790_v48, %v5770_v13 }
 0x1f4   : > { %824 = vrot.lane.b32.xlu1 %v796_v49, %s9539_s13  ;;  %828 = vrot.lane.b32.xlu0 %v798_v50, %s9539_s13 }
 0x1f5   : > { %820 = vrot.lane.b32.xlu2 %v794_v51, %s9539_s13 }
 0x1fc   : > { %830 = vrot.lane.b32.xlu1 %v799_v52, %s9539_s13  ;;  %834 = vrot.lane.b32.xlu0 %v801_v53, %s9539_s13  ;;  %v5982_v53 = vpop.permute.xlu2 %452 }
 0x1fd   : > { %826 = vrot.lane.b32.xlu2 %v797_v54, %s9539_s13 }
 0x204   : > { %836 = vrot.lane.b32.xlu1 %v802_v18, %s9539_s13  ;;  %876 = vperm.xlu0 %5141, %v5737_v0   ;;  %v5984_v54 = vpop.permute.xlu2 %454 }
 0x205   : > { %832 = vrot.lane.b32.xlu2 %v800_v22, %s9539_s13 }
 0x20c   : > { %880 = vperm.xlu1 %5142, %v5744_v3   ;;  %5143 = vset.pattern.permute.xlu0 %v5572_v28  ;;  %v5986_v18 = vpop.permute.xlu2 %460 }
 0x20d   : > { %838 = vrot.lane.b32.xlu2 %v803_v23, %s9539_s13 }
 0x214   : > { %5144 = vset.pattern.permute.xlu1 %v5572_v28  ;;  %v5988_v22 = vpop.permute.xlu2 %466 }
 0x21c   : > { %v5990_v23 = vpop.permute.xlu2 %472 }
 0x224   : > { %v5992_v28 = vpop.permute.xlu2 %547 }
 0x25e   : > { %v5954_v24 = vpop.permute.xlu0 %822  ;;  %v5956_v25 = vpop.permute.xlu1 %818 }
 0x25f   : > { %9567 = vst [vmem:[#allocation26_spill] sm:$0xff] %v5954_v24 }
 0x260   : > { %9568 = vst [vmem:[#allocation27_spill] sm:$0xff] %v5956_v25  ;;  %v5577_v25 = vmov 10  }
 0x266   : > { %v5958_v26 = vpop.permute.xlu0 %828  ;;  %v5960_v27 = vpop.permute.xlu1 %824 }
 0x267   : > { %9569 = vst [vmem:[#allocation28_spill] sm:$0xff] %v5958_v26 }
 0x268   : > { %9570 = vst [vmem:[#allocation29_spill] sm:$0xff] %v5960_v27 }
 0x26e   : > { %v5962_v29 = vpop.permute.xlu0 %834  ;;  %v5964_v30 = vpop.permute.xlu1 %830 }
 0x26f   : > { %9571 = vst [vmem:[#allocation30_spill] sm:$0xff] %v5962_v29  ;;  %v5576_v29 = vmov 9  }
 0x270   : > { %9572 = vst [vmem:[#allocation31_spill] sm:$0xff] %v5964_v30  ;;  %5147 = vset.pattern.permute.xlu2 %v5576_v29 }
 0x276   : > { %v877_v31 = vpop.permute.xlu0 %876  ;;  %v5966_v32 = vpop.permute.xlu1 %836 }
 0x277   : > { %9573 = vst [vmem:[#allocation32_spill] sm:$0xff] %v5966_v32  ;;  %v886_v33 = vmul.f32 %v877_v31, %v5758_v6  ;;  %v884_v34 = vmul.f32 %v877_v31, %v5772_v14  ;;  %v883_v35 = vmul.f32 %v877_v31, %v5762_v8  ;;  %v887_v43 = vmul.f32 %v877_v31, %v5780_v19 }
 0x278   : > { %v885_v46 = vmul.f32 %v877_v31, %v5760_v7  ;;  %v888_v49 = vmul.f32 %v877_v31, %v5770_v13  ;;  %v5994_v31 = vpop.permute.xlu2 %553 }
 0x279   : > { %913 = vrot.lane.b32.xlu0 %v886_v33, %s5573_s14  ;;  %909 = vrot.lane.b32.xlu1 %v884_v34, %s5573_s14  ;;  %9574 = vst [vmem:[#allocation33_spill] sm:$0xff] %v5994_v31 }
 0x27a   : > { %907 = vrot.lane.b32.xlu2 %v883_v35, %s5573_s14 }
 0x27e   : > { %v881_v40 = vpop.permute.xlu1 %880 }
 0x27f   : > { %v889_v45 = vmul.f32 %v881_v40, %v5762_v8  ;;  %v890_v47 = vmul.f32 %v881_v40, %v5772_v14  ;;  %v892_v48 = vmul.f32 %v881_v40, %v5758_v6  ;;  %v893_v50 = vmul.f32 %v881_v40, %v5780_v19 }
 0x280   : > { %v891_v51 = vmul.f32 %v881_v40, %v5760_v7  ;;  %v894_v52 = vmul.f32 %v881_v40, %v5770_v13  ;;  %v5996_v33 = vpop.permute.xlu2 %559 }
 0x281   : > { %915 = vrot.lane.b32.xlu1 %v887_v43, %s5573_s14  ;;  %919 = vrot.lane.b32.xlu0 %v889_v45, %s5573_s14 }
 0x282   : > { %911 = vrot.lane.b32.xlu2 %v885_v46, %s5573_s14  ;;  %v5574_v46 = vmov 8  }
 0x288   : > { %v6006_v45 = vpop.permute.xlu2 %565 }
 0x289   : > { %921 = vrot.lane.b32.xlu1 %v890_v47, %s5573_s14  ;;  %925 = vrot.lane.b32.xlu0 %v892_v48, %s5573_s14 }
 0x28a   : > { %917 = vrot.lane.b32.xlu2 %v888_v49, %s5573_s14 }
 0x290   : > { %v6012_v49 = vpop.permute.xlu2 %634 }
 0x291   : > { %927 = vrot.lane.b32.xlu1 %v893_v50, %s5573_s14  ;;  %967 = vperm.xlu0 %5143, %v5737_v0   ;;  %9581 = vst [vmem:[#allocation40_spill] sm:$0xff] %v6012_v49 }
 0x292   : > { %923 = vrot.lane.b32.xlu2 %v891_v51, %s5573_s14 }
 0x299   : > { %971 = vperm.xlu1 %5144, %v5744_v3   ;;  %5145 = vset.pattern.permute.xlu0 %v5574_v46 }
 0x29a   : > { %929 = vrot.lane.b32.xlu2 %v894_v52, %s5573_s14  ;;  %s5595_s14 = smov 72  }
 0x2a1   : > { %5146 = vset.pattern.permute.xlu1 %v5574_v46  ;;  %v6019_v46 = vpop.permute.xlu2 %638 }
 0x2a2   : > { %9583 = vst [vmem:[#allocation42_spill] sm:$0xff] %v6019_v46 }
 0x2eb   : > { %v5998_v34 = vpop.permute.xlu0 %913  ;;  %v6000_v35 = vpop.permute.xlu1 %909 }
 0x2ec   : > { %9575 = vst [vmem:[#allocation34_spill] sm:$0xff] %v5998_v34 }
 0x2ed   : > { %9576 = vst [vmem:[#allocation35_spill] sm:$0xff] %v6000_v35 }
 0x2f3   : > { %v6002_v40 = vpop.permute.xlu0 %919  ;;  %v6004_v43 = vpop.permute.xlu1 %915 }
 0x2f4   : > { %9577 = vst [vmem:[#allocation36_spill] sm:$0xff] %v6002_v40 }
 0x2f5   : > { %9578 = vst [vmem:[#allocation37_spill] sm:$0xff] %v6004_v43 }
 0x2fb   : > { %v6008_v47 = vpop.permute.xlu0 %925  ;;  %v6010_v48 = vpop.permute.xlu1 %921 }
 0x2fc   : > { %9579 = vst [vmem:[#allocation38_spill] sm:$0xff] %v6008_v47 }
 0x2fd   : > { %9580 = vst [vmem:[#allocation39_spill] sm:$0xff] %v6010_v48 }
 0x303   : > { %v968_v50 = vpop.permute.xlu0 %967  ;;  %v6014_v51 = vpop.permute.xlu1 %927 }
 0x304   : > { %9582 = vst [vmem:[#allocation41_spill] sm:$0xff] %v6014_v51  ;;  %v977_v52 = vmul.f32 %v968_v50, %v5758_v6  ;;  %v975_v40 = vmul.f32 %v968_v50, %v5772_v14  ;;  %v974_v43 = vmul.f32 %v968_v50, %v5762_v8  ;;  %v978_v48 = vmul.f32 %v968_v50, %v5780_v19  ;;  %v6024_v51 = vpop.permute.xlu2 %644 }
 0x305   : > { %v976_v34 = vmul.f32 %v968_v50, %v5760_v7  ;;  %9584 = vst [vmem:[#allocation43_spill] sm:$0xff] %v6024_v51 }
 0x306   : > { %1004 = vrot.lane.b32.xlu0 %v977_v52, %s5575_s15  ;;  %1000 = vrot.lane.b32.xlu1 %v975_v40, %s5575_s15  ;;  %v979_v40 = vmul.f32 %v968_v50, %v5770_v13 }
 0x307   : > { %998 = vrot.lane.b32.xlu2 %v974_v43, %s5575_s15 }
 0x30b   : > { %v972_v47 = vpop.permute.xlu1 %971 }
 0x30c   : > { %v980_v35 = vmul.f32 %v972_v47, %v5762_v8  ;;  %v981_v32 = vmul.f32 %v972_v47, %v5772_v14  ;;  %v983_v52 = vmul.f32 %v972_v47, %v5758_v6  ;;  %v6029_v43 = vpop.permute.xlu2 %650  ;;  %v984_v26 = vmul.f32 %v972_v47, %v5780_v19 }
 0x30d   : > { %9585 = vst [vmem:[#allocation44_spill] sm:$0xff] %v6029_v43  ;;  %v982_v30 = vmul.f32 %v972_v47, %v5760_v7 }
 0x30e   : > { %1006 = vrot.lane.b32.xlu1 %v978_v48, %s5575_s15  ;;  %1010 = vrot.lane.b32.xlu0 %v980_v35, %s5575_s15 }
 0x30f   : > { %1002 = vrot.lane.b32.xlu2 %v976_v34, %s5575_s15  ;;  %v985_v34 = vmul.f32 %v972_v47, %v5770_v13 }
 0x314   : > { %v6035_v35 = vpop.permute.xlu2 %656 }
 0x315   : > { %9586 = vst [vmem:[#allocation45_spill] sm:$0xff] %v6035_v35 }
 0x316   : > { %1012 = vrot.lane.b32.xlu1 %v981_v32, %s5575_s15  ;;  %1016 = vrot.lane.b32.xlu0 %v983_v52, %s5575_s15 }
 0x317   : > { %1008 = vrot.lane.b32.xlu2 %v979_v40, %s5575_s15 }
 0x31c   : > { %v6038_v32 = vpop.permute.xlu2 %725 }
 0x31d   : > { %9587 = vst [vmem:[#allocation46_spill] sm:$0xff] %v6038_v32 }
 0x31e   : > { %1018 = vrot.lane.b32.xlu1 %v984_v26, %s5575_s15  ;;  %1058 = vperm.xlu0 %5145, %v5737_v0  }
 0x31f   : > { %1014 = vrot.lane.b32.xlu2 %v982_v30, %s5575_s15 }
 0x324   : > { %v6040_v48 = vpop.permute.xlu2 %729 }
 0x325   : > { %9588 = vst [vmem:[#allocation47_spill] sm:$0xff] %v6040_v48 }
 0x326   : > { %1062 = vperm.xlu1 %5146, %v5744_v3   ;;  %5148 = vset.pattern.permute.xlu0 %v5576_v29 }
 0x327   : > { %1020 = vrot.lane.b32.xlu2 %v985_v34, %s5575_s15  ;;  %s5596_s15 = smov 71  }
 0x32c   : > { %v6042_v50 = vpop.permute.xlu2 %735 }
 0x32d   : > { %9589 = vst [vmem:[#allocation48_spill] sm:$0xff] %v6042_v50 }
 0x32e   : > { %5149 = vset.pattern.permute.xlu1 %v5577_v25 }
 0x334   : > { %v6044_v52 = vpop.permute.xlu2 %741 }
 0x335   : > { %9590 = vst [vmem:[#allocation49_spill] sm:$0xff] %v6044_v52 }
 0x33c   : > { %v6046_v40 = vpop.permute.xlu2 %747 }
 0x33d   : > { %9591 = vst [vmem:[#allocation50_spill] sm:$0xff] %v6046_v40 }
 0x344   : > { %v6048_v26 = vpop.permute.xlu2 %816 }
 0x345   : > { %9592 = vst [vmem:[#allocation51_spill] sm:$0xff] %v6048_v26 }
 0x34c   : > { %v6050_v30 = vpop.permute.xlu2 %820 }
 0x34d   : > { %9593 = vst [vmem:[#allocation52_spill] sm:$0xff] %v6050_v30 }
 0x354   : > { %v6052_v47 = vpop.permute.xlu2 %826 }
 0x355   : > { %9594 = vst [vmem:[#allocation53_spill] sm:$0xff] %v6052_v47 }
 0x35c   : > { %v6056_v27 = vpop.permute.xlu2 %832 }
 0x35d   : > { %9596 = vst [vmem:[#allocation55_spill] sm:$0xff] %v6056_v27 }
 0x364   : > { %v6060_v44 = vpop.permute.xlu2 %838 }
 0x365   : > { %9598 = vst [vmem:[#allocation57_spill] sm:$0xff] %v6060_v44 }
 0x36c   : > { %v6064_v26 = vpop.permute.xlu2 %907 }
 0x36d   : > { %9600 = vst [vmem:[#allocation59_spill] sm:$0xff] %v6064_v26 }
 0x378   : > { %v6054_v34 = vpop.permute.xlu0 %1004  ;;  %v6103_v27 = vpop.permute.xlu1 %1000 }
 0x379   : > { %9595 = vst [vmem:[#allocation54_spill] sm:$0xff] %v6054_v34 }
 0x37a   : > { %9606 = vst [vmem:[#allocation65_spill] sm:$0xff] %v6103_v27 }
 0x380   : > { %v6058_v24 = vpop.permute.xlu0 %1010 }
 0x381   : > { %9597 = vst [vmem:[#allocation56_spill] sm:$0xff] %v6058_v24  ;;  %v6077_v24 = vpop.permute.xlu2 %911 }
 0x382   : > { %9601 = vst [vmem:[#allocation60_spill] sm:$0xff] %v6077_v24  ;;  %v5581_v24 = vmov 14  }
 0x388   : > { %v6062_v40 = vpop.permute.xlu0 %1016 }
 0x389   : > { %9599 = vst [vmem:[#allocation58_spill] sm:$0xff] %v6062_v40  ;;  %v6086_v44 = vpop.permute.xlu2 %917 }
 0x38a   : > { %9602 = vst [vmem:[#allocation61_spill] sm:$0xff] %v6086_v44  ;;  %v5584_v44 = vmov 19  }
 0x390   : > { %v6066_v30 = vpop.permute.xlu0 %1058 }
 0x391   : > { %v1068_v47 = vmul.f32 %v6066_v30, %v5758_v6  ;;  %v1066_v29 = vmul.f32 %v6066_v30, %v5772_v14  ;;  %v1065_v34 = vmul.f32 %v6066_v30, %v5762_v8  ;;  %v1069_v40 = vmul.f32 %v6066_v30, %v5780_v19 }
 0x392   : > { %v1067_v26 = vmul.f32 %v6066_v30, %v5760_v7  ;;  %v1070_v51 = vmul.f32 %v6066_v30, %v5770_v13 }
 0x393   : > { %1095 = vrot.lane.b32.xlu0 %v1068_v47, %s5578_s16  ;;  %1091 = vrot.lane.b32.xlu1 %v1066_v29, %s5578_s16  ;;  %v5579_v47 = vmov 12   ;;  %v6091_v29 = vpop.permute.xlu2 %923 }
 0x394   : > { %1089 = vrot.lane.b32.xlu2 %v1065_v34, %s5578_s16  ;;  %v5580_v34 = vmov 11   ;;  %9603 = vst [vmem:[#allocation62_spill] sm:$0xff] %v6091_v29  ;;  %v5583_v29 = vmov 13  }
 0x39b   : > { %1153 = vperm.xlu0 %5148, %v5744_v3   ;;  %1097 = vrot.lane.b32.xlu1 %v1069_v40, %s5578_s16  ;;  %v6096_v40 = vpop.permute.xlu2 %929 }
 0x39c   : > { %1093 = vrot.lane.b32.xlu2 %v1067_v26, %s5578_s16  ;;  %9604 = vst [vmem:[#allocation63_spill] sm:$0xff] %v6096_v40  ;;  %v5582_v26 = vmov 17   ;;  %v5586_v40 = vmov 22  }
 0x3a3   : > { %5153 = vset.pattern.permute.xlu0 %v5579_v47  ;;  %1240 = vperm.xlu1 %5149, %v5737_v0  }
 0x3a4   : > { %1149 = vperm.xlu2 %5147, %v5737_v0   ;;  %1422 = vperm.xlu0 %5153, %v5737_v0  }
 0x3ab   : > { %5151 = vset.pattern.permute.xlu1 %v5580_v34 }
 0x3ac   : > { %5150 = vset.pattern.permute.xlu2 %v5577_v25  ;;  %5158 = vset.pattern.permute.xlu0 %v5581_v24  ;;  %v6101_v25 = vpop.permute.xlu2 %998 }
 0x3ad   : > { %1331 = vperm.xlu1 %5151, %v5737_v0   ;;  %1244 = vperm.xlu2 %5150, %v5744_v3   ;;  %9605 = vst [vmem:[#allocation64_spill] sm:$0xff] %v6101_v25  ;;  %v5587_v25 = vmov 16  }
 0x3ae   : > { %1608 = vperm.xlu0 %5158, %v5744_v3  }
 0x3b5   : > { %5154 = vset.pattern.permute.xlu1 %v5579_v47  ;;  %5152 = vset.pattern.permute.xlu2 %v5580_v34  ;;  %v6108_v47 = vpop.permute.xlu2 %1002  ;;  %v5585_v34 = vmov 15  }
 0x3b6   : > { %5163 = vset.pattern.permute.xlu0 %v5582_v26  ;;  %1426 = vperm.xlu1 %5154, %v5744_v3   ;;  %9607 = vst [vmem:[#allocation66_spill] sm:$0xff] %v6108_v47  ;;  %v5589_v47 = vmov 0  }
 0x3b7   : > { %1335 = vperm.xlu2 %5152, %v5744_v3   ;;  %1877 = vperm.xlu0 %5163, %v5737_v0  }
 0x3bd   : > { %v6115_v27 = vpop.permute.xlu2 %1008 }
 0x3be   : > { %5156 = vset.pattern.permute.xlu1 %v5583_v29  ;;  %9609 = vst [vmem:[#allocation68_spill] sm:$0xff] %v6115_v27  ;;  %v5590_v27 = vmov 18  }
 0x3bf   : > { %5155 = vset.pattern.permute.xlu2 %v5583_v29  ;;  %5168 = vset.pattern.permute.xlu0 %v5584_v44  ;;  %v6111_v29 = vpop.permute.xlu1 %1006 }
 0x3c0   : > { %1517 = vperm.xlu1 %5156, %v5744_v3   ;;  %1513 = vperm.xlu2 %5155, %v5737_v0   ;;  %9608 = vst [vmem:[#allocation67_spill] sm:$0xff] %v6111_v29 }
 0x3c1   : > { %2063 = vperm.xlu0 %5168, %v5744_v3  }
 0x3c5   : > { %v6122_v29 = vpop.permute.xlu2 %1014 }
 0x3c6   : > { %9611 = vst [vmem:[#allocation70_spill] sm:$0xff] %v6122_v29  ;;  %v5591_v29 = vmov 20  }
 0x3c8   : > { %5159 = vset.pattern.permute.xlu1 %v5585_v34  ;;  %5157 = vset.pattern.permute.xlu2 %v5581_v24  ;;  %v6119_v24 = vpop.permute.xlu1 %1012 }
 0x3c9   : > { %5173 = vset.pattern.permute.xlu0 %v5586_v40  ;;  %1695 = vperm.xlu1 %5159, %v5737_v0   ;;  %9610 = vst [vmem:[#allocation69_spill] sm:$0xff] %v6119_v24 }
 0x3ca   : > { %1604 = vperm.xlu2 %5157, %v5737_v0   ;;  %2354 = vperm.xlu0 %5173, %v5737_v0  }
 0x3cd   : > { %v6130_v24 = vpop.permute.xlu2 %1020 }
 0x3ce   : > { %9613 = vst [vmem:[#allocation72_spill] sm:$0xff] %v6130_v24  ;;  %v5592_v24 = vmov 21  }
 0x3d1   : > { %5161 = vset.pattern.permute.xlu1 %v5587_v25 }
 0x3d2   : > { %5160 = vset.pattern.permute.xlu2 %v5585_v34  ;;  %5178 = vset.pattern.permute.xlu0 %v5588_v38  ;;  %v6127_v34 = vpop.permute.xlu1 %1018 }
 0x3d3   : > { %1786 = vperm.xlu1 %5161, %v5737_v0   ;;  %1699 = vperm.xlu2 %5160, %v5744_v3   ;;  %9612 = vst [vmem:[#allocation71_spill] sm:$0xff] %v6127_v34 }
 0x3d4   : > { %2560 = vperm.xlu0 %5178, %v5744_v3  }
 0x3db   : > { %5164 = vset.pattern.permute.xlu1 %v5582_v26  ;;  %5162 = vset.pattern.permute.xlu2 %v5587_v25  ;;  %v6134_v26 = vpop.permute.xlu1 %1062 }
 0x3dc   : > { %5179 = vset.pattern.permute.xlu0 %v5589_v47  ;;  %1881 = vperm.xlu1 %5164, %v5744_v3   ;;  %v1075_v25 = vmul.f32 %v6134_v26, %v5780_v19 }
 0x3dd   : > { %1790 = vperm.xlu2 %5162, %v5744_v3   ;;  %387 = vperm.xlu0 %5179, %v5737_v0  }
 0x3e4   : > { %5166 = vset.pattern.permute.xlu1 %v5590_v27 }
 0x3e5   : > { %5165 = vset.pattern.permute.xlu2 %v5590_v27  ;;  %392 = vperm.xlu0 %5179, %v5744_v3  }
 0x3e6   : > { %1972 = vperm.xlu1 %5166, %v5744_v3   ;;  %1968 = vperm.xlu2 %5165, %v5737_v0  }
 0x3ed   : > { %1109 = vrot.lane.b32.xlu0 %v1075_v25, %s5578_s16 }
 0x3ee   : > { %5169 = vset.pattern.permute.xlu1 %v5591_v29  ;;  %5167 = vset.pattern.permute.xlu2 %v5584_v44  ;;  %v6139_v34 = vpop.permute.xlu2 %1089 }
 0x3ef   : > { %9614 = vst [vmem:[#allocation73_spill] sm:$0xff] %v6139_v34  ;;  %2150 = vperm.xlu1 %5169, %v5737_v0   ;;  %2059 = vperm.xlu2 %5167, %v5737_v0  }
 0x3f6   : > { %v6143_v27 = vpop.permute.xlu2 %1093 }
 0x3f7   : > { %9615 = vst [vmem:[#allocation74_spill] sm:$0xff] %v6143_v27  ;;  %5171 = vset.pattern.permute.xlu1 %v5592_v24  ;;  %5170 = vset.pattern.permute.xlu2 %v5591_v29  ;;  %v5594_v27 = vmov 23  }
 0x3f8   : > { %2253 = vperm.xlu1 %5171, %v5737_v0   ;;  %2154 = vperm.xlu2 %5170, %v5744_v3  }
 0x3fe   : > { %v6147_v42 = vpop.permute.xlu2 %1149 }
 0x3ff   : > { %v1158_v44 = vmul.f32 %v6147_v42, %v5760_v7  ;;  %v1159_v41 = vmul.f32 %v6147_v42, %v5758_v6  ;;  %v1161_v10 = vmul.f32 %v6147_v42, %v5770_v13 }
 0x400   : > { %5174 = vset.pattern.permute.xlu1 %v5586_v40  ;;  %5172 = vset.pattern.permute.xlu2 %v5592_v24 }
 0x401   : > { %2358 = vperm.xlu1 %5174, %v5744_v3   ;;  %2257 = vperm.xlu2 %5172, %v5744_v3  }
 0x402   : > { %1184 = vrot.lane.b32.xlu0 %v1158_v44, %s9395_s22 }
 0x405   : > { %v6154_v25 = vpop.permute.xlu0 %1095  ;;  %v6156_v29 = vpop.permute.xlu1 %1091 }
 0x406   : > { %9616 = vst [vmem:[#allocation75_spill] sm:$0xff] %v6154_v25  ;;  %v1071_v25 = vmul.f32 %v6134_v26, %v5762_v8 }
 0x407   : > { %9617 = vst [vmem:[#allocation76_spill] sm:$0xff] %v6156_v29  ;;  %v6158_v34 = vpop.permute.xlu2 %1244 }
 0x408   : > { %v1256_v32 = vmul.f32 %v6158_v34, %v5758_v6  ;;  %v1254_v16 = vmul.f32 %v6158_v34, %v5772_v14  ;;  %v1257_v30 = vmul.f32 %v6158_v34, %v5780_v19 }
 0x409   : > { %5176 = vset.pattern.permute.xlu1 %v5594_v27  ;;  %5175 = vset.pattern.permute.xlu2 %v5594_v27  ;;  %v1160_v27 = vmul.f32 %v6147_v42, %v5780_v19 }
 0x40a   : > { %2459 = vperm.xlu1 %5176, %v5744_v3   ;;  %2455 = vperm.xlu2 %5175, %v5737_v0  }
 0x40d   : > { %v6162_v40 = vpop.permute.xlu0 %1153  ;;  %v6164_v24 = vpop.permute.xlu1 %1097 }
 0x40e   : > { %9618 = vst [vmem:[#allocation77_spill] sm:$0xff] %v6164_v24  ;;  %v1163_v44 = vmul.f32 %v6162_v40, %v5772_v14  ;;  %v1073_v24 = vmul.f32 %v6134_v26, %v5760_v7  ;;  %v1166_v36 = vmul.f32 %v6162_v40, %v5780_v19 }
 0x410   : > { %1194 = vrot.lane.b32.xlu0 %v1163_v44, %s9395_s22  ;;  %v1072_v44 = vmul.f32 %v6134_v26, %v5772_v14 }
 0x411   : > { %v6171_v29 = vpop.permute.xlu2 %1335 }
 0x412   : > { %1101 = vrot.lane.b32.xlu1 %v1071_v25, %s5578_s16  ;;  %5177 = vset.pattern.permute.xlu2 %v5588_v38  ;;  %v1344_v20 = vmul.f32 %v6171_v29, %v5762_v8  ;;  %v1345_v49 = vmul.f32 %v6171_v29, %v5772_v14 }
 0x413   : > { %2556 = vperm.xlu2 %5177, %v5737_v0   ;;  %5180 = vset.pattern.permute.xlu1 %v5589_v47 }
 0x415   : > { %v6175_v3 = vpop.permute.xlu1 %1240 }
 0x416   : > { %v1248_v0 = vmul.f32 %v6175_v3, %v5772_v14  ;;  %v6192_v52 = vpop.permute.xlu0 %1422  ;;  %v1249_v21 = vmul.f32 %v6175_v3, %v5760_v7 }
 0x417   : > { %v1431_v9 = vmul.f32 %v6192_v52, %v5760_v7 }
 0x418   : > { %1188 = vrot.lane.b32.xlu0 %v1160_v27, %s9395_s22  ;;  %v1156_v27 = vmul.f32 %v6147_v42, %v5762_v8 }
 0x41a   : > { %1105 = vrot.lane.b32.xlu1 %v1073_v24, %s5578_s16  ;;  %v6185_v25 = vpop.permute.xlu2 %1513  ;;  %v1074_v24 = vmul.f32 %v6134_v26, %v5758_v6 }
 0x41b   : > { %1103 = vrot.lane.b32.xlu2 %v1072_v44, %s5578_s16  ;;  %v1253_v44 = vmul.f32 %v6158_v34, %v5762_v8 }
 0x41c   : > { %5456 = vset.pattern.permute.xlu2 %v5589_v47 }
 0x41f   : > { %v6190_v38 = vpop.permute.xlu1 %1331 }
 0x420   : > { %1273 = vrot.lane.b32.xlu0 %v1248_v0, %s5595_s14  ;;  %v1157_v0 = vmul.f32 %v6147_v42, %v5772_v14  ;;  %v6212_v39 = vpop.permute.xlu0 %1608  ;;  %v1339_v35 = vmul.f32 %v6190_v38, %v5772_v14  ;;  %v1340_v46 = vmul.f32 %v6190_v38, %v5760_v7 }
 0x422   : > { %1180 = vrot.lane.b32.xlu1 %v1156_v27, %s9395_s22 }
 0x423   : > { %1107 = vrot.lane.b32.xlu2 %v1074_v24, %s5578_s16  ;;  %v1164_v24 = vmul.f32 %v6162_v40, %v5760_v7 }
 0x424   : > { %v6201_v47 = vpop.permute.xlu2 %1604 }
 0x428   : > { %v6207_v50 = vpop.permute.xlu1 %1426  ;;  %1283 = vrot.lane.b32.xlu0 %v1253_v44, %s5595_s14  ;;  %v1162_v44 = vmul.f32 %v6162_v40, %v5762_v8 }
 0x42a   : > { %1186 = vrot.lane.b32.xlu1 %v1159_v41, %s9395_s22  ;;  %v6229_v41 = vpop.permute.xlu0 %1877 }
 0x42b   : > { %1182 = vrot.lane.b32.xlu2 %v1157_v0, %s9395_s22  ;;  %v1251_v0 = vmul.f32 %v6175_v3, %v5780_v19 }
 0x42d   : > { %v6216_v27 = vpop.permute.xlu2 %1699 }
 0x430   : > { %1289 = vrot.lane.b32.xlu0 %v1256_v32, %s5595_s14  ;;  %v1165_v32 = vmul.f32 %v6162_v40, %v5758_v6 }
 0x432   : > { %1196 = vrot.lane.b32.xlu1 %v1164_v24, %s9395_s22  ;;  %v6226_v37 = vpop.permute.xlu1 %1517 }
 0x433   : > { %1192 = vrot.lane.b32.xlu2 %v1162_v44, %s9395_s22  ;;  %v6244_v44 = vpop.permute.xlu0 %2063 }
 0x437   : > { %v6233_v48 = vpop.permute.xlu2 %1790 }
 0x438   : > { %1279 = vrot.lane.b32.xlu0 %v1251_v0, %s5595_s14 }
 0x43a   : > { %1200 = vrot.lane.b32.xlu1 %v1166_v36, %s9395_s22  ;;  %v1247_v36 = vmul.f32 %v6175_v3, %v5762_v8 }
 0x43b   : > { %1198 = vrot.lane.b32.xlu2 %v1165_v32, %s9395_s22  ;;  %v6242_v24 = vpop.permute.xlu1 %1695 }
 0x43c   : > { %v6261_v43 = vpop.permute.xlu0 %2354 }
 0x43d   : > { %9619 = vst [vmem:[#allocation78_spill] sm:$0xff] %v6261_v43 }
 0x440   : > { %1364 = vrot.lane.b32.xlu0 %v1339_v35, %s5596_s15  ;;  %v6251_v0 = vpop.permute.xlu2 %1968  ;;  %v1250_v35 = vmul.f32 %v6175_v3, %v5758_v6 }
 0x442   : > { %1275 = vrot.lane.b32.xlu1 %v1249_v21, %s5595_s14 }
 0x443   : > { %1271 = vrot.lane.b32.xlu2 %v1247_v36, %s5595_s14  ;;  %v1347_v36 = vmul.f32 %v6171_v29, %v5758_v6 }
 0x445   : > { %v6257_v32 = vpop.permute.xlu1 %1786 }
 0x446   : > { %v6281_v15 = vpop.permute.xlu0 %2560 }
 0x447   : > { %9620 = vst [vmem:[#allocation79_spill] sm:$0xff] %v6281_v15  ;;  %v1430_v15 = vmul.f32 %v6192_v52, %v5772_v14 }
 0x448   : > { %1374 = vrot.lane.b32.xlu0 %v1344_v20, %s5596_s15  ;;  %v1255_v20 = vmul.f32 %v6158_v34, %v5760_v7 }
 0x449   : > { %v6268_v17 = vpop.permute.xlu2 %2059 }
 0x44a   : > { %1285 = vrot.lane.b32.xlu1 %v1254_v16, %s5595_s14 }
 0x44b   : > { %1277 = vrot.lane.b32.xlu2 %v1250_v35, %s5595_s14  ;;  %v1342_v35 = vmul.f32 %v6190_v38, %v5780_v19 }
 0x44e   : > { %v6272_v21 = vpop.permute.xlu1 %1881 }
 0x450   : > { %1380 = vrot.lane.b32.xlu0 %v1347_v36, %s5596_s15  ;;  %v1076_v36 = vmul.f32 %v6134_v26, %v5770_v13  ;;  %v1338_v26 = vmul.f32 %v6190_v38, %v5762_v8 }
 0x452   : > { %1099 = vrot.lane.b32.xlu1 %v1070_v51, %s5578_s16  ;;  %v6284_v16 = vpop.permute.xlu2 %2154 }
 0x453   : > { %1287 = vrot.lane.b32.xlu2 %v1255_v20, %s5595_s14  ;;  %v6300_v20 = vpop.permute.xlu0 %387 }
 0x454   : > { %9622 = vst [vmem:[#allocation81_spill] sm:$0xff] %v6300_v20  ;;  %v1435_v20 = vmul.f32 %v6207_v50, %v5762_v8 }
 0x458   : > { %v6289_v12 = vpop.permute.xlu1 %1972  ;;  %1370 = vrot.lane.b32.xlu0 %v1342_v35, %s5596_s15 }
 0x45a   : > { %1291 = vrot.lane.b32.xlu1 %v1257_v30, %s5595_s14 }
 0x45b   : > { %1111 = vrot.lane.b32.xlu2 %v1076_v36, %s5578_s16  ;;  %v6298_v51 = vpop.permute.xlu2 %2257  ;;  %v6315_v36 = vpop.permute.xlu0 %392  ;;  %s5598_s16 = smov 69  }
 0x45c   : > { %9621 = vst [vmem:[#allocation80_spill] sm:$0xff] %v6298_v51 }
 0x45d   : > { %9624 = vst [vmem:[#allocation83_spill] sm:$0xff] %v6315_v36 }
 0x460   : > { %1455 = vrot.lane.b32.xlu0 %v1430_v15, %s5597_s12  ;;  %v1341_v15 = vmul.f32 %v6190_v38, %v5758_v6 }
 0x461   : > { %v6307_v35 = vpop.permute.xlu1 %2150 }
 0x462   : > { %1366 = vrot.lane.b32.xlu1 %v1340_v46, %s5596_s15 }
 0x463   : > { %1362 = vrot.lane.b32.xlu2 %v1338_v26, %s5596_s15  ;;  %v1438_v26 = vmul.f32 %v6207_v50, %v5758_v6  ;;  %v6332_v36 = vpop.permute.xlu0 %1109 }
 0x464   : > { %v6313_v30 = vpop.permute.xlu2 %2455  ;;  %9626 = vst [vmem:[#allocation85_spill] sm:$0xff] %v6332_v36  ;;  %v1348_v36 = vmul.f32 %v6171_v29, %v5780_v19 }
 0x465   : > { %9623 = vst [vmem:[#allocation82_spill] sm:$0xff] %v6313_v30 }
 0x468   : > { %1465 = vrot.lane.b32.xlu0 %v1435_v20, %s5597_s12  ;;  %v1346_v20 = vmul.f32 %v6171_v29, %v5760_v7 }
 0x46a   : > { %v6324_v11 = vpop.permute.xlu1 %2253  ;;  %1376 = vrot.lane.b32.xlu1 %v1345_v49, %s5596_s15 }
 0x46b   : > { %1368 = vrot.lane.b32.xlu2 %v1341_v15, %s5596_s15 }
 0x46d   : > { %v6328_v46 = vpop.permute.xlu2 %2556 }
 0x46e   : > { %9625 = vst [vmem:[#allocation84_spill] sm:$0xff] %v6328_v46  ;;  %v1433_v46 = vmul.f32 %v6192_v52, %v5780_v19 }
 0x470   : > { %1471 = vrot.lane.b32.xlu0 %v1438_v26, %s5597_s12  ;;  %v1167_v26 = vmul.f32 %v6162_v40, %v5770_v13  ;;  %v1429_v40 = vmul.f32 %v6192_v52, %v5762_v8 }
 0x472   : > { %1190 = vrot.lane.b32.xlu1 %v1161_v10, %s9395_s22 }
 0x473   : > { %v6340_v49 = vpop.permute.xlu1 %2358  ;;  %1378 = vrot.lane.b32.xlu2 %v1346_v20, %s5596_s15 }
 0x474   : > { %v6350_v42 = vpop.permute.xlu0 %1184 }
 0x475   : > { %v6343_v15 = vpop.permute.xlu2 %1103  ;;  %9628 = vst [vmem:[#allocation87_spill] sm:$0xff] %v6350_v42  ;;  %v1526_v42 = vmul.f32 %v6226_v37, %v5762_v8 }
 0x476   : > { %9627 = vst [vmem:[#allocation86_spill] sm:$0xff] %v6343_v15  ;;  %v1521_v15 = vmul.f32 %v6185_v25, %v5772_v14 }
 0x478   : > { %1461 = vrot.lane.b32.xlu0 %v1433_v46, %s5597_s12 }
 0x47a   : > { %1382 = vrot.lane.b32.xlu1 %v1348_v36, %s5596_s15 }
 0x47b   : > { %1202 = vrot.lane.b32.xlu2 %v1167_v26, %s9395_s22  ;;  %s5599_s22 = smov 68  }
 0x47c   : > { %v6356_v10 = vpop.permute.xlu1 %2459 }
 0x47d   : > { %9629 = vst [vmem:[#allocation88_spill] sm:$0xff] %v6356_v10  ;;  %v6358_v20 = vpop.permute.xlu2 %1107 }
 0x47e   : > { %9630 = vst [vmem:[#allocation89_spill] sm:$0xff] %v6358_v20  ;;  %v1436_v20 = vmul.f32 %v6207_v50, %v5772_v14 }
 0x480   : > { %1546 = vrot.lane.b32.xlu0 %v1521_v15, %s5598_s16  ;;  %v1432_v15 = vmul.f32 %v6192_v52, %v5758_v6 }
 0x482   : > { %1457 = vrot.lane.b32.xlu1 %v1431_v9, %s5597_s12  ;;  %v6368_v36 = vpop.permute.xlu0 %1194 }
 0x483   : > { %9631 = vst [vmem:[#allocation90_spill] sm:$0xff] %v6368_v36  ;;  %1453 = vrot.lane.b32.xlu2 %v1429_v40, %s5597_s12 }
 0x484   : > { %v6371_v46 = vpop.permute.xlu1 %1101 }
 0x485   : > { %9632 = vst [vmem:[#allocation91_spill] sm:$0xff] %v6371_v46  ;;  %v6373_v26 = vpop.permute.xlu2 %1182  ;;  %v1252_v46 = vmul.f32 %v6175_v3, %v5770_v13  ;;  %v1439_v3 = vmul.f32 %v6207_v50, %v5780_v19 }
 0x486   : > { %9633 = vst [vmem:[#allocation92_spill] sm:$0xff] %v6373_v26  ;;  %v1529_v26 = vmul.f32 %v6226_v37, %v5758_v6 }
 0x488   : > { %1556 = vrot.lane.b32.xlu0 %v1526_v42, %s5598_s16  ;;  %v1437_v42 = vmul.f32 %v6207_v50, %v5760_v7 }
 0x48a   : > { %1467 = vrot.lane.b32.xlu1 %v1436_v20, %s5597_s12  ;;  %v6383_v9 = vpop.permute.xlu0 %1188 }
 0x48b   : > { %9634 = vst [vmem:[#allocation93_spill] sm:$0xff] %v6383_v9  ;;  %1459 = vrot.lane.b32.xlu2 %v1432_v15, %s5597_s12 }
 0x48c   : > { %v6386_v40 = vpop.permute.xlu1 %1105 }
 0x48d   : > { %9635 = vst [vmem:[#allocation94_spill] sm:$0xff] %v6386_v40  ;;  %v6388_v36 = vpop.permute.xlu2 %1192  ;;  %v9783_v40 = vld [vmem:[#allocation25_spill] sm:$0xff] }
 0x48e   : > { %9636 = vst [vmem:[#allocation95_spill] sm:$0xff] %v6388_v36  ;;  %v1524_v36 = vmul.f32 %v6185_v25, %v5780_v19 }
 0x490   : > { %1562 = vrot.lane.b32.xlu0 %v1529_v26, %s5598_s16  ;;  %v1258_v26 = vmul.f32 %v6158_v34, %v5770_v13  ;;  %v1520_v34 = vmul.f32 %v6185_v25, %v5762_v8 }
 0x492   : > { %1281 = vrot.lane.b32.xlu1 %v1252_v46, %s5595_s14  ;;  %v6398_v20 = vpop.permute.xlu0 %1273 }
 0x493   : > { %9637 = vst [vmem:[#allocation96_spill] sm:$0xff] %v6398_v20  ;;  %1469 = vrot.lane.b32.xlu2 %v1437_v42, %s5597_s12 }
 0x494   : > { %v6401_v15 = vpop.permute.xlu1 %1180 }
 0x495   : > { %9638 = vst [vmem:[#allocation97_spill] sm:$0xff] %v6401_v15  ;;  %v6403_v9 = vpop.permute.xlu2 %1198  ;;  %v1522_v15 = vmul.f32 %v6185_v25, %v5760_v7 }
 0x496   : > { %9639 = vst [vmem:[#allocation98_spill] sm:$0xff] %v6403_v9  ;;  %v1612_v9 = vmul.f32 %v6201_v47, %v5772_v14 }
 0x498   : > { %1552 = vrot.lane.b32.xlu0 %v1524_v36, %s5598_s16 }
 0x49a   : > { %1473 = vrot.lane.b32.xlu1 %v1439_v3, %s5597_s12  ;;  %v6413_v46 = vpop.permute.xlu0 %1283 }
 0x49b   : > { %9640 = vst [vmem:[#allocation99_spill] sm:$0xff] %v6413_v46  ;;  %1293 = vrot.lane.b32.xlu2 %v1258_v26, %s5595_s14  ;;  %v1617_v46 = vmul.f32 %v6212_v39, %v5762_v8  ;;  %s5600_s14 = smov 44  }
 0x49c   : > { %v6416_v42 = vpop.permute.xlu1 %1186 }
 0x49d   : > { %9641 = vst [vmem:[#allocation100_spill] sm:$0xff] %v6416_v42  ;;  %v6418_v20 = vpop.permute.xlu2 %1271  ;;  %v9779_v42 = vld [vmem:[#allocation24_spill] sm:$0xff] }
 0x49e   : > { %9642 = vst [vmem:[#allocation101_spill] sm:$0xff] %v6418_v20  ;;  %v1527_v20 = vmul.f32 %v6226_v37, %v5772_v14 }
 0x4a0   : > { %1637 = vrot.lane.b32.xlu0 %v1612_v9, %s5599_s22  ;;  %v1523_v9 = vmul.f32 %v6185_v25, %v5758_v6 }
 0x4a2   : > { %1548 = vrot.lane.b32.xlu1 %v1522_v15, %s5598_s16  ;;  %v6428_v36 = vpop.permute.xlu0 %1289 }
 0x4a3   : > { %9643 = vst [vmem:[#allocation102_spill] sm:$0xff] %v6428_v36  ;;  %1544 = vrot.lane.b32.xlu2 %v1520_v34, %s5598_s16 }
 0x4a4   : > { %v6431_v3 = vpop.permute.xlu1 %1196 }
 0x4a5   : > { %9644 = vst [vmem:[#allocation103_spill] sm:$0xff] %v6431_v3  ;;  %v6433_v26 = vpop.permute.xlu2 %1277  ;;  %v1343_v3 = vmul.f32 %v6190_v38, %v5770_v13  ;;  %v1530_v38 = vmul.f32 %v6226_v37, %v5780_v19 }
 0x4a6   : > { %9645 = vst [vmem:[#allocation104_spill] sm:$0xff] %v6433_v26  ;;  %v1620_v26 = vmul.f32 %v6212_v39, %v5758_v6 }
 0x4a8   : > { %1647 = vrot.lane.b32.xlu0 %v1617_v46, %s5599_s22  ;;  %v1528_v46 = vmul.f32 %v6226_v37, %v5760_v7 }
 0x4aa   : > { %1558 = vrot.lane.b32.xlu1 %v1527_v20, %s5598_s16  ;;  %v6443_v15 = vpop.permute.xlu0 %1279 }
 0x4ab   : > { %9646 = vst [vmem:[#allocation105_spill] sm:$0xff] %v6443_v15  ;;  %1550 = vrot.lane.b32.xlu2 %v1523_v9, %s5598_s16 }
 0x4ac   : > { %v6446_v34 = vpop.permute.xlu1 %1200 }
 0x4ad   : > { %9647 = vst [vmem:[#allocation106_spill] sm:$0xff] %v6446_v34  ;;  %v6448_v36 = vpop.permute.xlu2 %1287  ;;  %v1615_v34 = vmul.f32 %v6201_v47, %v5780_v19 }
 0x4ae   : > { %9648 = vst [vmem:[#allocation107_spill] sm:$0xff] %v6448_v36 }
 0x4b0   : > { %1653 = vrot.lane.b32.xlu0 %v1620_v26, %s5599_s22  ;;  %v1349_v26 = vmul.f32 %v6171_v29, %v5770_v13  ;;  %v1611_v29 = vmul.f32 %v6201_v47, %v5762_v8 }
 0x4b2   : > { %1372 = vrot.lane.b32.xlu1 %v1343_v3, %s5596_s15  ;;  %v6458_v20 = vpop.permute.xlu0 %1364 }
 0x4b3   : > { %9649 = vst [vmem:[#allocation108_spill] sm:$0xff] %v6458_v20  ;;  %1560 = vrot.lane.b32.xlu2 %v1528_v46, %s5598_s16 }
 0x4b4   : > { %v6461_v9 = vpop.permute.xlu1 %1275 }
 0x4b5   : > { %9650 = vst [vmem:[#allocation109_spill] sm:$0xff] %v6461_v9  ;;  %v6463_v36 = vpop.permute.xlu2 %1111  ;;  %v1613_v9 = vmul.f32 %v6201_v47, %v5760_v7 }
 0x4b6   : > { %9651 = vst [vmem:[#allocation110_spill] sm:$0xff] %v6463_v36  ;;  %v1703_v36 = vmul.f32 %v6242_v24, %v5772_v14 }
 0x4b8   : > { %1643 = vrot.lane.b32.xlu0 %v1615_v34, %s5599_s22 }
 0x4ba   : > { %1564 = vrot.lane.b32.xlu1 %v1530_v38, %s5598_s16  ;;  %v6473_v3 = vpop.permute.xlu0 %1374 }
 0x4bb   : > { %9652 = vst [vmem:[#allocation111_spill] sm:$0xff] %v6473_v3  ;;  %1384 = vrot.lane.b32.xlu2 %v1349_v26, %s5596_s15  ;;  %v1708_v3 = vmul.f32 %v6216_v27, %v5762_v8  ;;  %s5601_s15 = smov 43  }
 0x4bc   : > { %v6476_v46 = vpop.permute.xlu1 %1285 }
 0x4bd   : > { %9653 = vst [vmem:[#allocation112_spill] sm:$0xff] %v6476_v46  ;;  %v6478_v20 = vpop.permute.xlu2 %1362  ;;  %v1434_v46 = vmul.f32 %v6192_v52, %v5770_v13  ;;  %v1621_v52 = vmul.f32 %v6212_v39, %v5780_v19 }
 0x4be   : > { %9654 = vst [vmem:[#allocation113_spill] sm:$0xff] %v6478_v20  ;;  %v1618_v20 = vmul.f32 %v6212_v39, %v5772_v14 }
 0x4c0   : > { %1728 = vrot.lane.b32.xlu0 %v1703_v36, %s5600_s14  ;;  %v1614_v36 = vmul.f32 %v6201_v47, %v5758_v6 }
 0x4c2   : > { %1639 = vrot.lane.b32.xlu1 %v1613_v9, %s5599_s22  ;;  %v6488_v34 = vpop.permute.xlu0 %1380 }
 0x4c3   : > { %9655 = vst [vmem:[#allocation114_spill] sm:$0xff] %v6488_v34  ;;  %1635 = vrot.lane.b32.xlu2 %v1611_v29, %s5599_s22  ;;  %v9776_v34 = vld [vmem:[#allocation23_spill] sm:$0xff] }
 0x4c4   : > { %v6491_v38 = vpop.permute.xlu1 %1099 }
 0x4c5   : > { %9656 = vst [vmem:[#allocation115_spill] sm:$0xff] %v6491_v38  ;;  %v6493_v26 = vpop.permute.xlu2 %1368  ;;  %v1711_v38 = vmul.f32 %v6216_v27, %v5758_v6 }
 0x4c6   : > { %9657 = vst [vmem:[#allocation116_spill] sm:$0xff] %v6493_v26 }
 0x4c8   : > { %1738 = vrot.lane.b32.xlu0 %v1708_v3, %s5600_s14  ;;  %v1619_v3 = vmul.f32 %v6212_v39, %v5760_v7 }
 0x4ca   : > { %1649 = vrot.lane.b32.xlu1 %v1618_v20, %s5599_s22  ;;  %v6503_v9 = vpop.permute.xlu0 %1370 }
 0x4cb   : > { %9658 = vst [vmem:[#allocation117_spill] sm:$0xff] %v6503_v9  ;;  %1641 = vrot.lane.b32.xlu2 %v1614_v36, %s5599_s22  ;;  %v1706_v9 = vmul.f32 %v6242_v24, %v5780_v19 }
 0x4cc   : > { %v6506_v29 = vpop.permute.xlu1 %1291 }
 0x4cd   : > { %9659 = vst [vmem:[#allocation118_spill] sm:$0xff] %v6506_v29  ;;  %v6508_v26 = vpop.permute.xlu2 %1378 }
 0x4ce   : > { %9660 = vst [vmem:[#allocation119_spill] sm:$0xff] %v6508_v26 }
 0x4d0   : > { %1744 = vrot.lane.b32.xlu0 %v1711_v38, %s5600_s14  ;;  %v1440_v38 = vmul.f32 %v6207_v50, %v5770_v13  ;;  %v1702_v50 = vmul.f32 %v6242_v24, %v5762_v8 }
 0x4d2   : > { %1463 = vrot.lane.b32.xlu1 %v1434_v46, %s5597_s12  ;;  %v6518_v20 = vpop.permute.xlu0 %1455 }
 0x4d3   : > { %9661 = vst [vmem:[#allocation120_spill] sm:$0xff] %v6518_v20  ;;  %1651 = vrot.lane.b32.xlu2 %v1619_v3, %s5599_s22 }
 0x4d4   : > { %v6521_v36 = vpop.permute.xlu1 %1366 }
 0x4d5   : > { %9662 = vst [vmem:[#allocation121_spill] sm:$0xff] %v6521_v36  ;;  %v6523_v29 = vpop.permute.xlu2 %1202  ;;  %v1704_v36 = vmul.f32 %v6242_v24, %v5760_v7 }
 0x4d6   : > { %9663 = vst [vmem:[#allocation122_spill] sm:$0xff] %v6523_v29  ;;  %v1794_v29 = vmul.f32 %v6257_v32, %v5772_v14 }
 0x4d8   : > { %1734 = vrot.lane.b32.xlu0 %v1706_v9, %s5600_s14 }
 0x4da   : > { %1655 = vrot.lane.b32.xlu1 %v1621_v52, %s5599_s22  ;;  %v6533_v46 = vpop.permute.xlu0 %1465 }
 0x4db   : > { %9664 = vst [vmem:[#allocation123_spill] sm:$0xff] %v6533_v46  ;;  %1475 = vrot.lane.b32.xlu2 %v1440_v38, %s5597_s12  ;;  %v1799_v46 = vmul.f32 %v6233_v48, %v5762_v8  ;;  %s5602_s12 = smov 42  }
 0x4dc   : > { %v6536_v3 = vpop.permute.xlu1 %1376 }
 0x4dd   : > { %9665 = vst [vmem:[#allocation124_spill] sm:$0xff] %v6536_v3  ;;  %v6538_v20 = vpop.permute.xlu2 %1453  ;;  %v1525_v3 = vmul.f32 %v6185_v25, %v5770_v13  ;;  %v1712_v25 = vmul.f32 %v6216_v27, %v5780_v19 }
 0x4de   : > { %9666 = vst [vmem:[#allocation125_spill] sm:$0xff] %v6538_v20  ;;  %v1709_v20 = vmul.f32 %v6216_v27, %v5772_v14 }
 0x4e0   : > { %1819 = vrot.lane.b32.xlu0 %v1794_v29, %s5601_s15  ;;  %v1705_v29 = vmul.f32 %v6242_v24, %v5758_v6 }
 0x4e2   : > { %1730 = vrot.lane.b32.xlu1 %v1704_v36, %s5600_s14  ;;  %v6548_v9 = vpop.permute.xlu0 %1471 }
 0x4e3   : > { %9667 = vst [vmem:[#allocation126_spill] sm:$0xff] %v6548_v9  ;;  %1726 = vrot.lane.b32.xlu2 %v1702_v50, %s5600_s14  ;;  %v9773_v9 = vld [vmem:[#allocation48_spill] sm:$0xff] }
 0x4e4   : > { %v6551_v52 = vpop.permute.xlu1 %1190 }
 0x4e5   : > { %9668 = vst [vmem:[#allocation127_spill] sm:$0xff] %v6551_v52  ;;  %v6553_v38 = vpop.permute.xlu2 %1459  ;;  %v1802_v52 = vmul.f32 %v6233_v48, %v5758_v6 }
 0x4e6   : > { %9669 = vst [vmem:[#allocation128_spill] sm:$0xff] %v6553_v38 }
 0x4e8   : > { %1829 = vrot.lane.b32.xlu0 %v1799_v46, %s5601_s15  ;;  %v1710_v46 = vmul.f32 %v6216_v27, %v5760_v7 }
 0x4ea   : > { %1740 = vrot.lane.b32.xlu1 %v1709_v20, %s5600_s14  ;;  %v6563_v36 = vpop.permute.xlu0 %1461 }
 0x4eb   : > { %9670 = vst [vmem:[#allocation129_spill] sm:$0xff] %v6563_v36  ;;  %1732 = vrot.lane.b32.xlu2 %v1705_v29, %s5600_s14 }
 0x4ec   : > { %v6566_v50 = vpop.permute.xlu1 %1382 }
 0x4ed   : > { %9671 = vst [vmem:[#allocation130_spill] sm:$0xff] %v6566_v50  ;;  %v6568_v38 = vpop.permute.xlu2 %1469  ;;  %v1797_v50 = vmul.f32 %v6257_v32, %v5780_v19 }
 0x4ee   : > { %9672 = vst [vmem:[#allocation131_spill] sm:$0xff] %v6568_v38 }
 0x4f0   : > { %1835 = vrot.lane.b32.xlu0 %v1802_v52, %s5601_s15  ;;  %v1531_v52 = vmul.f32 %v6226_v37, %v5770_v13  ;;  %v1793_v37 = vmul.f32 %v6257_v32, %v5762_v8 }
 0x4f2   : > { %1554 = vrot.lane.b32.xlu1 %v1525_v3, %s5598_s16  ;;  %v6578_v20 = vpop.permute.xlu0 %1546 }
 0x4f3   : > { %9673 = vst [vmem:[#allocation132_spill] sm:$0xff] %v6578_v20  ;;  %1742 = vrot.lane.b32.xlu2 %v1710_v46, %s5600_s14  ;;  %v1885_v20 = vmul.f32 %v6229_v41, %v5772_v14 }
 0x4f4   : > { %v6581_v29 = vpop.permute.xlu1 %1457 }
 0x4f5   : > { %9674 = vst [vmem:[#allocation133_spill] sm:$0xff] %v6581_v29  ;;  %v6583_v36 = vpop.permute.xlu2 %1293 }
 0x4f6   : > { %9675 = vst [vmem:[#allocation134_spill] sm:$0xff] %v6583_v36  ;;  %v1795_v36 = vmul.f32 %v6257_v32, %v5760_v7 }
 0x4f8   : > { %1825 = vrot.lane.b32.xlu0 %v1797_v50, %s5601_s15 }
 0x4fa   : > { %1746 = vrot.lane.b32.xlu1 %v1712_v25, %s5600_s14  ;;  %v6593_v3 = vpop.permute.xlu0 %1556 }
 0x4fb   : > { %9676 = vst [vmem:[#allocation135_spill] sm:$0xff] %v6593_v3  ;;  %1566 = vrot.lane.b32.xlu2 %v1531_v52, %s5598_s16  ;;  %v1890_v3 = vmul.f32 %v6272_v21, %v5762_v8  ;;  %s5603_s16 = smov 41  }
 0x4fc   : > { %v6596_v46 = vpop.permute.xlu1 %1467 }
 0x4fd   : > { %9677 = vst [vmem:[#allocation136_spill] sm:$0xff] %v6596_v46  ;;  %v6598_v29 = vpop.permute.xlu2 %1544  ;;  %v1800_v46 = vmul.f32 %v6233_v48, %v5772_v14 }
 0x4fe   : > { %9678 = vst [vmem:[#allocation137_spill] sm:$0xff] %v6598_v29  ;;  %v1616_v29 = vmul.f32 %v6201_v47, %v5770_v13  ;;  %v1803_v47 = vmul.f32 %v6233_v48, %v5780_v19 }
 0x500   : > { %1910 = vrot.lane.b32.xlu0 %v1885_v20, %s5602_s12  ;;  %v1796_v20 = vmul.f32 %v6257_v32, %v5758_v6 }
 0x502   : > { %1821 = vrot.lane.b32.xlu1 %v1795_v36, %s5601_s15  ;;  %v6608_v50 = vpop.permute.xlu0 %1562 }
 0x503   : > { %9679 = vst [vmem:[#allocation138_spill] sm:$0xff] %v6608_v50  ;;  %1817 = vrot.lane.b32.xlu2 %v1793_v37, %s5601_s15 }
 0x504   : > { %v6611_v25 = vpop.permute.xlu1 %1281 }
 0x505   : > { %9680 = vst [vmem:[#allocation139_spill] sm:$0xff] %v6611_v25  ;;  %v6613_v52 = vpop.permute.xlu2 %1550  ;;  %v1893_v25 = vmul.f32 %v6272_v21, %v5758_v6 }
 0x506   : > { %9681 = vst [vmem:[#allocation140_spill] sm:$0xff] %v6613_v52 }
 0x508   : > { %1920 = vrot.lane.b32.xlu0 %v1890_v3, %s5602_s12  ;;  %v1801_v3 = vmul.f32 %v6233_v48, %v5760_v7 }
 0x50a   : > { %1831 = vrot.lane.b32.xlu1 %v1800_v46, %s5601_s15  ;;  %v6623_v36 = vpop.permute.xlu0 %1552 }
 0x50b   : > { %9682 = vst [vmem:[#allocation141_spill] sm:$0xff] %v6623_v36  ;;  %1823 = vrot.lane.b32.xlu2 %v1796_v20, %s5601_s15 }
 0x50c   : > { %v6626_v37 = vpop.permute.xlu1 %1473 }
 0x50d   : > { %9683 = vst [vmem:[#allocation142_spill] sm:$0xff] %v6626_v37  ;;  %v6628_v52 = vpop.permute.xlu2 %1560  ;;  %v1888_v37 = vmul.f32 %v6229_v41, %v5780_v19 }
 0x50e   : > { %9684 = vst [vmem:[#allocation143_spill] sm:$0xff] %v6628_v52  ;;  %v9769_v52 = vld [vmem:[#allocation47_spill] sm:$0xff] }
 0x510   : > { %1926 = vrot.lane.b32.xlu0 %v1893_v25, %s5602_s12  ;;  %v1622_v25 = vmul.f32 %v6212_v39, %v5770_v13  ;;  %v1884_v39 = vmul.f32 %v6229_v41, %v5762_v8 }
 0x512   : > { %1645 = vrot.lane.b32.xlu1 %v1616_v29, %s5599_s22  ;;  %v6638_v46 = vpop.permute.xlu0 %1637 }
 0x513   : > { %9685 = vst [vmem:[#allocation144_spill] sm:$0xff] %v6638_v46  ;;  %1833 = vrot.lane.b32.xlu2 %v1801_v3, %s5601_s15  ;;  %v1976_v46 = vmul.f32 %v6251_v0, %v5772_v14 }
 0x514   : > { %v6641_v20 = vpop.permute.xlu1 %1548 }
 0x515   : > { %9686 = vst [vmem:[#allocation145_spill] sm:$0xff] %v6641_v20  ;;  %v6643_v36 = vpop.permute.xlu2 %1384 }
 0x516   : > { %9687 = vst [vmem:[#allocation146_spill] sm:$0xff] %v6643_v36  ;;  %v1886_v36 = vmul.f32 %v6229_v41, %v5760_v7 }
 0x518   : > { %1916 = vrot.lane.b32.xlu0 %v1888_v37, %s5602_s12 }
 0x51a   : > { %1837 = vrot.lane.b32.xlu1 %v1803_v47, %s5601_s15  ;;  %v6653_v29 = vpop.permute.xlu0 %1647 }
 0x51b   : > { %9688 = vst [vmem:[#allocation147_spill] sm:$0xff] %v6653_v29  ;;  %1657 = vrot.lane.b32.xlu2 %v1622_v25, %s5599_s22  ;;  %v1981_v29 = vmul.f32 %v6289_v12, %v5762_v8  ;;  %s5604_s22 = smov 40  }
 0x51c   : > { %v6656_v3 = vpop.permute.xlu1 %1558 }
 0x51d   : > { %9689 = vst [vmem:[#allocation148_spill] sm:$0xff] %v6656_v3  ;;  %v6658_v20 = vpop.permute.xlu2 %1635  ;;  %v1891_v3 = vmul.f32 %v6272_v21, %v5772_v14 }
 0x51e   : > { %9690 = vst [vmem:[#allocation149_spill] sm:$0xff] %v6658_v20  ;;  %v1707_v20 = vmul.f32 %v6242_v24, %v5770_v13  ;;  %v1894_v24 = vmul.f32 %v6272_v21, %v5780_v19 }
 0x520   : > { %2001 = vrot.lane.b32.xlu0 %v1976_v46, %s5603_s16  ;;  %v1887_v46 = vmul.f32 %v6229_v41, %v5758_v6 }
 0x522   : > { %1912 = vrot.lane.b32.xlu1 %v1886_v36, %s5602_s12  ;;  %v6668_v37 = vpop.permute.xlu0 %1653 }
 0x523   : > { %9691 = vst [vmem:[#allocation150_spill] sm:$0xff] %v6668_v37  ;;  %1908 = vrot.lane.b32.xlu2 %v1884_v39, %s5602_s12 }
 0x524   : > { %v6671_v47 = vpop.permute.xlu1 %1372 }
 0x525   : > { %9692 = vst [vmem:[#allocation151_spill] sm:$0xff] %v6671_v47  ;;  %v6673_v25 = vpop.permute.xlu2 %1641 }
 0x526   : > { %9693 = vst [vmem:[#allocation152_spill] sm:$0xff] %v6673_v25  ;;  %v1984_v25 = vmul.f32 %v6289_v12, %v5758_v6 }
 0x528   : > { %2011 = vrot.lane.b32.xlu0 %v1981_v29, %s5603_s16  ;;  %v1892_v29 = vmul.f32 %v6272_v21, %v5760_v7 }
 0x52a   : > { %1922 = vrot.lane.b32.xlu1 %v1891_v3, %s5602_s12  ;;  %v6683_v36 = vpop.permute.xlu0 %1643 }
 0x52b   : > { %9694 = vst [vmem:[#allocation153_spill] sm:$0xff] %v6683_v36  ;;  %1914 = vrot.lane.b32.xlu2 %v1887_v46, %s5602_s12 }
 0x52c   : > { %v6686_v39 = vpop.permute.xlu1 %1564 }
 0x52d   : > { %9695 = vst [vmem:[#allocation154_spill] sm:$0xff] %v6686_v39  ;;  %v6688_v47 = vpop.permute.xlu2 %1651  ;;  %v1979_v39 = vmul.f32 %v6251_v0, %v5780_v19 }
 0x52e   : > { %9696 = vst [vmem:[#allocation155_spill] sm:$0xff] %v6688_v47 }
 0x530   : > { %2017 = vrot.lane.b32.xlu0 %v1984_v25, %s5603_s16  ;;  %v1713_v25 = vmul.f32 %v6216_v27, %v5770_v13  ;;  %v1975_v27 = vmul.f32 %v6251_v0, %v5762_v8 }
 0x532   : > { %1736 = vrot.lane.b32.xlu1 %v1707_v20, %s5600_s14  ;;  %v6698_v3 = vpop.permute.xlu0 %1728 }
 0x533   : > { %9697 = vst [vmem:[#allocation156_spill] sm:$0xff] %v6698_v3  ;;  %1924 = vrot.lane.b32.xlu2 %v1892_v29, %s5602_s12  ;;  %v2067_v3 = vmul.f32 %v6268_v17, %v5772_v14 }
 0x534   : > { %v6701_v46 = vpop.permute.xlu1 %1639 }
 0x535   : > { %9698 = vst [vmem:[#allocation157_spill] sm:$0xff] %v6701_v46  ;;  %v6703_v36 = vpop.permute.xlu2 %1475 }
 0x536   : > { %9699 = vst [vmem:[#allocation158_spill] sm:$0xff] %v6703_v36  ;;  %v1977_v36 = vmul.f32 %v6251_v0, %v5760_v7 }
 0x538   : > { %2007 = vrot.lane.b32.xlu0 %v1979_v39, %s5603_s16 }
 0x53a   : > { %1928 = vrot.lane.b32.xlu1 %v1894_v24, %s5602_s12  ;;  %v6713_v20 = vpop.permute.xlu0 %1738 }
 0x53b   : > { %9700 = vst [vmem:[#allocation159_spill] sm:$0xff] %v6713_v20  ;;  %1748 = vrot.lane.b32.xlu2 %v1713_v25, %s5600_s14  ;;  %v2072_v20 = vmul.f32 %v6244_v44, %v5762_v8  ;;  %s9525_s14 = smov 16  }
 0x53c   : > { %v6716_v29 = vpop.permute.xlu1 %1649 }
 0x53d   : > { %9701 = vst [vmem:[#allocation160_spill] sm:$0xff] %v6716_v29  ;;  %v6718_v46 = vpop.permute.xlu2 %1726  ;;  %v1982_v29 = vmul.f32 %v6289_v12, %v5772_v14 }
 0x53e   : > { %9702 = vst [vmem:[#allocation161_spill] sm:$0xff] %v6718_v46  ;;  %v1798_v46 = vmul.f32 %v6257_v32, %v5770_v13  ;;  %v1985_v32 = vmul.f32 %v6289_v12, %v5780_v19 }
 0x540   : > { %2092 = vrot.lane.b32.xlu0 %v2067_v3, %s5604_s22  ;;  %v1978_v3 = vmul.f32 %v6251_v0, %v5758_v6 }
 0x542   : > { %2003 = vrot.lane.b32.xlu1 %v1977_v36, %s5603_s16  ;;  %v6728_v39 = vpop.permute.xlu0 %1744 }
 0x543   : > { %9703 = vst [vmem:[#allocation162_spill] sm:$0xff] %v6728_v39  ;;  %1999 = vrot.lane.b32.xlu2 %v1975_v27, %s5603_s16 }
 0x544   : > { %v6731_v24 = vpop.permute.xlu1 %1463 }
 0x545   : > { %9704 = vst [vmem:[#allocation163_spill] sm:$0xff] %v6731_v24  ;;  %v6733_v25 = vpop.permute.xlu2 %1732 }
 0x546   : > { %9705 = vst [vmem:[#allocation164_spill] sm:$0xff] %v6733_v25  ;;  %v2075_v25 = vmul.f32 %v6244_v44, %v5758_v6 }
 0x548   : > { %2102 = vrot.lane.b32.xlu0 %v2072_v20, %s5604_s22  ;;  %v1983_v20 = vmul.f32 %v6289_v12, %v5760_v7 }
 0x54a   : > { %2013 = vrot.lane.b32.xlu1 %v1982_v29, %s5603_s16  ;;  %v6743_v36 = vpop.permute.xlu0 %1734 }
 0x54b   : > { %9706 = vst [vmem:[#allocation165_spill] sm:$0xff] %v6743_v36  ;;  %2005 = vrot.lane.b32.xlu2 %v1978_v3, %s5603_s16 }
 0x54c   : > { %v6746_v27 = vpop.permute.xlu1 %1655 }
 0x54d   : > { %9707 = vst [vmem:[#allocation166_spill] sm:$0xff] %v6746_v27  ;;  %v6748_v24 = vpop.permute.xlu2 %1742  ;;  %v2070_v27 = vmul.f32 %v6268_v17, %v5780_v19 }
 0x54e   : > { %9708 = vst [vmem:[#allocation167_spill] sm:$0xff] %v6748_v24 }
 0x550   : > { %2108 = vrot.lane.b32.xlu0 %v2075_v25, %s5604_s22  ;;  %v1804_v25 = vmul.f32 %v6233_v48, %v5770_v13  ;;  %v2066_v48 = vmul.f32 %v6268_v17, %v5762_v8 }
 0x552   : > { %1827 = vrot.lane.b32.xlu1 %v1798_v46, %s5601_s15  ;;  %v6758_v29 = vpop.permute.xlu0 %1819 }
 0x553   : > { %9709 = vst [vmem:[#allocation168_spill] sm:$0xff] %v6758_v29  ;;  %2015 = vrot.lane.b32.xlu2 %v1983_v20, %s5603_s16  ;;  %v2160_v29 = vmul.f32 %v6307_v35, %v5772_v14 }
 0x554   : > { %v6761_v3 = vpop.permute.xlu1 %1730 }
 0x555   : > { %9710 = vst [vmem:[#allocation169_spill] sm:$0xff] %v6761_v3  ;;  %v6763_v36 = vpop.permute.xlu2 %1566 }
 0x556   : > { %9711 = vst [vmem:[#allocation170_spill] sm:$0xff] %v6763_v36  ;;  %v2068_v36 = vmul.f32 %v6268_v17, %v5760_v7 }
 0x558   : > { %2098 = vrot.lane.b32.xlu0 %v2070_v27, %s5604_s22 }
 0x55a   : > { %2019 = vrot.lane.b32.xlu1 %v1985_v32, %s5603_s16  ;;  %v6773_v46 = vpop.permute.xlu0 %1829 }
 0x55b   : > { %9712 = vst [vmem:[#allocation171_spill] sm:$0xff] %v6773_v46  ;;  %1839 = vrot.lane.b32.xlu2 %v1804_v25, %s5601_s15  ;;  %v2166_v46 = vmul.f32 %v6284_v16, %v5762_v8  ;;  %s5606_s15 = smov 15  }
 0x55c   : > { %v6776_v20 = vpop.permute.xlu1 %1740 }
 0x55d   : > { %9713 = vst [vmem:[#allocation172_spill] sm:$0xff] %v6776_v20  ;;  %v6778_v3 = vpop.permute.xlu2 %1817  ;;  %v2073_v20 = vmul.f32 %v6244_v44, %v5772_v14 }
 0x55e   : > { %9714 = vst [vmem:[#allocation173_spill] sm:$0xff] %v6778_v3  ;;  %v1889_v3 = vmul.f32 %v6229_v41, %v5770_v13  ;;  %v2076_v41 = vmul.f32 %v6244_v44, %v5780_v19 }
 0x560   : > { %2189 = vrot.lane.b32.xlu0 %v2160_v29, %s9525_s14  ;;  %v2069_v29 = vmul.f32 %v6268_v17, %v5758_v6 }
 0x562   : > { %2094 = vrot.lane.b32.xlu1 %v2068_v36, %s5604_s22  ;;  %v6788_v27 = vpop.permute.xlu0 %1835 }
 0x563   : > { %9715 = vst [vmem:[#allocation174_spill] sm:$0xff] %v6788_v27  ;;  %2090 = vrot.lane.b32.xlu2 %v2066_v48, %s5604_s22 }
 0x564   : > { %v6791_v32 = vpop.permute.xlu1 %1554 }
 0x565   : > { %9716 = vst [vmem:[#allocation175_spill] sm:$0xff] %v6791_v32  ;;  %v6793_v25 = vpop.permute.xlu2 %1823 }
 0x566   : > { %9717 = vst [vmem:[#allocation176_spill] sm:$0xff] %v6793_v25  ;;  %v2169_v25 = vmul.f32 %v6284_v16, %v5758_v6 }
 0x568   : > { %2201 = vrot.lane.b32.xlu0 %v2166_v46, %s9525_s14  ;;  %v2074_v46 = vmul.f32 %v6244_v44, %v5760_v7 }
 0x56a   : > { %2104 = vrot.lane.b32.xlu1 %v2073_v20, %s5604_s22  ;;  %v6803_v36 = vpop.permute.xlu0 %1825 }
 0x56b   : > { %9718 = vst [vmem:[#allocation177_spill] sm:$0xff] %v6803_v36  ;;  %2096 = vrot.lane.b32.xlu2 %v2069_v29, %s5604_s22 }
 0x56c   : > { %v6806_v48 = vpop.permute.xlu1 %1746 }
 0x56d   : > { %9719 = vst [vmem:[#allocation178_spill] sm:$0xff] %v6806_v48  ;;  %v6808_v32 = vpop.permute.xlu2 %1833  ;;  %v2163_v48 = vmul.f32 %v6307_v35, %v5780_v19 }
 0x56e   : > { %9720 = vst [vmem:[#allocation179_spill] sm:$0xff] %v6808_v32  ;;  %v9761_v32 = vld [vmem:[#allocation15_spill] sm:$0xff] }
 0x570   : > { %2207 = vrot.lane.b32.xlu0 %v2169_v25, %s9525_s14  ;;  %v1895_v25 = vmul.f32 %v6272_v21, %v5770_v13  ;;  %v2159_v21 = vmul.f32 %v6307_v35, %v5762_v8 }
 0x572   : > { %1918 = vrot.lane.b32.xlu1 %v1889_v3, %s5602_s12  ;;  %v6818_v20 = vpop.permute.xlu0 %1910 }
 0x573   : > { %9721 = vst [vmem:[#allocation180_spill] sm:$0xff] %v6818_v20  ;;  %2106 = vrot.lane.b32.xlu2 %v2074_v46, %s5604_s22  ;;  %v2261_v20 = vmul.f32 %v6324_v11, %v5772_v14 }
 0x574   : > { %v6821_v29 = vpop.permute.xlu1 %1821 }
 0x575   : > { %9722 = vst [vmem:[#allocation181_spill] sm:$0xff] %v6821_v29  ;;  %v6823_v36 = vpop.permute.xlu2 %1657 }
 0x576   : > { %9723 = vst [vmem:[#allocation182_spill] sm:$0xff] %v6823_v36  ;;  %v2161_v36 = vmul.f32 %v6307_v35, %v5760_v7 }
 0x578   : > { %2195 = vrot.lane.b32.xlu0 %v2163_v48, %s9525_s14 }
 0x57a   : > { %2110 = vrot.lane.b32.xlu1 %v2076_v41, %s5604_s22  ;;  %v6833_v3 = vpop.permute.xlu0 %1920 }
 0x57b   : > { %9724 = vst [vmem:[#allocation183_spill] sm:$0xff] %v6833_v3  ;;  %1930 = vrot.lane.b32.xlu2 %v1895_v25, %s5602_s12  ;;  %v2267_v3 = vmul.f32 %v6298_v51, %v5762_v8  ;;  %s5607_s12 = smov 14  }
 0x57c   : > { %v6836_v46 = vpop.permute.xlu1 %1831 }
 0x57d   : > { %9725 = vst [vmem:[#allocation184_spill] sm:$0xff] %v6836_v46  ;;  %v6838_v29 = vpop.permute.xlu2 %1908  ;;  %v2167_v46 = vmul.f32 %v6284_v16, %v5772_v14 }
 0x57e   : > { %9726 = vst [vmem:[#allocation185_spill] sm:$0xff] %v6838_v29  ;;  %v1980_v29 = vmul.f32 %v6251_v0, %v5770_v13  ;;  %v2170_v0 = vmul.f32 %v6284_v16, %v5780_v19 }
 0x580   : > { %2290 = vrot.lane.b32.xlu0 %v2261_v20, %s5606_s15  ;;  %v2162_v20 = vmul.f32 %v6307_v35, %v5758_v6 }
 0x582   : > { %2191 = vrot.lane.b32.xlu1 %v2161_v36, %s9525_s14  ;;  %v6848_v48 = vpop.permute.xlu0 %1926 }
 0x583   : > { %9727 = vst [vmem:[#allocation186_spill] sm:$0xff] %v6848_v48  ;;  %2187 = vrot.lane.b32.xlu2 %v2159_v21, %s9525_s14  ;;  %v9758_v48 = vld [vmem:[#allocation43_spill] sm:$0xff] }
 0x584   : > { %v6851_v41 = vpop.permute.xlu1 %1645 }
 0x585   : > { %9728 = vst [vmem:[#allocation187_spill] sm:$0xff] %v6851_v41  ;;  %v6853_v25 = vpop.permute.xlu2 %1914 }
 0x586   : > { %9729 = vst [vmem:[#allocation188_spill] sm:$0xff] %v6853_v25  ;;  %v2270_v25 = vmul.f32 %v6298_v51, %v5758_v6 }
 0x588   : > { %2302 = vrot.lane.b32.xlu0 %v2267_v3, %s5606_s15  ;;  %v2168_v3 = vmul.f32 %v6284_v16, %v5760_v7 }
 0x58a   : > { %2203 = vrot.lane.b32.xlu1 %v2167_v46, %s9525_s14  ;;  %v6863_v36 = vpop.permute.xlu0 %1916 }
 0x58b   : > { %9730 = vst [vmem:[#allocation189_spill] sm:$0xff] %v6863_v36  ;;  %2193 = vrot.lane.b32.xlu2 %v2162_v20, %s9525_s14 }
 0x58c   : > { %v6866_v21 = vpop.permute.xlu1 %1837 }
 0x58d   : > { %9731 = vst [vmem:[#allocation190_spill] sm:$0xff] %v6866_v21  ;;  %v6868_v41 = vpop.permute.xlu2 %1924  ;;  %v2264_v21 = vmul.f32 %v6324_v11, %v5780_v19 }
 0x58e   : > { %9732 = vst [vmem:[#allocation191_spill] sm:$0xff] %v6868_v41  ;;  %v2361_v41 = vmul.f32 %v6261_v43, %v5762_v8 }
 0x590   : > { %2308 = vrot.lane.b32.xlu0 %v2270_v25, %s5606_s15  ;;  %v1986_v25 = vmul.f32 %v6289_v12, %v5770_v13  ;;  %v2260_v12 = vmul.f32 %v6324_v11, %v5762_v8 }
 0x592   : > { %2009 = vrot.lane.b32.xlu1 %v1980_v29, %s5603_s16  ;;  %v6878_v46 = vpop.permute.xlu0 %2001 }
 0x593   : > { %9733 = vst [vmem:[#allocation192_spill] sm:$0xff] %v6878_v46  ;;  %2205 = vrot.lane.b32.xlu2 %v2168_v3, %s9525_s14  ;;  %v2362_v46 = vmul.f32 %v6261_v43, %v5772_v14 }
 0x594   : > { %v6881_v20 = vpop.permute.xlu1 %1912 }
 0x595   : > { %9734 = vst [vmem:[#allocation193_spill] sm:$0xff] %v6881_v20  ;;  %v6883_v36 = vpop.permute.xlu2 %1748 }
 0x596   : > { %9735 = vst [vmem:[#allocation194_spill] sm:$0xff] %v6883_v36  ;;  %v2262_v36 = vmul.f32 %v6324_v11, %v5760_v7 }
 0x598   : > { %2296 = vrot.lane.b32.xlu0 %v2264_v21, %s5606_s15 }
 0x59a   : > { %2209 = vrot.lane.b32.xlu1 %v2170_v0, %s9525_s14  ;;  %v6893_v29 = vpop.permute.xlu0 %2011 }
 0x59b   : > { %9736 = vst [vmem:[#allocation195_spill] sm:$0xff] %v6893_v29  ;;  %2021 = vrot.lane.b32.xlu2 %v1986_v25, %s5603_s16  ;;  %v2368_v29 = vmul.f32 %v6340_v49, %v5762_v8  ;;  %s5608_s16 = smov 13  }
 0x59c   : > { %v6896_v3 = vpop.permute.xlu1 %1922 }
 0x59d   : > { %9737 = vst [vmem:[#allocation196_spill] sm:$0xff] %v6896_v3  ;;  %v6898_v20 = vpop.permute.xlu2 %1999  ;;  %v2268_v3 = vmul.f32 %v6298_v51, %v5772_v14 }
 0x59e   : > { %9738 = vst [vmem:[#allocation197_spill] sm:$0xff] %v6898_v20  ;;  %v2071_v20 = vmul.f32 %v6268_v17, %v5770_v13  ;;  %v2271_v17 = vmul.f32 %v6298_v51, %v5780_v19 }
 0x5a0   : > { %2391 = vrot.lane.b32.xlu0 %v2362_v46, %s5607_s12  ;;  %v2263_v46 = vmul.f32 %v6324_v11, %v5758_v6 }
 0x5a2   : > { %2292 = vrot.lane.b32.xlu1 %v2262_v36, %s5606_s15  ;;  %v6908_v21 = vpop.permute.xlu0 %2017 }
 0x5a3   : > { %9739 = vst [vmem:[#allocation198_spill] sm:$0xff] %v6908_v21  ;;  %2288 = vrot.lane.b32.xlu2 %v2260_v12, %s5606_s15  ;;  %v9756_v21 = vld [vmem:[#allocation13_spill] sm:$0xff] }
 0x5a4   : > { %v6911_v0 = vpop.permute.xlu1 %1736 }
 0x5a5   : > { %9740 = vst [vmem:[#allocation199_spill] sm:$0xff] %v6911_v0  ;;  %v6913_v25 = vpop.permute.xlu2 %2005 }
 0x5a6   : > { %9741 = vst [vmem:[#allocation200_spill] sm:$0xff] %v6913_v25  ;;  %v2371_v25 = vmul.f32 %v6340_v49, %v5758_v6 }
 0x5a8   : > { %2403 = vrot.lane.b32.xlu0 %v2368_v29, %s5607_s12  ;;  %v2269_v29 = vmul.f32 %v6298_v51, %v5760_v7 }
 0x5aa   : > { %2304 = vrot.lane.b32.xlu1 %v2268_v3, %s5606_s15  ;;  %v6923_v36 = vpop.permute.xlu0 %2007 }
 0x5ab   : > { %9742 = vst [vmem:[#allocation201_spill] sm:$0xff] %v6923_v36  ;;  %2294 = vrot.lane.b32.xlu2 %v2263_v46, %s5606_s15 }
 0x5ac   : > { %v6926_v12 = vpop.permute.xlu1 %1928 }
 0x5ad   : > { %9743 = vst [vmem:[#allocation202_spill] sm:$0xff] %v6926_v12  ;;  %v6928_v0 = vpop.permute.xlu2 %2015  ;;  %v2365_v12 = vmul.f32 %v6261_v43, %v5780_v19 }
 0x5ae   : > { %9744 = vst [vmem:[#allocation203_spill] sm:$0xff] %v6928_v0  ;;  %v9755_v0 = vld [vmem:[#allocation42_spill] sm:$0xff] }
 0x5b0   : > { %2409 = vrot.lane.b32.xlu0 %v2371_v25, %s5607_s12  ;;  %v6955_v25 = vsel %vm476_vm0, %v5982_v53, %v5984_v54  ;;  %v6973_v53 = vsel %vm476_vm0, %v5846_v56, %v5844_v55 }
 0x5b2   : > { %2100 = vrot.lane.b32.xlu1 %v2071_v20, %s5604_s22  ;;  %v6938_v3 = vpop.permute.xlu0 %2092  ;;  %v2077_v20 = vmul.f32 %v6244_v44, %v5770_v13  ;;  %v6978_v44 = vsel %vm476_vm0, %v5986_v18, %v5848_v57  ;;  %v9788_v57 = vld [vmem:[#allocation26_spill] sm:$0xff] }
 0x5b3   : > { %9745 = vst [vmem:[#allocation204_spill] sm:$0xff] %v6938_v3  ;;  %2306 = vrot.lane.b32.xlu2 %v2269_v29, %s5606_s15  ;;  %v9753_v3 = vld [vmem:[#allocation12_spill] sm:$0xff] }
 0x5b4   : > { %v6941_v46 = vpop.permute.xlu1 %2003 }
 0x5b5   : > { %9746 = vst [vmem:[#allocation205_spill] sm:$0xff] %v6941_v46  ;;  %v6943_v36 = vpop.permute.xlu2 %1839  ;;  %v6963_v46 = vsel %vm476_vm0, %v5844_v55, %v5986_v18  ;;  %v6994_v55 = vsel %vm476_vm0, %v5852_v59, %v5854_v60 }
 0x5b6   : > { %9747 = vst [vmem:[#allocation206_spill] sm:$0xff] %v6943_v36  ;;  %v9754_v36 = vld [vmem:[#allocation40_spill] sm:$0xff] }
 0x5b8   : > { %2397 = vrot.lane.b32.xlu0 %v2365_v12, %s5607_s12  ;;  %v6968_v12 = vsel %vm476_vm0, %v5984_v54, %v5846_v56  ;;  %v6989_v54 = vsel %vm476_vm0, %v5988_v22, %v5852_v59  ;;  %v6999_v56 = vsel %vm476_vm0, %v5854_v60, %v5990_v23  ;;  %v7016_v59 = vsel %vm9528_vm1, %v5860_v63, %v5858_v62 }
 0x5b9   : > { %v7040_v63 = vsel %vm9528_vm1, %v5866_v4, %v5996_v33 }
 0x5ba   : > { %2310 = vrot.lane.b32.xlu1 %v2271_v17, %s5606_s15  ;;  %v6958_v29 = vpop.permute.xlu0 %2102  ;;  %v6984_v17 = vsel %vm476_vm0, %v5850_v58, %v5988_v22  ;;  %v7006_v58 = vsel %vm476_vm0, %v5990_v23, %v5856_v61  ;;  %v7011_v22 = vsel %vm9528_vm1, %v5858_v62, %v5992_v28  ;;  %v7028_v23 = vsel %vm9528_vm1, %v5992_v28, %v5864_v2  ;;  %v9751_v28 = vld [vmem:[#allocation10_spill] sm:$0xff] }
 0x5bb   : > { %9748 = vst [vmem:[#allocation207_spill] sm:$0xff] %v6958_v29  ;;  %2112 = vrot.lane.b32.xlu2 %v2077_v20, %s5604_s22  ;;  %v7023_v20 = vsel %vm9528_vm1, %v5862_v1, %v5994_v31  ;;  %v7033_v29 = vsel %vm9528_vm1, %v5864_v2, %v5862_v1  ;;  %v2463_v62 = vmul.f32 %v6313_v30, %v5772_v14  ;;  %v9752_v1 = vld [vmem:[#allocation11_spill] sm:$0xff]  ;;  %s5609_s22 = smov 12  }
 0x5bc   : > { %v7001_v18 = vpop.permute.xlu1 %2013  ;;  %v7045_v31 = vsel %vm9528_vm1, %v5868_v5, %v5866_v4  ;;  %v7055_v2 = vsel %vm9528_vm1, %v5996_v33, %v9752_v1  ;;  %v7065_v4 = vsel %vm658_vm2, %v9754_v36, %v9753_v3  ;;  %v2363_v5 = vmul.f32 %v6261_v43, %v5760_v7 }
 0x5bd   : > { %9749 = vst [vmem:[#allocation208_spill] sm:$0xff] %v7001_v18  ;;  %v7018_v60 = vpop.permute.xlu2 %2090  ;;  %v7050_v18 = vsel %vm9528_vm1, %v9751_v28, %v6006_v45  ;;  %v7073_v33 = vsel %vm658_vm2, %v9753_v3, %v9755_v0  ;;  %v9760_v3 = vld [vmem:[#allocation16_spill] sm:$0xff] }
 0x5be   : > { %9750 = vst [vmem:[#allocation209_spill] sm:$0xff] %v7018_v60  ;;  %v7060_v60 = vsel %vm9528_vm1, %v9752_v1, %v9751_v28  ;;  %v7078_v28 = vsel %vm658_vm2, %v9755_v0, %v9756_v21  ;;  %v9757_v1 = vld [vmem:[#allocation14_spill] sm:$0xff]  ;;  %v7095_v27 = vsel %vm658_vm2, %v9761_v32, %v9760_v3  ;;  %v9762_v0 = vld [vmem:[#allocation44_spill] sm:$0xff]  ;;  %v9766_v32 = vld [vmem:[#allocation45_spill] sm:$0xff]  ;;  %vm2215_vm1 = vcmask 130048  }
 0x5bf   : > { %v7083_v36 = vsel %vm658_vm2, %v9756_v21, %v9757_v1  ;;  %v7100_v24 = vsel %vm658_vm2, %v9760_v3, %v9762_v0  ;;  %v9763_v21 = vld [vmem:[#allocation17_spill] sm:$0xff]  ;;  %v9768_v3 = vld [vmem:[#allocation19_spill] sm:$0xff] }
 0x5c0   : > { %2492 = vrot.lane.b32.xlu0 %v2463_v62, %s5608_s16  ;;  %v7090_v62 = vsel %vm658_vm2, %v9757_v1, %v9758_v48  ;;  %v7105_v39 = vsel %vm658_vm2, %v9762_v0, %v9763_v21  ;;  %v9765_v1 = vld [vmem:[#allocation18_spill] sm:$0xff]  ;;  %v7123_v50 = vsel %vm749_vm3, %v9769_v52, %v9768_v3 }
 0x5c1   : > { %9759 = vst [vmem:[#allocation10_spill] sm:$0xff] %v7090_v62  ;;  %v7113_v48 = vsel %vm658_vm2, %v9763_v21, %v9765_v1  ;;  %v7118_v37 = vsel %vm658_vm2, %v9765_v1, %v9766_v32  ;;  %v9771_v0 = vld [vmem:[#allocation46_spill] sm:$0xff]  ;;  %v9801_v32 = vld [vmem:[#allocation55_spill] sm:$0xff]  ;;  %v2364_v62 = vmul.f32 %v6261_v43, %v5758_v6 }
 0x5c2   : > { %2393 = vrot.lane.b32.xlu1 %v2363_v5, %s5607_s12  ;;  %v7108_v47 = vpop.permute.xlu0 %2108  ;;  %9767 = vst [vmem:[#allocation12_spill] sm:$0xff] %v7118_v37  ;;  %v9770_v5 = vld [vmem:[#allocation20_spill] sm:$0xff]  ;;  %v9772_v1 = vld [vmem:[#allocation22_spill] sm:$0xff] }
 0x5c3   : > { %9764 = vst [vmem:[#allocation11_spill] sm:$0xff] %v7108_v47  ;;  %2389 = vrot.lane.b32.xlu2 %v2361_v41, %s5607_s12  ;;  %v7129_v47 = vsel %vm749_vm3, %v9771_v0, %v9770_v5  ;;  %v7134_v21 = vsel %vm749_vm3, %v9770_v5, %v9769_v52  ;;  %v7139_v38 = vsel %vm749_vm3, %v9768_v3, %v9772_v1  ;;  %v9777_v0 = vld [vmem:[#allocation49_spill] sm:$0xff] }
 0x5c4   : > { %v7144_v26 = vsel %vm749_vm3, %v9772_v1, %v9773_v9  ;;  %v7146_v41 = vpop.permute.xlu1 %1827  ;;  %v7151_v15 = vsel %vm749_vm3, %v9777_v0, %v9776_v34  ;;  %v9780_v52 = vld [vmem:[#allocation21_spill] sm:$0xff]  ;;  %v7161_v3 = vsel %vm749_vm3, %v9779_v42, %v9777_v0  ;;  %v7166_v1 = vsel %vm749_vm3, %v9776_v34, %v9783_v40 }
 0x5c5   : > { %9774 = vst [vmem:[#allocation40_spill] sm:$0xff] %v7144_v26  ;;  %v7156_v5 = vsel %vm749_vm3, %v9780_v52, %v9779_v42  ;;  %v7168_v9 = vpop.permute.xlu2 %2096  ;;  %v9789_v52 = vld [vmem:[#allocation52_spill] sm:$0xff]  ;;  %v9791_v26 = vld [vmem:[#allocation27_spill] sm:$0xff]  ;;  %v2469_v34 = vmul.f32 %v6356_v10, %v5762_v8 }
 0x5c6   : > { %9775 = vst [vmem:[#allocation42_spill] sm:$0xff] %v7146_v41  ;;  %v9786_v41 = vld [vmem:[#allocation50_spill] sm:$0xff]  ;;  %v7178_v30 = vsel %vm840_vm4, %v9789_v52, %v9788_v57  ;;  %v9792_v42 = vld [vmem:[#allocation51_spill] sm:$0xff] }
 0x5c7   : > { %9778 = vst [vmem:[#allocation13_spill] sm:$0xff] %v7151_v15  ;;  %v7173_v51 = vsel %vm749_vm3, %v9783_v40, %v9786_v41  ;;  %v7183_v0 = vsel %vm840_vm4, %v9792_v42, %v9791_v26  ;;  %v9795_v40 = vld [vmem:[#allocation81_spill] sm:$0xff]  ;;  %vm1841_vm3 = vcmask 351232  }
 0x5c8   : > { %9781 = vst [vmem:[#allocation14_spill] sm:$0xff] %v7156_v5  ;;  %v408_v41 = vmul.f32 %v5762_v8, %v9795_v40  ;;  %v9796_v15 = vld [vmem:[#allocation29_spill] sm:$0xff]  ;;  %v411_v5 = vmul.f32 %v5758_v6, %v9795_v40  ;;  %2504 = vrot.lane.b32.xlu0 %v2469_v34, %s5608_s16 }
 0x5c9   : > { %9782 = vst [vmem:[#allocation16_spill] sm:$0xff] %v7161_v3  ;;  %v7199_v42 = vsel %vm840_vm4, %v9788_v57, %v9796_v15  ;;  %v410_v3 = vmul.f32 %v5760_v7, %v9795_v40 }
 0x5ca   : > { %9784 = vst [vmem:[#allocation15_spill] sm:$0xff] %v7166_v1  ;;  %v7246_v43 = vpop.permute.xlu0 %2098 }
 0x5cb   : > { %9785 = vst [vmem:[#allocation44_spill] sm:$0xff] %v7168_v9  ;;  %v7190_v9 = vsel %vm840_vm4, %v9791_v26, %v9789_v52  ;;  %v2369_v26 = vmul.f32 %v6340_v49, %v5772_v14  ;;  %v9798_v52 = vld [vmem:[#allocation53_spill] sm:$0xff]  ;;  %2395 = vrot.lane.b32.xlu2 %v2364_v62, %s5607_s12  ;;  %v9824_v62 = vld [vmem:[#allocation83_spill] sm:$0xff] }
 0x5cc   : > { %9787 = vst [vmem:[#allocation17_spill] sm:$0xff] %v7173_v51  ;;  %v409_v51 = vmul.f32 %v5772_v14, %v9795_v40  ;;  %v7211_v1 = vsel %vm840_vm4, %v9796_v15, %v9798_v52  ;;  %v9807_v15 = vld [vmem:[#allocation32_spill] sm:$0xff] }
 0x5cd   : > { %9790 = vst [vmem:[#allocation18_spill] sm:$0xff] %v7178_v30  ;;  %v9800_v30 = vld [vmem:[#allocation30_spill] sm:$0xff]  ;;  %2405 = vrot.lane.b32.xlu1 %v2369_v26, %s5607_s12 }
 0x5ce   : > { %9793 = vst [vmem:[#allocation19_spill] sm:$0xff] %v7183_v0  ;;  %v7216_v57 = vsel %vm840_vm4, %v9801_v32, %v9800_v30  ;;  %v9804_v0 = vld [vmem:[#allocation28_spill] sm:$0xff]  ;;  %v7233_v52 = vsel %vm840_vm4, %v9800_v30, %v9807_v15 }
 0x5cf   : > { %9794 = vst [vmem:[#allocation47_spill] sm:$0xff] %v7190_v9 }
 0x5d0   : > { %9797 = vst [vmem:[#allocation20_spill] sm:$0xff] %v7199_v42  ;;  %v9803_v42 = vld [vmem:[#allocation31_spill] sm:$0xff] }
 0x5d1   : > { %9799 = vst [vmem:[#allocation46_spill] sm:$0xff] %v7211_v1  ;;  %v7221_v9 = vsel %vm840_vm4, %v9804_v0, %v9803_v42  ;;  %v7228_v34 = vsel %vm840_vm4, %v9803_v42, %v9801_v32  ;;  %v9809_v1 = vld [vmem:[#allocation57_spill] sm:$0xff]  ;;  %v9811_v0 = vld [vmem:[#allocation34_spill] sm:$0xff]  ;;  %v9814_v32 = vld [vmem:[#allocation35_spill] sm:$0xff] }
 0x5d2   : > { %9802 = vst [vmem:[#allocation22_spill] sm:$0xff] %v7216_v57  ;;  %v7238_v57 = vsel %vm840_vm4, %v9807_v15, %v9809_v1  ;;  %v9815_v42 = vld [vmem:[#allocation59_spill] sm:$0xff]  ;;  %v499_v15 = vadd.f32 %v6955_v25, %v408_v41  ;;  %v500_v1 = vadd.f32 %v6968_v12, %v409_v51  ;;  %v9821_v25 = vld [vmem:[#allocation38_spill] sm:$0xff]  ;;  %v414_v41 = vmul.f32 %v5762_v8, %v9824_v62 }
 0x5d3   : > { %9805 = vst [vmem:[#allocation23_spill] sm:$0xff] %v7221_v9  ;;  %v9812_v9 = vld [vmem:[#allocation60_spill] sm:$0xff]  ;;  %v9822_v51 = vld [vmem:[#allocation62_spill] sm:$0xff] }
 0x5d4   : > { %9806 = vst [vmem:[#allocation49_spill] sm:$0xff] %v7228_v34  ;;  %v7243_v37 = vsel %vm931_vm5, %v9812_v9, %v9811_v0  ;;  %v7251_v34 = vsel %vm931_vm5, %v9815_v42, %v9814_v32  ;;  %v7256_v30 = vsel %vm931_vm5, %v9814_v32, %v9812_v9  ;;  %v502_v9 = vadd.f32 %v6963_v46, %v411_v5  ;;  %v7273_v32 = vpop.permute.xlu1 %2019 }
 0x5d5   : > { %9808 = vst [vmem:[#allocation24_spill] sm:$0xff] %v7233_v52  ;;  %v501_v52 = vadd.f32 %v6973_v53, %v410_v3  ;;  %v7278_v12 = vsel %vm931_vm5, %v9822_v51, %v9821_v25  ;;  %v412_v46 = vmul.f32 %v5780_v19, %v9795_v40  ;;  %v416_v53 = vmul.f32 %v5760_v7, %v9824_v62 }
 0x5d6   : > { %9810 = vst [vmem:[#allocation21_spill] sm:$0xff] %v7238_v57  ;;  %v9816_v57 = vld [vmem:[#allocation37_spill] sm:$0xff]  ;;  %v418_v5 = vmul.f32 %v5780_v19, %v9824_v62  ;;  %v2472_v3 = vmul.f32 %v6356_v10, %v5758_v6  ;;  %v590_v40 = vadd.f32 %v7016_v59, %v499_v15 }
 0x5d7   : > { %9813 = vst [vmem:[#allocation25_spill] sm:$0xff] %v7246_v43  ;;  %v7264_v26 = vsel %vm931_vm5, %v9811_v0, %v9816_v57  ;;  %v9818_v43 = vld [vmem:[#allocation61_spill] sm:$0xff]  ;;  %v415_v0 = vmul.f32 %v5772_v14, %v9824_v62  ;;  %v592_v8 = vadd.f32 %v7028_v23, %v501_v52  ;;  %v507_v23 = vadd.f32 %v6994_v55, %v416_v53 }
 0x5d8   : > { %9817 = vst [vmem:[#allocation26_spill] sm:$0xff] %v7264_v26  ;;  %v7269_v42 = vsel %vm931_vm5, %v9816_v57, %v9818_v43  ;;  %v417_v57 = vmul.f32 %v5758_v6, %v9824_v62  ;;  %v7286_v43 = vpop.permute.xlu2 %2106  ;;  %v593_v26 = vadd.f32 %v7033_v29, %v502_v9  ;;  %v2164_v6 = vmul.f32 %v6307_v35, %v5770_v13 }
 0x5d9   : > { %9819 = vst [vmem:[#allocation52_spill] sm:$0xff] %v7269_v42  ;;  %v9827_v42 = vld [vmem:[#allocation36_spill] sm:$0xff]  ;;  %2510 = vrot.lane.b32.xlu0 %v2472_v3, %s5608_s16  ;;  %v503_v29 = vadd.f32 %v6978_v44, %v412_v46  ;;  %v681_v15 = vadd.f32 %v7065_v4, %v590_v40  ;;  %v9830_v44 = vld [vmem:[#allocation63_spill] sm:$0xff]  ;;  %v9834_v4 = vld [vmem:[#allocation65_spill] sm:$0xff]  ;;  %v2372_v46 = vmul.f32 %v6340_v49, %v5780_v19 }
 0x5da   : > { %9820 = vst [vmem:[#allocation27_spill] sm:$0xff] %v7273_v32  ;;  %v9826_v32 = vld [vmem:[#allocation39_spill] sm:$0xff]  ;;  %2197 = vrot.lane.b32.xlu1 %v2164_v6, %s9525_s14  ;;  %v9831_v6 = vld [vmem:[#allocation54_spill] sm:$0xff]  ;;  %v2171_v53 = vmul.f32 %v6284_v16, %v5770_v13  ;;  %v9838_v3 = vld [vmem:[#allocation12_spill] sm:$0xff] }
 0x5db   : > { %9823 = vst [vmem:[#allocation51_spill] sm:$0xff] %v7278_v12  ;;  %v7299_v14 = vsel %vm931_vm5, %v9827_v42, %v9826_v32  ;;  %v591_v12 = vadd.f32 %v7011_v22, %v500_v1  ;;  %v506_v42 = vadd.f32 %v6989_v54, %v415_v0  ;;  %v2370_v22 = vmul.f32 %v6340_v49, %v5760_v7  ;;  %v7324_v54 = vpop.permute.xlu0 %2189 }
 0x5dc   : > { %9825 = vst [vmem:[#allocation29_spill] sm:$0xff] %v7286_v43  ;;  %v419_v43 = vmul.f32 %v5770_v13, %v9824_v62  ;;  %v505_v62 = vadd.f32 %v6984_v17, %v414_v41  ;;  %v7318_v59 = vsel %vm931_vm5, %v9826_v32, %v9822_v51  ;;  %v509_v1 = vadd.f32 %v7006_v58, %v418_v5  ;;  %v9832_v58 = vld [vmem:[#allocation66_spill] sm:$0xff]  ;;  %v7347_v51 = vpop.permute.xlu1 %2094  ;;  %v9837_v5 = vld [vmem:[#allocation68_spill] sm:$0xff] }
 0x5dd   : > { %9828 = vst [vmem:[#allocation30_spill] sm:$0xff] %v7299_v14  ;;  %v508_v14 = vadd.f32 %v6999_v56, %v417_v57  ;;  %v9829_v56 = vld [vmem:[#allocation41_spill] sm:$0xff]  ;;  %v682_v52 = vadd.f32 %v7073_v33, %v591_v12  ;;  %2407 = vrot.lane.b32.xlu2 %v2370_v22, %s5607_s12  ;;  %v7343_v32 = vsel %vm1022_vm6, %v9832_v58, %v9831_v6 }
 0x5de   : > { %v7329_v17 = vsel %vm931_vm5, %v9821_v25, %v9829_v56  ;;  %v510_v9 = vadd.f32 %v5856_v61, %v419_v43  ;;  %v7338_v55 = vsel %vm931_vm5, %v9829_v56, %v9830_v44  ;;  %v683_v25 = vadd.f32 %v7078_v28, %v592_v8  ;;  %9833 = vst [vmem:[#allocation55_spill] sm:$0xff] %v7347_v51  ;;  %v9835_v61 = vld [vmem:[#allocation64_spill] sm:$0xff]  ;;  %v9844_v56 = vld [vmem:[#allocation19_spill] sm:$0xff] }
 0x5df   : > { %v684_v33 = vadd.f32 %v7083_v36, %v593_v26  ;;  %v7352_v43 = vsel %vm1022_vm6, %v9835_v61, %v9834_v4  ;;  %v599_v40 = vadd.f32 %v7060_v60, %v508_v14  ;;  %v596_v12 = vadd.f32 %v7045_v31, %v505_v62  ;;  %v9839_v62 = vld [vmem:[#allocation10_spill] sm:$0xff]  ;;  %v9849_v61 = vld [vmem:[#allocation20_spill] sm:$0xff]  ;;  %v9921_v51 = vld [vmem:[#allocation119_spill] sm:$0xff] }
 0x5e0   : > { %v597_v41 = vadd.f32 %v7040_v63, %v506_v42  ;;  %v7357_v0 = vpop.permute.xlu2 %1930  ;;  %v598_v57 = vadd.f32 %v7055_v2, %v507_v23  ;;  %v600_v8 = vadd.f32 %v7050_v18, %v509_v1  ;;  %v594_v28 = vadd.f32 %v7023_v20, %v503_v29  ;;  %v9836_v63 = vld [vmem:[#allocation67_spill] sm:$0xff] }
 0x5e1   : > { %v2265_v36 = vmul.f32 %v6324_v11, %v5770_v13  ;;  %v1024_v26 = vsel %vm1022_vm6, %v9834_v4, %v9832_v58  ;;  %v773_v14 = vadd.f32 %v7134_v21, %v682_v52  ;;  %v772_v31 = vadd.f32 %v7129_v47, %v681_v15  ;;  %v9843_v23 = vld [vmem:[#allocation47_spill] sm:$0xff]  ;;  %v9845_v15 = vld [vmem:[#allocation45_spill] sm:$0xff] }
 0x5e2   : > { %v601_v60 = vadd.f32 %v6006_v45, %v510_v9  ;;  %v7373_v2 = vsel %vm1022_vm6, %v9831_v6, %v9836_v63  ;;  %v774_v18 = vadd.f32 %v7123_v50, %v683_v25  ;;  %v775_v20 = vadd.f32 %v7139_v38, %v684_v33  ;;  %2411 = vrot.lane.b32.xlu1 %v2372_v46, %s5607_s12  ;;  %v9847_v6 = vld [vmem:[#allocation56_spill] sm:$0xff]  ;;  %v9848_v33 = vld [vmem:[#allocation18_spill] sm:$0xff]  ;;  %v9855_v46 = vld [vmem:[#allocation13_spill] sm:$0xff] }
 0x5e3   : > { %2298 = vrot.lane.b32.xlu0 %v2265_v36, %s5606_s15  ;;  %v690_v21 = vadd.f32 %v7113_v48, %v599_v40  ;;  %v687_v47 = vadd.f32 %v7095_v27, %v596_v12  ;;  %v688_v45 = vadd.f32 %v7100_v24, %v597_v41  ;;  %v7388_v50 = vsel %vm1022_vm6, %v9836_v63, %v9837_v5  ;;  %v7394_v48 = vpop.permute.xlu0 %2201  ;;  %v9841_v27 = vld [vmem:[#allocation58_spill] sm:$0xff]  ;;  %v9851_v41 = vld [vmem:[#allocation71_spill] sm:$0xff] }
 0x5e4   : > { %v689_v38 = vadd.f32 %v7105_v39, %v598_v57  ;;  %v691_v42 = vadd.f32 %v9838_v3, %v600_v8  ;;  %v685_v22 = vadd.f32 %v9839_v62, %v594_v28  ;;  %9840 = vst [vmem:[#allocation31_spill] sm:$0xff] %v7394_v48  ;;  %v9842_v24 = vld [vmem:[#allocation70_spill] sm:$0xff]  ;;  %v864_v1 = vadd.f32 %v9843_v23, %v773_v14  ;;  %v9846_v39 = vld [vmem:[#allocation69_spill] sm:$0xff]  ;;  %v7417_v12 = vpop.permute.xlu1 %2104  ;;  %v9852_v8 = vld [vmem:[#allocation15_spill] sm:$0xff] }
 0x5e5   : > { %v7399_v29 = vsel %vm1022_vm6, %v9842_v24, %v9841_v27  ;;  %v863_v52 = vadd.f32 %v9844_v56, %v772_v31  ;;  %v692_v9 = vadd.f32 %v9845_v15, %v601_v60  ;;  %2211 = vrot.lane.b32.xlu2 %v2171_v53, %s9525_s14  ;;  %v7408_v58 = vsel %vm1022_vm6, %v9847_v6, %v9846_v39  ;;  %v9853_v36 = vld [vmem:[#allocation14_spill] sm:$0xff]  ;;  %v9854_v31 = vld [vmem:[#allocation16_spill] sm:$0xff]  ;;  %v9856_v3 = vld [vmem:[#allocation17_spill] sm:$0xff] }
 0x5e6   : > { %v7413_v25 = vsel %vm1022_vm6, %v9846_v39, %v9842_v24  ;;  %v865_v4 = vadd.f32 %v9848_v33, %v774_v18  ;;  %v866_v40 = vadd.f32 %v9849_v61, %v775_v20  ;;  %9850 = vst [vmem:[#allocation28_spill] sm:$0xff] %v7417_v12  ;;  %v1031_v57 = vsel %vm1022_vm6, %v9841_v27, %v9851_v41  ;;  %v9857_v62 = vld [vmem:[#allocation40_spill] sm:$0xff]  ;;  %v9858_v23 = vld [vmem:[#allocation50_spill] sm:$0xff] }
 0x5e7   : > { %v781_v28 = vadd.f32 %v9852_v8, %v690_v21  ;;  %v778_v14 = vadd.f32 %v9853_v36, %v687_v47  ;;  %v779_v60 = vadd.f32 %v9854_v31, %v688_v45  ;;  %v780_v53 = vadd.f32 %v9855_v46, %v689_v38  ;;  %v9859_v56 = vld [vmem:[#allocation72_spill] sm:$0xff]  ;;  %v9860_v15 = vld [vmem:[#allocation26_spill] sm:$0xff]  ;;  %v9866_v8 = vld [vmem:[#allocation75_spill] sm:$0xff] }
 0x5e8   : > { %v7425_v63 = vpop.permute.xlu2 %2187  ;;  %v782_v18 = vadd.f32 %v9856_v3, %v691_v42  ;;  %v776_v20 = vadd.f32 %v9857_v62, %v685_v22  ;;  %v2473_v24 = vmul.f32 %v6356_v10, %v5780_v19  ;;  %v955_v27 = vadd.f32 %v7256_v30, %v864_v1  ;;  %v9861_v22 = vld [vmem:[#allocation82_spill] sm:$0xff]  ;;  %v9862_v6 = vld [vmem:[#allocation24_spill] sm:$0xff]  ;;  %v9863_v30 = vld [vmem:[#allocation23_spill] sm:$0xff] }
 0x5e9   : > { %v954_v21 = vadd.f32 %v7251_v34, %v863_v52  ;;  %v783_v47 = vadd.f32 %v9858_v23, %v692_v9  ;;  %v1032_v45 = vsel %vm1022_vm6, %v9851_v41, %v9859_v56  ;;  %v956_v38 = vadd.f32 %v7243_v37, %v865_v4  ;;  %v9864_v34 = vld [vmem:[#allocation49_spill] sm:$0xff]  ;;  %v9865_v9 = vld [vmem:[#allocation6_spill] sm:$0xff] }
 0x5ea   : > { %v957_v42 = vadd.f32 %v9860_v15, %v866_v40  ;;  %v2464_v39 = vmul.f32 %v9861_v22, %v5760_v7  ;;  %v872_v33 = vadd.f32 %v9862_v6, %v781_v28  ;;  %v869_v1 = vadd.f32 %v9863_v30, %v778_v14  ;;  %v9867_v41 = vld [vmem:[#allocation74_spill] sm:$0xff]  ;;  %v9869_v36 = vld [vmem:[#allocation21_spill] sm:$0xff]  ;;  %v9873_v6 = vld [vmem:[#allocation76_spill] sm:$0xff] }
 0x5eb   : > { %2512 = vrot.lane.b32.xlu0 %v2473_v24, %s5608_s16  ;;  %v870_v52 = vadd.f32 %v9864_v34, %v779_v60  ;;  %v2462_v61 = vmul.f32 %v9861_v22, %v9865_v9  ;;  %v1116_v37 = vsel %vm1113_vm7, %v9867_v41, %v9866_v8  ;;  %v9868_v4 = vld [vmem:[#allocation22_spill] sm:$0xff]  ;;  %v873_v31 = vadd.f32 %v9869_v36, %v782_v18  ;;  %v7455_v28 = vpop.permute.xlu0 %2207  ;;  %v9871_v14 = vld [vmem:[#allocation81_spill] sm:$0xff] }
 0x5ec   : > { %v871_v40 = vadd.f32 %v9868_v4, %v780_v53  ;;  %v9870_v46 = vld [vmem:[#allocation46_spill] sm:$0xff]  ;;  %2494 = vrot.lane.b32.xlu1 %v2464_v39, %s5608_s16  ;;  %v413_v60 = vmul.f32 %v5770_v13, %v9871_v14  ;;  %v1046_v62 = vadd.f32 %v1024_v26, %v955_v27  ;;  %v1045_v24 = vadd.f32 %v7352_v43, %v954_v21  ;;  %v9872_v23 = vld [vmem:[#allocation57_spill] sm:$0xff]  ;;  %v7472_v27 = vpop.permute.xlu1 %1918 }
 0x5ed   : > { %v867_v3 = vadd.f32 %v9870_v46, %v776_v20  ;;  %v874_v15 = vadd.f32 %v9872_v23, %v783_v47  ;;  %2490 = vrot.lane.b32.xlu2 %v2462_v61, %s5608_s16  ;;  %v9874_v53 = vld [vmem:[#allocation73_spill] sm:$0xff]  ;;  %v1115_v20 = vsel %vm1113_vm7, %v9873_v6, %v9867_v41  ;;  %v1047_v26 = vadd.f32 %v7343_v32, %v956_v38  ;;  %v9877_v21 = vld [vmem:[#allocation30_spill] sm:$0xff]  ;;  %v9879_v41 = vld [vmem:[#allocation51_spill] sm:$0xff] }
 0x5ee   : > { %v1114_v18 = vsel %vm1113_vm7, %v9874_v53, %v9873_v6  ;;  %v9875_v39 = vld [vmem:[#allocation77_spill] sm:$0xff]  ;;  %9876 = vst [vmem:[#allocation32_spill] sm:$0xff] %v7472_v27  ;;  %v963_v43 = vadd.f32 %v7329_v17, %v872_v33  ;;  %v960_v47 = vadd.f32 %v9877_v21, %v869_v1  ;;  %v961_v34 = vadd.f32 %v7318_v59, %v870_v52  ;;  %v9881_v32 = vld [vmem:[#allocation84_spill] sm:$0xff]  ;;  %v9892_v21 = vld [vmem:[#allocation79_spill] sm:$0xff] }
 0x5ef   : > { %v1117_v30 = vsel %vm1113_vm7, %v9866_v8, %v9875_v39  ;;  %v1048_v61 = vadd.f32 %v7373_v2, %v957_v42  ;;  %v962_v36 = vadd.f32 %v9879_v41, %v871_v40  ;;  %v964_v46 = vadd.f32 %v7338_v55, %v873_v31  ;;  %v9880_v8 = vld [vmem:[#allocation52_spill] sm:$0xff]  ;;  %v9882_v59 = vld [vmem:[#allocation9_spill] sm:$0xff]  ;;  %v9903_v27 = vld [vmem:[#allocation90_spill] sm:$0xff] }
 0x5f0   : > { %v7478_v4 = vpop.permute.xlu2 %2193  ;;  %v958_v14 = vadd.f32 %v9880_v8, %v867_v3  ;;  %v2565_v38 = vmul.f32 %v9881_v32, %v5760_v7  ;;  %v1137_v23 = vadd.f32 %v1115_v20, %v1046_v62  ;;  %v7485_v17 = vadd.f32 %v1114_v18, %v1045_v24  ;;  %v9884_v42 = vld [vmem:[#allocation8_spill] sm:$0xff]  ;;  %v9894_v8 = vld [vmem:[#allocation89_spill] sm:$0xff] }
 0x5f1   : > { %9878 = vst [vmem:[#allocation34_spill] sm:$0xff] %v7478_v4  ;;  %v965_v33 = vadd.f32 %v9830_v44, %v874_v15  ;;  %v7489_v1 = vadd.f32 %v9882_v59, %v413_v60  ;;  %v7491_v2 = vadd.f32 %v1116_v37, %v1047_v26  ;;  %v2470_v52 = vmul.f32 %v6356_v10, %v9884_v42  ;;  %v5496_v55 = vld [vmem:[%s5755_s24] sm:$0xff]  ;;  %s10088_s24 = smov 126  }
 0x5f2   : > { %v7497_v40 = vperm.slane %v5496_v55, 6  ;;  %v1054_v31 = vadd.f32 %v1031_v57, %v963_v43  ;;  %v1051_v3 = vadd.f32 %v7408_v58, %v960_v47  ;;  %v1139_v62 = vadd.f32 %v1117_v30, %v1048_v61  ;;  %v9886_v44 = vld [vmem:[#allocation5_spill] sm:$0xff]  ;;  %v9888_v58 = vld [vmem:[#allocation80_spill] sm:$0xff]  ;;  %v9889_v30 = vld [vmem:[#allocation78_spill] sm:$0xff] }
 0x5f3   : > { %9883 = vst [vmem:[#allocation60_spill] sm:$0xff] %v7489_v1  ;;  %2595 = vrot.lane.b32.xlu0 %v2565_v38, %s5609_s22  ;;  %v2465_v60 = vmul.f32 %v9861_v22, %v9886_v44  ;;  %v1052_v24 = vadd.f32 %v7413_v25, %v961_v34  ;;  %v1053_v37 = vadd.f32 %v7399_v29, %v962_v36  ;;  %v7510_v53 = vpop.permute.xlu0 %2195  ;;  %v9895_v38 = vld [vmem:[#allocation86_spill] sm:$0xff]  ;;  %v9899_v55 = vld [vmem:[#allocation92_spill] sm:$0xff]  ;;  %vm1932_vm5 = vcmask 343040  }
 0x5f4   : > { %9885 = vst [vmem:[#allocation35_spill] sm:$0xff] %v7497_v40  ;;  %v7504_v15 = vadd.f32 %v1032_v45, %v964_v46  ;;  %v7507_v6 = vadd.f32 %v7388_v50, %v958_v14  ;;  %2506 = vrot.lane.b32.xlu1 %v2470_v52, %s5608_s16  ;;  %v7513_v57 = vadd.f32 %v9859_v56, %v965_v33  ;;  %v7528_v25 = vpop.permute.xlu1 %2110  ;;  %v9893_v46 = vld [vmem:[#allocation85_spill] sm:$0xff]  ;;  %v9896_v33 = vld [vmem:[#allocation91_spill] sm:$0xff]  ;;  %vm2023_vm6 = vcmask 334848  }
 0x5f5   : > { %9887 = vst [vmem:[#allocation59_spill] sm:$0xff] %v7510_v53  ;;  %2496 = vrot.lane.b32.xlu2 %v2465_v60, %s5608_s16  ;;  %v7518_v18 = vmul.f32 %v9888_v58, %v5770_v13  ;;  %v7522_v29 = vmul.f32 %v9861_v22, %v5780_v19  ;;  %v7526_v50 = vmul.f32 %v6340_v49, %v5770_v13  ;;  %v9898_v52 = vld [vmem:[#allocation87_spill] sm:$0xff] }
 0x5f6   : > { %v2165_v56 = vmul.f32 %v7497_v40, %v6307_v35  ;;  %v7534_v45 = vmul.f32 %v7497_v40, %v6284_v16  ;;  %v2266_v20 = vmul.f32 %v6324_v11, %v7497_v40  ;;  %v7540_v26 = vmul.f32 %v9889_v30, %v5770_v13  ;;  %v9904_v22 = vld [vmem:[#allocation95_spill] sm:$0xff]  ;;  %v9906_v30 = vld [vmem:[#allocation100_spill] sm:$0xff] }
 0x5f7   : > { %v2571_v47 = vmul.f32 %v9892_v21, %v9884_v42  ;;  %v7548_v34 = vmul.f32 %v9892_v21, %v5760_v7  ;;  %v7552_v16 = vmul.f32 %v9892_v21, %v9865_v9  ;;  %v7556_v11 = vmul.f32 %v9888_v58, %v7497_v40 }
 0x5f8   : > { %9890 = vst [vmem:[#allocation37_spill] sm:$0xff] %v7540_v26  ;;  %v7542_v43 = vpop.permute.xlu2 %2205  ;;  %v7560_v35 = vmul.f32 %v9881_v32, %v9865_v9  ;;  %v7564_v61 = vmul.f32 %v9881_v32, %v9886_v44  ;;  %v7568_v41 = vmul.f32 %v9881_v32, %v9884_v42  ;;  %v7572_v36 = vmul.f32 %v9892_v21, %v9886_v44 }
 0x5f9   : > { %9891 = vst [vmem:[#allocation38_spill] sm:$0xff] %v7542_v43  ;;  %v1122_v14 = vsel %vm1113_vm7, %v9894_v8, %v9893_v46  ;;  %v1119_v9 = vsel %vm1113_vm7, %v9896_v33, %v9895_v38  ;;  %v7582_v59 = vmul.f32 %v9881_v32, %v5770_v13  ;;  %v7586_v42 = vmul.f32 %v9881_v32, %v5780_v19  ;;  %v9902_v33 = vld [vmem:[#allocation94_spill] sm:$0xff] }
 0x5fa   : > { %v1206_v44 = vsel %vm1204_vm8, %v9899_v55, %v9898_v52  ;;  %v7594_v60 = vmul.f32 %v9892_v21, %v7497_v40  ;;  %v7598_v58 = vmul.f32 %v9892_v21, %v5780_v19  ;;  %v1120_v5 = vsel %vm1113_vm7, %v9895_v38, %v9902_v33  ;;  %v9905_v19 = vld [vmem:[#allocation97_spill] sm:$0xff] }
 0x5fb   : > { %9897 = vst [vmem:[#allocation62_spill] sm:$0xff] %v7586_v42  ;;  %2607 = vrot.lane.b32.xlu0 %v2571_v47, %s5609_s22  ;;  %v1121_v32 = vsel %vm1113_vm7, %v9902_v33, %v9894_v8  ;;  %v1210_v47 = vsel %vm1204_vm8, %v9904_v22, %v9903_v27  ;;  %v2471_v48 = vmul.f32 %v6356_v10, %v5760_v7  ;;  %v7615_v38 = vpop.permute.xlu0 %2290  ;;  %v9907_v7 = vld [vmem:[#allocation93_spill] sm:$0xff] }
 0x5fc   : > { %9900 = vst [vmem:[#allocation83_spill] sm:$0xff] %v7594_v60  ;;  %v1145_v12 = vadd.f32 %v1122_v14, %v1054_v31  ;;  %v1142_v1 = vadd.f32 %v1119_v9, %v1051_v3  ;;  %v1205_v21 = vsel %vm1204_vm8, %v9905_v19, %v9899_v55  ;;  %2199 = vrot.lane.b32.xlu1 %v2165_v56, %s9525_s14  ;;  %v9909_v55 = vld [vmem:[#allocation98_spill] sm:$0xff]  ;;  %v9910_v19 = vld [vmem:[#allocation103_spill] sm:$0xff] }
 0x5fd   : > { %9901 = vst [vmem:[#allocation39_spill] sm:$0xff] %v7598_v58  ;;  %v7619_v8 = vmul.f32 %v6356_v10, %v5770_v13  ;;  %v1228_v33 = vadd.f32 %v1206_v44, %v1137_v23  ;;  %v1207_v22 = vsel %vm1204_vm8, %v9898_v52, %v9906_v30  ;;  %v1208_v31 = vsel %vm1204_vm8, %v9906_v30, %v9907_v7  ;;  %v7635_v44 = vpop.permute.xlu1 %2191  ;;  %v9912_v10 = vld [vmem:[#allocation96_spill] sm:$0xff]  ;;  %v9913_v13 = vld [vmem:[#allocation101_spill] sm:$0xff]  ;;  %v9962_v60 = vld [vmem:[#allocation11_spill] sm:$0xff] }
 0x5fe   : > { %2508 = vrot.lane.b32.xlu2 %v2471_v48, %s5608_s16  ;;  %v7630_v3 = vmul.f32 %v6340_v49, %v7497_v40  ;;  %v1143_v56 = vadd.f32 %v1120_v5, %v1052_v24  ;;  %v1144_v14 = vadd.f32 %v1121_v32, %v1053_v37  ;;  %v1233_v9 = vadd.f32 %v1210_v47, %v1142_v1  ;;  %v9914_v48 = vld [vmem:[#allocation105_spill] sm:$0xff]  ;;  %v9915_v5 = vld [vmem:[#allocation104_spill] sm:$0xff]  ;;  %v9916_v47 = vld [vmem:[#allocation106_spill] sm:$0xff] }
 0x5ff   : > { %v1212_v23 = vsel %vm1204_vm8, %v9910_v19, %v9909_v55  ;;  %9911 = vst [vmem:[#allocation41_spill] sm:$0xff] %v7635_v44  ;;  %v1227_v52 = vadd.f32 %v1205_v21, %v7485_v17  ;;  %v1296_v30 = vsel %vm1295_vm9, %v9913_v13, %v9912_v10  ;;  %v1211_v49 = vsel %vm1204_vm8, %v9903_v27, %v9910_v19  ;;  %v9917_v21 = vld [vmem:[#allocation102_spill] sm:$0xff]  ;;  %v9919_v44 = vld [vmem:[#allocation109_spill] sm:$0xff] }
 0x600   : > { %9908 = vst [vmem:[#allocation36_spill] sm:$0xff] %v7630_v3  ;;  %v1299_v32 = vsel %vm1295_vm9, %v9915_v5, %v9914_v48  ;;  %v7647_v1 = vpop.permute.xlu2 %2021  ;;  %v1229_v24 = vadd.f32 %v1207_v22, %v7491_v2  ;;  %v1230_v37 = vadd.f32 %v1208_v31, %v1139_v62  ;;  %v1213_v17 = vsel %vm1204_vm8, %v9909_v55, %v9916_v47  ;;  %v9918_v3 = vld [vmem:[#allocation107_spill] sm:$0xff]  ;;  %v9920_v31 = vld [vmem:[#allocation114_spill] sm:$0xff] }
 0x601   : > { %v1303_v13 = vsel %vm1295_vm9, %v9918_v3, %v9917_v21  ;;  %v1235_v40 = vadd.f32 %v1212_v23, %v1144_v14  ;;  %v1297_v27 = vsel %vm1295_vm9, %v9912_v10, %v9919_v44  ;;  %v1298_v19 = vsel %vm1295_vm9, %v9919_v44, %v9915_v5  ;;  %v9922_v23 = vld [vmem:[#allocation110_spill] sm:$0xff]  ;;  %v9923_v44 = vld [vmem:[#allocation112_spill] sm:$0xff]  ;;  %v9924_v5 = vld [vmem:[#allocation99_spill] sm:$0xff] }
 0x602   : > { %v1318_v2 = vadd.f32 %v1296_v30, %v1227_v52  ;;  %v1234_v62 = vadd.f32 %v1211_v49, %v1143_v56  ;;  %v1321_v22 = vadd.f32 %v1299_v32, %v1230_v37  ;;  %v1394_v55 = vsel %vm1386_vm10, %v9921_v51, %v9920_v31  ;;  %v9925_v52 = vld [vmem:[#allocation126_spill] sm:$0xff]  ;;  %v9926_v30 = vld [vmem:[#allocation131_spill] sm:$0xff]  ;;  %v9928_v32 = vld [vmem:[#allocation108_spill] sm:$0xff] }
 0x603   : > { %2300 = vrot.lane.b32.xlu0 %v2266_v20, %s5606_s15  ;;  %v1236_v58 = vadd.f32 %v1213_v17, %v1145_v12  ;;  %v1326_v14 = vadd.f32 %v1303_v13, %v1235_v40  ;;  %v1123_v10 = vsel %vm1113_vm7, %v9893_v46, %v9922_v23  ;;  %v1319_v4 = vadd.f32 %v1297_v27, %v1228_v33  ;;  %v7677_v12 = vpop.permute.xlu0 %2302  ;;  %v9930_v37 = vld [vmem:[#allocation138_spill] sm:$0xff]  ;;  %v9931_v17 = vld [vmem:[#allocation143_spill] sm:$0xff] }
 0x604   : > { %v1320_v53 = vadd.f32 %v1298_v19, %v1229_v24  ;;  %v1301_v56 = vsel %vm1295_vm9, %v9924_v5, %v9923_v44  ;;  %v1485_v49 = vsel %vm1477_vm11, %v9926_v30, %v9925_v52  ;;  %2312 = vrot.lane.b32.xlu1 %v7518_v18, %s5606_s15  ;;  %9927 = vst [vmem:[#allocation63_spill] sm:$0xff] %v7677_v12  ;;  %v9929_v24 = vld [vmem:[#allocation113_spill] sm:$0xff]  ;;  %v9933_v19 = vld [vmem:[#allocation115_spill] sm:$0xff] }
 0x605   : > { %v1302_v40 = vsel %vm1295_vm9, %v9923_v44, %v9918_v3  ;;  %v1417_v20 = vadd.f32 %v1394_v55, %v1326_v14  ;;  %v1146_v46 = vadd.f32 %v1123_v10, %v7504_v15  ;;  %v1147_v33 = vadd.f32 %v9922_v23, %v7513_v57  ;;  %v7693_v3 = vpop.permute.xlu1 %2203  ;;  %v9934_v57 = vld [vmem:[#allocation117_spill] sm:$0xff]  ;;  %v9935_v23 = vld [vmem:[#allocation116_spill] sm:$0xff]  ;;  %v9936_v44 = vld [vmem:[#allocation150_spill] sm:$0xff] }
 0x606   : > { %2213 = vrot.lane.b32.xlu2 %v7534_v45, %s9525_s14  ;;  %v1387_v18 = vsel %vm1386_vm10, %v9929_v24, %v9928_v32  ;;  %v1576_v13 = vsel %vm1568_vm12, %v9931_v17, %v9930_v37  ;;  %9932 = vst [vmem:[#allocation54_spill] sm:$0xff] %v7693_v3  ;;  %v1324_v27 = vadd.f32 %v1301_v56, %v1233_v9  ;;  %v9937_v5 = vld [vmem:[#allocation155_spill] sm:$0xff]  ;;  %v9938_v3 = vld [vmem:[#allocation118_spill] sm:$0xff]  ;;  %s5614_s14 = smov 113  }
 0x607   : > { %v1118_v45 = vsel %vm1113_vm7, %v9875_v39, %v9933_v19  ;;  %v1508_v55 = vadd.f32 %v1485_v49, %v1417_v20  ;;  %v7698_v14 = vadd.f32 %v1302_v40, %v1234_v62  ;;  %v1390_v10 = vsel %vm1386_vm10, %v9935_v23, %v9934_v57  ;;  %v9939_v40 = vld [vmem:[#allocation121_spill] sm:$0xff]  ;;  %v9940_v19 = vld [vmem:[#allocation122_spill] sm:$0xff] }
 0x608   : > { %v2289_v15 = vpop.permute.xlu2 %2288  ;;  %v1667_v24 = vsel %vm1659_vm14, %v9937_v5, %v9936_v44  ;;  %v1409_v56 = vadd.f32 %v1387_v18, %v1318_v2  ;;  %v1304_v39 = vsel %vm1295_vm9, %v9917_v21, %v9938_v3  ;;  %v7714_v62 = vadd.f32 %v1118_v45, %v7507_v6  ;;  %v9942_v5 = vld [vmem:[#allocation167_spill] sm:$0xff] }
 0x609   : > { %v7708_v9 = vsel %vm2316_vm13, %v2289_v15, %v7615_v38  ;;  %v1599_v49 = vadd.f32 %v1576_v13, %v1508_v55  ;;  %v1388_v20 = vsel %vm1386_vm10, %v9928_v32, %v9939_v40  ;;  %v1214_v26 = vsel %vm1204_vm8, %v9916_v47, %v9940_v19  ;;  %v9941_v15 = vld [vmem:[#allocation162_spill] sm:$0xff] }
 0x60a   : > { %v1758_v2 = vsel %vm1750_vm15, %v9942_v5, %v9941_v15  ;;  %v7727_v21 = vadd.f32 %v1390_v10, %v1321_v22  ;;  %v1389_v6 = vsel %vm1386_vm10, %v9939_v40, %v9935_v23  ;;  %v7732_v32 = vadd.f32 %v1304_v39, %v1236_v58  ;;  %v9943_v47 = vld [vmem:[#allocation134_spill] sm:$0xff]  ;;  %v9945_v5 = vld [vmem:[#allocation179_spill] sm:$0xff]  ;;  %v9963_v15 = vld [vmem:[#allocation29_spill] sm:$0xff] }
 0x60b   : > { %2413 = vrot.lane.b32.xlu0 %v7526_v50, %s5607_s12  ;;  %v1690_v18 = vadd.f32 %v1667_v24, %v1599_v49  ;;  %v1238_v13 = vadd.f32 %v9940_v19, %v1147_v33  ;;  %v1305_v45 = vsel %vm1295_vm9, %v9938_v3, %v9943_v47  ;;  %v9944_v55 = vld [vmem:[#allocation174_spill] sm:$0xff]  ;;  %v7743_v22 = vpop.permute.xlu0 %2308  ;;  %v7745_v23 = vadd.f32 %v1388_v20, %v1319_v4 }
 0x60c   : > { %v1849_v50 = vsel %vm1841_vm3, %v9945_v5, %v9944_v55  ;;  %2591 = vrot.lane.b32.xlu1 %v7560_v35, %s5609_s22  ;;  %9946 = vst [vmem:[#allocation66_spill] sm:$0xff] %v7743_v22  ;;  %v1237_v10 = vadd.f32 %v1214_v26, %v1146_v46  ;;  %v7749_v33 = vadd.f32 %v1389_v6, %v1320_v53  ;;  %v9947_v19 = vld [vmem:[#allocation146_spill] sm:$0xff]  ;;  %v9950_v35 = vld [vmem:[#allocation191_spill] sm:$0xff]  ;;  %v9952_v26 = vld [vmem:[#allocation124_spill] sm:$0xff]  ;;  %vm2114_vm7 = vcmask 326656  }
 0x60d   : > { %v1781_v58 = vadd.f32 %v1758_v2, %v1690_v18  ;;  %v1329_v3 = vadd.f32 %v9943_v47, %v1238_v13  ;;  %v9948_v24 = vld [vmem:[#allocation130_spill] sm:$0xff]  ;;  %v7758_v4 = vpop.permute.xlu1 %2009  ;;  %v9953_v46 = vld [vmem:[#allocation111_spill] sm:$0xff]  ;;  %v2656_v6 = vld [vmem:[%s9315_s2] sm:$0xff]  ;;  %v2122_v17 = vsel %vm2114_vm7, %v9963_v15, %v9962_v60 }
 0x60e   : > { %2498 = vrot.lane.b32.xlu2 %v7522_v29, %s5608_s16  ;;  %v1396_v39 = vsel %vm1386_vm10, %v9948_v24, %v9947_v19  ;;  %v9949_v49 = vld [vmem:[#allocation186_spill] sm:$0xff]  ;;  %9951 = vst [vmem:[#allocation65_spill] sm:$0xff] %v7758_v4  ;;  %v1392_v20 = vsel %vm1386_vm10, %v9953_v46, %v9952_v26  ;;  %v1328_v2 = vadd.f32 %v1305_v45, %v1237_v10  ;;  %v9954_v18 = vld [vmem:[#allocation120_spill] sm:$0xff]  ;;  %v9955_v13 = vld [vmem:[#allocation125_spill] sm:$0xff] }
 0x60f   : > { %v1940_v40 = vsel %vm1932_vm5, %v9950_v35, %v9949_v49  ;;  %v1872_v29 = vadd.f32 %v1849_v50, %v1781_v58  ;;  %v1478_v47 = vsel %vm1477_vm11, %v9955_v13, %v9954_v18  ;;  %v1420_v35 = vadd.f32 %v9947_v19, %v1329_v3  ;;  %v9956_v4 = vld [vmem:[#allocation158_spill] sm:$0xff]  ;;  %v9959_v45 = vld [vmem:[#allocation203_spill] sm:$0xff]  ;;  %v9978_v15 = vld [vmem:[#allocation156_spill] sm:$0xff] }
 0x610   : > { %v7763_v53 = vpop.permute.xlu2 %2294  ;;  %v9957_v5 = vld [vmem:[#allocation142_spill] sm:$0xff]  ;;  %v1393_v10 = vsel %vm1386_vm10, %v9952_v26, %v9921_v51  ;;  %v1419_v58 = vadd.f32 %v1396_v39, %v1328_v2  ;;  %v7781_v57 = vadd.f32 %v1392_v20, %v1324_v27  ;;  %v9964_v51 = vld [vmem:[#allocation132_spill] sm:$0xff]  ;;  %v9965_v39 = vld [vmem:[#allocation137_spill] sm:$0xff]  ;;  %v2224_v20 = vsel %vm2215_vm1, %v7542_v43, %v7455_v28 }
 0x611   : > { %v1487_v49 = vsel %vm1477_vm11, %v9957_v5, %v9956_v4  ;;  %v9958_v46 = vld [vmem:[#allocation198_spill] sm:$0xff]  ;;  %v1963_v42 = vadd.f32 %v1940_v40, %v1872_v29  ;;  %v1511_v13 = vadd.f32 %v9956_v4, %v1420_v35  ;;  %v1569_v27 = vsel %vm1568_vm12, %v9965_v39, %v9964_v51 }
 0x612   : > { %v2031_v50 = vsel %vm2023_vm6, %v9959_v45, %v9958_v46  ;;  %v9960_v3 = vld [vmem:[#allocation170_spill] sm:$0xff]  ;;  %v1500_v45 = vadd.f32 %v1478_v47, %v1409_v56  ;;  %v1510_v46 = vadd.f32 %v1487_v49, %v1419_v58  ;;  %v9971_v47 = vld [vmem:[#allocation129_spill] sm:$0xff]  ;;  %v9973_v58 = vld [vmem:[#allocation144_spill] sm:$0xff] }
 0x613   : > { %v9961_v19 = vld [vmem:[#allocation154_spill] sm:$0xff]  ;;  %2660 = vperm.xlu0 %5179, %v2656_v6   ;;  %v2054_v12 = vadd.f32 %v2031_v50, %v1963_v42  ;;  %v1602_v40 = vadd.f32 %v9960_v3, %v1511_v13  ;;  %v7802_v56 = vpop.permute.xlu0 %2296  ;;  %v9969_v42 = vld [vmem:[#allocation127_spill] sm:$0xff]  ;;  %v9972_v50 = vld [vmem:[#allocation128_spill] sm:$0xff] }
 0x614   : > { %v1578_v55 = vsel %vm1568_vm12, %v9961_v19, %v9960_v3  ;;  %v9966_v35 = vld [vmem:[#allocation182_spill] sm:$0xff]  ;;  %2597 = vrot.lane.b32.xlu1 %v7564_v61, %s5609_s22  ;;  %9968 = vst [vmem:[#allocation64_spill] sm:$0xff] %v7802_v56  ;;  %v1209_v49 = vsel %vm1204_vm8, %v9907_v7, %v9969_v42  ;;  %v7812_v6 = vsel %vm2316_vm13, %v7763_v53, %v7802_v56  ;;  %v9974_v13 = vld [vmem:[#allocation149_spill] sm:$0xff] }
 0x615   : > { %v9967_v4 = vld [vmem:[#allocation166_spill] sm:$0xff]  ;;  %v1601_v2 = vadd.f32 %v1578_v55, %v1510_v46  ;;  %v2145_v29 = vadd.f32 %v2122_v17, %v2054_v12  ;;  %9970 = vst [vmem:[#allocation67_spill] sm:$0xff] %v7812_v6  ;;  %v1481_v61 = vsel %vm1477_vm11, %v9972_v50, %v9971_v47  ;;  %v1660_v3 = vsel %vm1659_vm14, %v9974_v13, %v9973_v58  ;;  %v9979_v13 = vld [vmem:[#allocation161_spill] sm:$0xff] }
 0x616   : > { %v1669_v26 = vsel %vm1659_vm14, %v9967_v4, %v9966_v35  ;;  %2593 = vrot.lane.b32.xlu2 %v7568_v41, %s5609_s22  ;;  %v1693_v7 = vadd.f32 %v9966_v35, %v1602_v40  ;;  %v9975_v55 = vld [vmem:[#allocation194_spill] sm:$0xff]  ;;  %v7824_v41 = vpop.permute.xlu1 %2209  ;;  %v1591_v46 = vadd.f32 %v1569_v27, %v1500_v45  ;;  %v1751_v40 = vsel %vm1750_vm15, %v9979_v13, %v9978_v15 }
 0x617   : > { %v9976_v12 = vld [vmem:[#allocation178_spill] sm:$0xff]  ;;  %9977 = vst [vmem:[#allocation12_spill] sm:$0xff] %v7824_v41  ;;  %v1692_v39 = vadd.f32 %v1669_v26, %v1601_v2  ;;  %v2248_v42 = vadd.f32 %v2224_v20, %v2145_v29  ;;  %v7829_v56 = vsel %vm2215_vm1, %v7455_v28, %v7824_v41  ;;  %v1395_v28 = vsel %vm1386_vm10, %v9920_v31, %v9948_v24  ;;  %v9982_v29 = vld [vmem:[#allocation168_spill] sm:$0xff] }
 0x618   : > { %v1760_v17 = vsel %vm1750_vm15, %v9976_v12, %v9975_v55  ;;  %v7831_v43 = vpop.permute.xlu2 %2306  ;;  %v1784_v35 = vadd.f32 %v9975_v55, %v1693_v7  ;;  %v9980_v6 = vld [vmem:[#allocation206_spill] sm:$0xff]  ;;  %v1682_v27 = vadd.f32 %v1660_v3, %v1591_v46  ;;  %v1416_v2 = vadd.f32 %v1393_v10, %v7698_v14  ;;  %v9983_v7 = vld [vmem:[#allocation173_spill] sm:$0xff]  ;;  %v9985_v10 = vld [vmem:[#allocation180_spill] sm:$0xff] }
 0x619   : > { %v9981_v60 = vld [vmem:[#allocation190_spill] sm:$0xff]  ;;  %v2325_v45 = vsel %vm2316_vm13, %v7831_v43, %v7743_v22  ;;  %v1783_v26 = vadd.f32 %v1760_v17, %v1692_v39  ;;  %v1842_v55 = vsel %vm1841_vm3, %v9983_v7, %v9982_v29  ;;  %v1231_v31 = vadd.f32 %v1209_v49, %v7714_v62  ;;  %v9986_v17 = vld [vmem:[#allocation185_spill] sm:$0xff]  ;;  %v9987_v39 = vld [vmem:[#allocation27_spill] sm:$0xff] }
 0x61a   : > { %v1851_v47 = vsel %vm1841_vm3, %v9981_v60, %v9980_v6  ;;  %v7846_v20 = vadd.f32 %v2325_v45, %v2248_v42  ;;  %v1875_v13 = vadd.f32 %v9980_v6, %v1784_v35  ;;  %v9984_v41 = vld [vmem:[#allocation202_spill] sm:$0xff]  ;;  %v1503_v24 = vadd.f32 %v1481_v61, %v7727_v21  ;;  %v9988_v62 = vld [vmem:[#allocation133_spill] sm:$0xff]  ;;  %v9990_v61 = vld [vmem:[#allocation123_spill] sm:$0xff] }
 0x61b   : > { %v1942_v22 = vsel %vm1932_vm5, %v9984_v41, %v7357_v0  ;;  %2514 = vrot.lane.b32.xlu0 %v7619_v8, %s5608_s16  ;;  %v1773_v42 = vadd.f32 %v1751_v40, %v1682_v27  ;;  %v1874_v3 = vadd.f32 %v1851_v47, %v1783_v26  ;;  %v1418_v14 = vadd.f32 %v1395_v28, %v7732_v32  ;;  %v7870_v8 = vpop.permute.xlu0 %2391  ;;  %v9991_v45 = vld [vmem:[#allocation192_spill] sm:$0xff]  ;;  %v9992_v28 = vld [vmem:[#allocation197_spill] sm:$0xff] }
 0x61c   : > { %v1933_v46 = vsel %vm1932_vm5, %v9986_v17, %v9985_v10  ;;  %v1966_v6 = vadd.f32 %v7357_v0, %v1875_v13  ;;  %v2033_v35 = vsel %vm2023_vm6, %v9987_v39, %v7647_v1  ;;  %2609 = vrot.lane.b32.xlu1 %v7548_v34, %s5609_s22  ;;  %v1479_v21 = vsel %vm1477_vm11, %v9954_v18, %v9988_v62  ;;  %v9989_v0 = vld [vmem:[#allocation136_spill] sm:$0xff]  ;;  %v9993_v13 = vld [vmem:[#allocation139_spill] sm:$0xff] }
 0x61d   : > { %v1480_v32 = vsel %vm1477_vm11, %v9988_v62, %v9972_v50  ;;  %v1864_v49 = vadd.f32 %v1842_v55, %v1773_v42  ;;  %v1965_v47 = vadd.f32 %v1942_v22, %v1874_v3  ;;  %v1483_v40 = vsel %vm1477_vm11, %v9990_v61, %v9989_v0  ;;  %v9994_v42 = vld [vmem:[#allocation204_spill] sm:$0xff]  ;;  %v9995_v3 = vld [vmem:[#allocation209_spill] sm:$0xff] }
 0x61e   : > { %2605 = vrot.lane.b32.xlu2 %v7552_v16, %s5609_s22  ;;  %v1484_v34 = vsel %vm1477_vm11, %v9989_v0, %v9926_v30  ;;  %v2024_v18 = vsel %vm2023_vm6, %v9992_v28, %v9991_v45  ;;  %v2057_v27 = vadd.f32 %v7647_v1, %v1966_v6  ;;  %v2293_v50 = vpop.permute.xlu1 %2292  ;;  %v1300_v30 = vsel %vm1295_vm9, %v9914_v48, %v9993_v13  ;;  %v9998_v6 = vld [vmem:[#allocation140_spill] sm:$0xff] }
 0x61f   : > { %v1955_v26 = vadd.f32 %v1933_v46, %v1864_v49  ;;  %v2056_v22 = vadd.f32 %v2033_v35, %v1965_v47  ;;  %v7892_v16 = vsel %vm2316_vm13, %v7615_v38, %v2293_v50  ;;  %v7896_v7 = vsel %vm2316_vm13, %v2293_v50, %v7763_v53  ;;  %v9997_v53 = vld [vmem:[#allocation141_spill] sm:$0xff]  ;;  %v10005_v50 = vld [vmem:[#allocation135_spill] sm:$0xff] }
 0x620   : > { %v2113_v55 = vpop.permute.xlu2 %2112  ;;  %v2115_v1 = vsel %vm2114_vm7, %v9995_v3, %v9994_v42  ;;  %v1486_v38 = vsel %vm1477_vm11, %v9925_v52, %v9957_v5  ;;  %v1572_v35 = vsel %vm1568_vm12, %v9998_v6, %v9997_v53  ;;  %v1501_v48 = vadd.f32 %v1479_v21, %v7745_v23  ;;  %v9999_v5 = vld [vmem:[#allocation145_spill] sm:$0xff] }
 0x621   : > { %v2124_v17 = vsel %vm2114_vm7, %v7528_v25, %v2113_v55  ;;  %v7906_v46 = vadd.f32 %v2113_v55, %v2057_v27  ;;  %v2046_v62 = vadd.f32 %v2024_v18, %v1955_v26  ;;  %v1502_v47 = vadd.f32 %v1480_v32, %v7749_v33  ;;  %v10000_v18 = vld [vmem:[#allocation153_spill] sm:$0xff]  ;;  %v10001_v27 = vld [vmem:[#allocation152_spill] sm:$0xff] }
 0x622   : > { %v7914_v49 = vadd.f32 %v2124_v17, %v2056_v22  ;;  %v1506_v0 = vadd.f32 %v1483_v40, %v7781_v57  ;;  %v2216_v61 = vsel %vm2215_vm1, %v7425_v63, %v7324_v54  ;;  %v1507_v52 = vadd.f32 %v1484_v34, %v1416_v2  ;;  %v10002_v2 = vld [vmem:[#allocation165_spill] sm:$0xff]  ;;  %v10003_v40 = vld [vmem:[#allocation164_spill] sm:$0xff] }
 0x623   : > { %9996 = vst [vmem:[#allocation10_spill] sm:$0xff] %v7906_v46  ;;  %2601 = vrot.lane.b32.xlu0 %v7582_v59, %s5609_s22  ;;  %v1570_v28 = vsel %vm1568_vm12, %v9964_v51, %v9999_v5  ;;  %v1663_v23 = vsel %vm1659_vm14, %v10001_v27, %v10000_v18  ;;  %v2137_v21 = vadd.f32 %v2115_v1, %v2046_v62  ;;  %v7937_v59 = vpop.permute.xlu0 %2403  ;;  %vm2417_vm9 = vcmask 113664   ;;  %v10007_v55 = vld [vmem:[#allocation176_spill] sm:$0xff]  ;;  %v10008_v1 = vld [vmem:[#allocation63_spill] sm:$0xff] }
 0x624   : > { %v7930_v33 = vadd.f32 %v1300_v30, %v1231_v31  ;;  %v1509_v57 = vadd.f32 %v1486_v38, %v1418_v14  ;;  %v1594_v32 = vadd.f32 %v1572_v35, %v1503_v24  ;;  %v1571_v63 = vsel %vm1568_vm12, %v9999_v5, %v9998_v6  ;;  %2314 = vrot.lane.b32.xlu1 %v7556_v11, %s5606_s15  ;;  %v10004_v14 = vld [vmem:[#allocation148_spill] sm:$0xff]  ;;  %v10011_v5 = vld [vmem:[#allocation189_spill] sm:$0xff]  ;;  %s10089_s15 = smov 127  }
 0x625   : > { %v1577_v51 = vsel %vm1568_vm12, %v9930_v37, %v9961_v19  ;;  %v1754_v31 = vsel %vm1750_vm15, %v10003_v40, %v10002_v2  ;;  %v2240_v34 = vadd.f32 %v2216_v61, %v2137_v21  ;;  %v1592_v24 = vadd.f32 %v1570_v28, %v1501_v48  ;;  %v10006_v19 = vld [vmem:[#allocation177_spill] sm:$0xff]  ;;  %v10012_v28 = vld [vmem:[#allocation188_spill] sm:$0xff] }
 0x626   : > { %2611 = vrot.lane.b32.xlu2 %v7572_v36, %s5609_s22  ;;  %v1574_v11 = vsel %vm1568_vm12, %v10005_v50, %v10004_v14  ;;  %v1685_v26 = vadd.f32 %v1663_v23, %v1594_v32  ;;  %v1668_v22 = vsel %vm1659_vm14, %v9936_v44, %v9967_v4  ;;  %v2305_v37 = vpop.permute.xlu1 %2304  ;;  %v1845_v30 = vsel %vm1841_vm3, %v10007_v55, %v10006_v19  ;;  %v10009_v4 = vld [vmem:[#allocation143_spill] sm:$0xff]  ;;  %v10013_v21 = vld [vmem:[#allocation157_spill] sm:$0xff]  ;;  %v10017_v50 = vld [vmem:[#allocation174_spill] sm:$0xff] }
 0x627   : > { %v2341_v3 = vadd.f32 %v7708_v9, %v2240_v34  ;;  %v7959_v36 = vsel %vm2316_vm13, %v10008_v1, %v2305_v37  ;;  %v7963_v17 = vsel %vm2316_vm13, %v2305_v37, %v7831_v43  ;;  %v1593_v6 = vadd.f32 %v1571_v63, %v1502_v47  ;;  %v10010_v9 = vld [vmem:[#allocation162_spill] sm:$0xff]  ;;  %v10016_v34 = vld [vmem:[#allocation147_spill] sm:$0xff] }
 0x628   : > { %v2390_v38 = vpop.permute.xlu2 %2389  ;;  %v1600_v35 = vadd.f32 %v1577_v51, %v1509_v57  ;;  %v1776_v62 = vadd.f32 %v1754_v31, %v1685_v26  ;;  %v1575_v48 = vsel %vm1568_vm12, %v10004_v14, %v10009_v4  ;;  %v1759_v61 = vsel %vm1750_vm15, %v10010_v9, %v9976_v12  ;;  %v10014_v51 = vld [vmem:[#allocation83_spill] sm:$0xff]  ;;  %v10015_v31 = vld [vmem:[#allocation160_spill] sm:$0xff]  ;;  %v10024_v4 = vld [vmem:[#allocation186_spill] sm:$0xff] }
 0x629   : > { %v2418_v44 = vsel %vm2417_vm9, %v2390_v38, %v7870_v8  ;;  %v1936_v43 = vsel %vm1932_vm5, %v10012_v28, %v10011_v5  ;;  %v1597_v47 = vadd.f32 %v1574_v11, %v1506_v0  ;;  %v1661_v57 = vsel %vm1659_vm14, %v9973_v58, %v10013_v21  ;;  %v10018_v11 = vld [vmem:[#allocation201_spill] sm:$0xff]  ;;  %v10019_v26 = vld [vmem:[#allocation200_spill] sm:$0xff]  ;;  %v10020_v37 = vld [vmem:[#allocation151_spill] sm:$0xff] }
 0x62a   : > { %v7976_v23 = vadd.f32 %v2418_v44, %v2341_v3  ;;  %v1691_v32 = vadd.f32 %v1668_v22, %v1600_v35  ;;  %v1867_v63 = vadd.f32 %v1845_v30, %v1776_v62  ;;  %v1662_v12 = vsel %vm1659_vm14, %v10013_v21, %v10001_v27  ;;  %v10021_v30 = vld [vmem:[#allocation117_spill] sm:$0xff]  ;;  %v10022_v38 = vld [vmem:[#allocation62_spill] sm:$0xff]  ;;  %v10023_v44 = vld [vmem:[#allocation155_spill] sm:$0xff] }
 0x62b   : > { %2617 = vrot.lane.b32.xlu0 %v10014_v51, %s5609_s22  ;;  %v1665_v14 = vsel %vm1659_vm14, %v10016_v34, %v10015_v31  ;;  %v1850_v0 = vsel %vm1841_vm3, %v10017_v50, %v9981_v60  ;;  %v2027_v58 = vsel %vm2023_vm6, %v10019_v26, %v10018_v11  ;;  %v1598_v22 = vadd.f32 %v1575_v48, %v1507_v52  ;;  %v8002_v35 = vpop.permute.xlu0 %2409  ;;  %v10025_v48 = vld [vmem:[#allocation25_spill] sm:$0xff]  ;;  %v10026_v9 = vld [vmem:[#allocation44_spill] sm:$0xff]  ;;  %v10029_v34 = vld [vmem:[#allocation198_spill] sm:$0xff] }
 0x62c   : > { %v7998_v3 = vsel %vm1386_vm10, %v10021_v30, %v10020_v37  ;;  %v1782_v1 = vadd.f32 %v1759_v61, %v1691_v32  ;;  %v1958_v27 = vadd.f32 %v1936_v43, %v1867_v63  ;;  %2599 = vrot.lane.b32.xlu1 %v10022_v38, %s5609_s22  ;;  %v1683_v62 = vadd.f32 %v1661_v57, %v1592_v24  ;;  %v10027_v61 = vld [vmem:[#allocation37_spill] sm:$0xff]  ;;  %v10030_v30 = vld [vmem:[#allocation59_spill] sm:$0xff]  ;;  %v10031_v38 = vld [vmem:[#allocation34_spill] sm:$0xff] }
 0x62d   : > { %v1666_v60 = vsel %vm1659_vm14, %v10015_v31, %v10023_v44  ;;  %v1941_v52 = vsel %vm1932_vm5, %v10024_v4, %v9984_v41  ;;  %v2118_v21 = vsel %vm2114_vm7, %v10026_v9, %v10025_v48  ;;  %v1684_v43 = vadd.f32 %v1662_v12, %v1593_v6  ;;  %v10028_v57 = vld [vmem:[#allocation169_spill] sm:$0xff] }
 0x62e   : > { %2399 = vrot.lane.b32.xlu2 %v10027_v61, %s5607_s12  ;;  %v1688_v32 = vadd.f32 %v1665_v14, %v1597_v47  ;;  %v1873_v63 = vadd.f32 %v1850_v0, %v1782_v1  ;;  %v2049_v51 = vadd.f32 %v2027_v58, %v1958_v27  ;;  %v8015_v24 = vpop.permute.xlu1 %2100  ;;  %v1752_v31 = vsel %vm1750_vm15, %v9978_v15, %v10028_v57  ;;  %v10032_v14 = vld [vmem:[#allocation172_spill] sm:$0xff]  ;;  %v10033_v0 = vld [vmem:[#allocation159_spill] sm:$0xff]  ;;  %v10035_v44 = vld [vmem:[#allocation129_spill] sm:$0xff] }
 0x62f   : > { %v1753_v41 = vsel %vm1750_vm15, %v10028_v57, %v10003_v40  ;;  %v2032_v50 = vsel %vm2023_vm6, %v10029_v34, %v9987_v39  ;;  %v2219_v6 = vsel %vm2215_vm1, %v10031_v38, %v10030_v30  ;;  %v1689_v12 = vadd.f32 %v1666_v60, %v1598_v22  ;;  %v10034_v27 = vld [vmem:[#allocation163_spill] sm:$0xff]  ;;  %v10036_v4 = vld [vmem:[#allocation181_spill] sm:$0xff] }
 0x630   : > { %v8029_v47 = vpop.permute.xlu2 %2395  ;;  %v1756_v58 = vsel %vm1750_vm15, %v10033_v0, %v10032_v14  ;;  %v1964_v15 = vadd.f32 %v1941_v52, %v1873_v63  ;;  %v2140_v1 = vadd.f32 %v2118_v21, %v2049_v51  ;;  %v1482_v40 = vsel %vm1477_vm11, %v10035_v44, %v10034_v27  ;;  %v10037_v22 = vld [vmem:[#allocation11_spill] sm:$0xff]  ;;  %v2657_v52 = vld [vmem:[%s9315_s2 + $0x8] sm:$0xff] }
 0x631   : > { %v1843_v39 = vsel %vm1841_vm3, %v9982_v29, %v10036_v4  ;;  %v1844_v61 = vsel %vm1841_vm3, %v10036_v4, %v10007_v55  ;;  %v2123_v60 = vsel %vm2114_vm7, %v10037_v22, %v7528_v25  ;;  %v1774_v21 = vadd.f32 %v1752_v31, %v1683_v62  ;;  %v10038_v34 = vld [vmem:[#allocation167_spill] sm:$0xff]  ;;  %v10039_v44 = vld [vmem:[#allocation193_spill] sm:$0xff] }
 0x632   : > { %v1775_v63 = vadd.f32 %v1753_v41, %v1684_v43  ;;  %v2055_v51 = vadd.f32 %v2032_v50, %v1964_v15  ;;  %v2243_v57 = vadd.f32 %v2219_v6, %v2140_v1  ;;  %v1757_v29 = vsel %vm1750_vm15, %v10032_v14, %v10038_v34  ;;  %v10040_v62 = vld [vmem:[#allocation67_spill] sm:$0xff]  ;;  %v10041_v41 = vld [vmem:[#allocation184_spill] sm:$0xff]  ;;  %v10043_v6 = vld [vmem:[#allocation205_spill] sm:$0xff] }
 0x633   : > { %v1779_v0 = vadd.f32 %v1756_v58, %v1688_v32  ;;  %v1934_v55 = vsel %vm1932_vm5, %v9985_v10, %v10039_v44  ;;  %v1935_v25 = vsel %vm1932_vm5, %v10039_v44, %v10012_v28  ;;  %v1865_v4 = vadd.f32 %v1843_v39, %v1774_v21  ;;  %v8059_v31 = vpop.permute.xlu0 %2397  ;;  %v10042_v50 = vld [vmem:[#allocation171_spill] sm:$0xff] }
 0x634   : > { %v1866_v22 = vadd.f32 %v1844_v61, %v1775_v63  ;;  %v2146_v46 = vadd.f32 %v2123_v60, %v2055_v51  ;;  %v2344_v43 = vadd.f32 %v10040_v62, %v2243_v57  ;;  %2665 = vperm.xlu1 %5180, %v2657_v52   ;;  %v1847_v32 = vsel %vm1841_vm3, %v10042_v50, %v10041_v41  ;;  %v10044_v14 = vld [vmem:[#allocation39_spill] sm:$0xff]  ;;  %v10047_v51 = vld [vmem:[#allocation66_spill] sm:$0xff] }
 0x635   : > { %v2025_v10 = vsel %vm2023_vm6, %v9991_v45, %v10043_v6  ;;  %v2026_v28 = vsel %vm2023_vm6, %v10043_v6, %v10019_v26  ;;  %v2421_v58 = vsel %vm2417_vm9, %v8029_v47, %v8059_v31  ;;  %v1956_v15 = vadd.f32 %v1934_v55, %v1865_v4  ;;  %v10045_v45 = vld [vmem:[#allocation179_spill] sm:$0xff] }
 0x636   : > { %2613 = vrot.lane.b32.xlu2 %v10044_v14, %s5609_s22  ;;  %v1957_v1 = vadd.f32 %v1935_v25, %v1866_v22  ;;  %v2249_v39 = vadd.f32 %v7829_v56, %v2146_v46  ;;  %v8076_v61 = vpop.permute.xlu1 %2310  ;;  %v8078_v60 = vadd.f32 %v2421_v58, %v2344_v43  ;;  %v1848_v52 = vsel %vm1841_vm3, %v10041_v41, %v10045_v45  ;;  %v10046_v26 = vld [vmem:[#allocation55_spill] sm:$0xff]  ;;  %v10048_v25 = vld [vmem:[#allocation196_spill] sm:$0xff]  ;;  %v10050_v22 = vld [vmem:[#allocation41_spill] sm:$0xff] }
 0x637   : > { %v2116_v21 = vsel %vm2114_vm7, %v9994_v42, %v10046_v26  ;;  %v2117_v63 = vsel %vm2114_vm7, %v10046_v26, %v10026_v9  ;;  %v2326_v56 = vsel %vm2316_vm13, %v10047_v51, %v8076_v61  ;;  %v2047_v57 = vadd.f32 %v2025_v10, %v1956_v15  ;;  %v10049_v42 = vld [vmem:[#allocation183_spill] sm:$0xff]  ;;  %v10052_v15 = vld [vmem:[#allocation208_spill] sm:$0xff] }
 0x638   : > { %v8092_v46 = vpop.permute.xlu2 %2407  ;;  %v2048_v34 = vadd.f32 %v2026_v28, %v1957_v1  ;;  %v8094_v44 = vadd.f32 %v2326_v56, %v2249_v39  ;;  %v1938_v4 = vsel %vm1932_vm5, %v10049_v42, %v10048_v25  ;;  %v2217_v9 = vsel %vm2215_vm1, %v7324_v54, %v10050_v22  ;;  %v10051_v14 = vld [vmem:[#allocation191_spill] sm:$0xff] }
 0x639   : > { %v2426_v55 = vsel %vm2417_vm9, %v8092_v46, %v8002_v35  ;;  %v2218_v62 = vsel %vm2215_vm1, %v10050_v22, %v10031_v38  ;;  %v1780_v41 = vadd.f32 %v1757_v29, %v1689_v12  ;;  %v1870_v50 = vadd.f32 %v1847_v32, %v1779_v0  ;;  %v10053_v54 = vld [vmem:[#allocation195_spill] sm:$0xff]  ;;  %v10055_v38 = vld [vmem:[#allocation78_spill] sm:$0xff]  ;;  %v10056_v0 = vld [vmem:[#allocation36_spill] sm:$0xff] }
 0x63a   : > { %v8109_v43 = vadd.f32 %v2426_v55, %v7846_v20  ;;  %v2138_v6 = vadd.f32 %v2116_v21, %v2047_v57  ;;  %v2139_v10 = vadd.f32 %v2117_v63, %v2048_v34  ;;  %v1413_v28 = vadd.f32 %v7998_v3, %v7930_v33  ;;  %v10054_v39 = vld [vmem:[#allocation35_spill] sm:$0xff]  ;;  %v10057_v33 = vld [vmem:[#allocation60_spill] sm:$0xff]  ;;  %v10058_v3 = vld [vmem:[#allocation33_spill] sm:$0xff] }
 0x63b   : > { %v1939_v58 = vsel %vm1932_vm5, %v10048_v25, %v10051_v14  ;;  %v2029_v1 = vsel %vm2023_vm6, %v10053_v54, %v10052_v15  ;;  %v2367_v45 = vmul.f32 %v10055_v38, %v10054_v39  ;;  %v1871_v20 = vadd.f32 %v1848_v52, %v1780_v41  ;;  %v8123_v32 = vpop.permute.xlu0 %2492  ;;  %v10059_v51 = vld [vmem:[#allocation175_spill] sm:$0xff]  ;;  %v10061_v22 = vld [vmem:[#allocation28_spill] sm:$0xff]  ;;  %v10066_v54 = vld [vmem:[#allocation54_spill] sm:$0xff] }
 0x63c   : > { %v1961_v26 = vadd.f32 %v1938_v4, %v1870_v50  ;;  %v2241_v12 = vadd.f32 %v2217_v9, %v2138_v6  ;;  %v2242_v29 = vadd.f32 %v2218_v62, %v2139_v10  ;;  %2415 = vrot.lane.b32.xlu1 %v10056_v0, %s5607_s12  ;;  %v595_v21 = vadd.f32 %v10058_v3, %v10057_v33  ;;  %v10060_v57 = vld [vmem:[#allocation203_spill] sm:$0xff]  ;;  %v10063_v62 = vld [vmem:[#allocation29_spill] sm:$0xff] }
 0x63d   : > { %v1504_v63 = vadd.f32 %v1482_v40, %v1413_v28  ;;  %v1573_v56 = vsel %vm1568_vm12, %v9997_v53, %v10059_v51  ;;  %v2030_v52 = vsel %vm2023_vm6, %v10052_v15, %v10060_v57  ;;  %v1962_v34 = vadd.f32 %v1939_v58, %v1871_v20  ;;  %v10062_v9 = vld [vmem:[#allocation207_spill] sm:$0xff]  ;;  %v10064_v28 = vld [vmem:[#allocation12_spill] sm:$0xff] }
 0x63e   : > { %2401 = vrot.lane.b32.xlu2 %v2367_v45, %s5607_s12  ;;  %v2052_v55 = vadd.f32 %v2029_v1, %v1961_v26  ;;  %v2342_v25 = vadd.f32 %v7892_v16, %v2241_v12  ;;  %v2343_v42 = vadd.f32 %v7896_v7, %v2242_v29  ;;  %v2394_v4 = vpop.permute.xlu1 %2393  ;;  %v2120_v40 = vsel %vm2114_vm7, %v10062_v9, %v10061_v22  ;;  %v10065_v58 = vld [vmem:[#allocation187_spill] sm:$0xff]  ;;  %v10069_v29 = vld [vmem:[#allocation82_spill] sm:$0xff]  ;;  %s5615_s12 = smov 92  }
 0x63f   : > { %v2121_v53 = vsel %vm2114_vm7, %v10061_v22, %v10063_v62  ;;  %v2419_v41 = vsel %vm2417_vm9, %v7870_v8, %v2394_v4  ;;  %v2420_v50 = vsel %vm2417_vm9, %v2394_v4, %v8029_v47  ;;  %v2053_v16 = vadd.f32 %v2030_v52, %v1962_v34  ;;  %v10067_v8 = vld [vmem:[#allocation31_spill] sm:$0xff]  ;;  %v10068_v47 = vld [vmem:[#allocation38_spill] sm:$0xff] }
 0x640   : > { %v8146_v6 = vpop.permute.xlu2 %2211  ;;  %v8148_v10 = vadd.f32 %v2419_v41, %v2342_v25  ;;  %v8150_v7 = vadd.f32 %v2420_v50, %v2343_v42  ;;  %v1664_v15 = vsel %vm1659_vm14, %v10000_v18, %v10065_v58  ;;  %v2222_v1 = vsel %vm2215_vm1, %v10067_v8, %v10066_v54  ;;  %v10070_v33 = vld [vmem:[#allocation199_spill] sm:$0xff] }
 0x641   : > { %v2226_v14 = vsel %vm2215_vm1, %v10064_v28, %v8146_v6  ;;  %v2223_v38 = vsel %vm2215_vm1, %v10066_v54, %v10068_v47  ;;  %v1595_v20 = vadd.f32 %v1573_v56, %v1504_v63  ;;  %v2143_v26 = vadd.f32 %v2120_v40, %v2052_v55  ;;  %v10071_v3 = vld [vmem:[#allocation7_spill] sm:$0xff]  ;;  %v10072_v63 = vld [vmem:[#allocation42_spill] sm:$0xff]  ;;  %v10074_v40 = vld [vmem:[#allocation32_spill] sm:$0xff] }
 0x642   : > { %v8165_v45 = vadd.f32 %v2226_v14, %v7914_v49  ;;  %v2144_v12 = vadd.f32 %v2121_v53, %v2053_v16  ;;  %v2468_v0 = vmul.f32 %v10069_v29, %v10054_v39  ;;  %v1755_v18 = vsel %vm1750_vm15, %v10002_v2, %v10070_v33  ;;  %v10073_v55 = vld [vmem:[#allocation43_spill] sm:$0xff]  ;;  %v10076_v14 = vld [vmem:[#allocation48_spill] sm:$0xff] }
 0x643   : > { %v2467_v57 = vmul.f32 %v10069_v29, %v10071_v3  ;;  %v1686_v52 = vadd.f32 %v1664_v15, %v1595_v20  ;;  %v2246_v34 = vadd.f32 %v2222_v1, %v2143_v26  ;;  %v8175_v49 = vpop.permute.xlu0 %2504  ;;  %v1846_v56 = vsel %vm1841_vm3, %v10006_v19, %v10072_v63  ;;  %v10078_v1 = vld [vmem:[#allocation88_spill] sm:$0xff] }
 0x644   : > { %v2247_v25 = vadd.f32 %v2223_v38, %v2144_v12  ;;  %2502 = vrot.lane.b32.xlu1 %v2468_v0, %s5608_s16  ;;  %vm2518_vm10 = vcmask 105472   ;;  %v686_v42 = vadd.f32 %v10073_v55, %v595_v21  ;;  %v1937_v62 = vsel %vm1932_vm5, %v10011_v5, %v10074_v40  ;;  %v10083_v55 = vld [vmem:[#allocation68_spill] sm:$0xff] }
 0x645   : > { %v1777_v2 = vadd.f32 %v1755_v18, %v1686_v52  ;;  %v2347_v4 = vadd.f32 %v7959_v36, %v2246_v34  ;;  %v2119_v8 = vsel %vm2114_vm7, %v10025_v48, %v8015_v24  ;;  %v2475_v47 = vmul.f32 %v10078_v1, %v10054_v39 }
 0x646   : > { %2500 = vrot.lane.b32.xlu2 %v2467_v57, %s5608_s16  ;;  %v2348_v22 = vadd.f32 %v7963_v17, %v2247_v25  ;;  %v2406_v9 = vpop.permute.xlu1 %2405  ;;  %v10075_v17 = vld [vmem:[#allocation65_spill] sm:$0xff]  ;;  %v10081_v57 = vld [vmem:[#allocation84_spill] sm:$0xff]  ;;  %vm2619_vm11 = vcmask 97280   ;;  %vm3586_vm12 = vcmask 941056   ;;  %vm3572_vm14 = vcmask 957440  }
 0x647   : > { %v2424_v53 = vsel %vm2417_vm9, %v7937_v59, %v2406_v9  ;;  %v2425_v19 = vsel %vm2417_vm9, %v2406_v9, %v8092_v46  ;;  %v1868_v50 = vadd.f32 %v1846_v56, %v1777_v2  ;;  %v2028_v28 = vsel %vm2023_vm6, %v10018_v11, %v10075_v17  ;;  %v10077_v46 = vld [vmem:[#allocation79_spill] sm:$0xff]  ;;  %v10082_v25 = vld [vmem:[#allocation64_spill] sm:$0xff] }
 0x648   : > { %v2491_v41 = vpop.permute.xlu2 %2490  ;;  %v2448_v16 = vadd.f32 %v2424_v53, %v2347_v4  ;;  %v8191_v21 = vadd.f32 %v2425_v19, %v2348_v22  ;;  %v777_v59 = vadd.f32 %v10076_v14, %v686_v42  ;;  %v2575_v54 = vmul.f32 %v10077_v46, %v10071_v3  ;;  %v10080_v3 = vld [vmem:[#allocation61_spill] sm:$0xff]  ;;  %v10084_v9 = vld [vmem:[#allocation115_spill] sm:$0xff] }
 0x649   : > { %v2519_v36 = vsel %vm2518_vm10, %v2491_v41, %v8123_v32  ;;  %v1959_v15 = vadd.f32 %v1937_v62, %v1868_v50  ;;  %v2569_v52 = vmul.f32 %v10081_v57, %v10054_v39  ;;  %v10085_v41 = vld [vmem:[#allocation127_spill] sm:$0xff]  ;;  %vm10092_vm15 = vcmask 1031168  }
 0x64a   : > { %v8199_v5 = vadd.f32 %v2519_v36, %v7976_v23  ;;  %v10079_v23 = vld [vmem:[#allocation53_spill] sm:$0xff]  ;;  %vm10093_vm3 = vmmov %vm10092_vm15  ;;  %vm3600_vm5 = vcmask 924672   ;;  %vm3971_vm6 = vcmask 654336   ;;  %vm4058_vm7 = vcmask 261120  }
 0x64b   : > { %v2050_v38 = vadd.f32 %v2028_v28, %v1959_v15  ;;  %v2511_v11 = vpop.permute.xlu0 %2510  ;;  %v868_v20 = vadd.f32 %v10079_v23, %v777_v59 }
 0x64c   : > { %2615 = vrot.lane.b32.xlu1 %v2575_v54, %s5609_s22 }
 0x64d   : > { %v2141_v26 = vadd.f32 %v2119_v8, %v2050_v38  ;;  %v959_v48 = vadd.f32 %v10080_v3, %v868_v20 }
 0x64e   : > { %2516 = vrot.lane.b32.xlu2 %v2475_v47, %s5608_s16  ;;  %v2198_v12 = vpop.permute.xlu1 %2197  ;;  %s5610_s16 = smov 115  }
 0x64f   : > { %v2220_v29 = vsel %vm2215_vm1, %v10030_v30, %v2198_v12  ;;  %v1050_v42 = vadd.f32 %v10083_v55, %v959_v48 }
 0x650   : > { %v2497_v0 = vpop.permute.xlu2 %2496  ;;  %v2244_v18 = vadd.f32 %v2220_v29, %v2141_v26 }
 0x651   : > { %v1141_v62 = vadd.f32 %v10084_v9, %v1050_v42 }
 0x653   : > { %v1232_v50 = vadd.f32 %v10085_v41, %v1141_v62 }
 0x655   : > { %v2299_v34 = vpop.permute.xlu0 %2298  ;;  %v1323_v36 = vadd.f32 %v9993_v13, %v1232_v50 }
 0x656   : > { %2603 = vrot.lane.b32.xlu2 %v2569_v52, %s5609_s22  ;;  %v2321_v56 = vsel %vm2316_vm13, %v10082_v25, %v2299_v34  ;;  %v2412_v2 = vpop.permute.xlu1 %2411  ;;  %s10087_s22 = smov 125  }
 0x657   : > { %v8221_v4 = vadd.f32 %v2321_v56, %v2244_v18  ;;  %v2427_v30 = vsel %vm2417_vm9, %v8002_v35, %v2412_v2  ;;  %v1414_v35 = vadd.f32 %v10020_v37, %v1323_v36  ;;  %v10086_v37 = vld [vmem:[#allocation10_spill] sm:$0xff] }
 0x658   : > { %v8225_v22 = vpop.permute.xlu2 %2508  ;;  %v2451_v39 = vadd.f32 %v2427_v30, %v8094_v44 }
 0x659   : > { %v2527_v53 = vsel %vm2518_vm10, %v8225_v22, %v2511_v11 }
 0x65a   : > { %v8232_v19 = vadd.f32 %v2527_v53, %v8109_v43  ;;  %v1505_v43 = vadd.f32 %v10034_v27, %v1414_v35 }
 0x65c   : > { %v1596_v38 = vadd.f32 %v10059_v51, %v1505_v43 }
 0x65d   : > { %v2513_v28 = vpop.permute.xlu0 %2512 }
 0x65e   : > { %v2528_v14 = vsel %vm2518_vm10, %v2511_v11, %v2513_v28  ;;  %v2495_v59 = vpop.permute.xlu1 %2494  ;;  %v1687_v11 = vadd.f32 %v10065_v58, %v1596_v38 }
 0x65f   : > { %v8238_v15 = vadd.f32 %v2528_v14, %v2451_v39  ;;  %v2520_v44 = vsel %vm2518_vm10, %v8123_v32, %v2495_v59  ;;  %v2521_v46 = vsel %vm2518_vm10, %v2495_v59, %v2497_v0 }
 0x660   : > { %v2214_v54 = vpop.permute.xlu2 %2213  ;;  %v2544_v8 = vadd.f32 %v2520_v44, %v8148_v10  ;;  %v8246_v13 = vadd.f32 %v2521_v46, %v8150_v7  ;;  %v1778_v23 = vadd.f32 %v10070_v33, %v1687_v11 }
 0x661   : > { %v2227_v1 = vsel %vm2215_vm1, %v8146_v6, %v2214_v54 }
 0x662   : > { %v2251_v47 = vadd.f32 %v2227_v1, %v10086_v37  ;;  %v1869_v7 = vadd.f32 %v10072_v63, %v1778_v23 }
 0x664   : > { %v1960_v18 = vadd.f32 %v10074_v40, %v1869_v7 }
 0x665   : > { %v2596_v32 = vpop.permute.xlu0 %2595 }
 0x666   : > { %v2507_v20 = vpop.permute.xlu1 %2506  ;;  %v2051_v51 = vadd.f32 %v10075_v17, %v1960_v18 }
 0x667   : > { %v2525_v27 = vsel %vm2518_vm10, %v8175_v49, %v2507_v20 }
 0x668   : > { %v2499_v10 = vpop.permute.xlu2 %2498  ;;  %v2549_v26 = vadd.f32 %v2525_v27, %v2448_v16  ;;  %v2142_v3 = vadd.f32 %v8015_v24, %v2051_v51 }
 0x669   : > { %v2522_v29 = vsel %vm2518_vm10, %v2497_v0, %v2499_v10 }
 0x66a   : > { %v2546_v6 = vadd.f32 %v2522_v29, %v8078_v60 }
 0x66d   : > { %v2608_v58 = vpop.permute.xlu0 %2607 }
 0x66e   : > { %v2200_v33 = vpop.permute.xlu1 %2199 }
 0x66f   : > { %v2221_v48 = vsel %vm2215_vm1, %v2198_v12, %v2200_v33 }
 0x670   : > { %v2594_v57 = vpop.permute.xlu2 %2593  ;;  %v2245_v49 = vadd.f32 %v2221_v48, %v2142_v3 }
 0x675   : > { %v2301_v52 = vpop.permute.xlu0 %2300 }
 0x676   : > { %v2322_v63 = vsel %vm2316_vm13, %v2299_v34, %v2301_v52  ;;  %v2313_v16 = vpop.permute.xlu1 %2312  ;;  %v2621_v34 = vsel %vm2619_vm11, %v2594_v57, %v2596_v32 }
 0x677   : > { %v8264_v25 = vadd.f32 %v2322_v63, %v2245_v49  ;;  %v2327_v60 = vsel %vm2316_vm13, %v8076_v61, %v2313_v16  ;;  %v2645_v30 = vadd.f32 %v2621_v34, %v2544_v8 }
 0x678   : > { %v2606_v40 = vpop.permute.xlu2 %2605  ;;  %v2351_v17 = vadd.f32 %v2327_v60, %v8165_v45 }
 0x679   : > { %v2626_v23 = vsel %vm2619_vm11, %v2606_v40, %v2608_v58 }
 0x67a   : > { %v2650_v18 = vadd.f32 %v2626_v23, %v2549_v26 }
 0x67d   : > { %v8269_v0 = vpop.permute.xlu0 %2413 }
 0x67e   : > { %v2428_v24 = vsel %vm2417_vm9, %v2412_v2, %v8269_v0  ;;  %v2592_v12 = vpop.permute.xlu1 %2591 }
 0x67f   : > { %v2452_v56 = vadd.f32 %v2428_v24, %v2351_v17  ;;  %v2620_v42 = vsel %vm2619_vm11, %v2592_v12, %v2594_v57 }
 0x680   : > { %v2612_v55 = vpop.permute.xlu2 %2611  ;;  %v2644_v9 = vadd.f32 %v2620_v42, %v8199_v5 }
 0x685   : > { %v8276_v61 = vpop.permute.xlu0 %2660 }
 0x686   : > { %v8279_v45 = vadd.f32 %v8276_v61, %v2644_v9  ;;  %v8282_v62 = vadd.f32 %v8276_v61, %v2645_v30  ;;  %v2598_v39 = vpop.permute.xlu1 %2597 }
 0x687   : > { %v2622_v43 = vsel %vm2619_vm11, %v2596_v32, %v2598_v39 }
 0x688   : > { %v2400_v2 = vpop.permute.xlu2 %2399  ;;  %v5181_v53 = vpack.i.bf16 %v8282_v62, %v8279_v45 }
 0x689   : > { %v2422_v54 = vsel %vm2417_vm9, %v8059_v31, %v2400_v2 }
 0x68a   : > { %5182 = vrot.lane.b32.xlu1 %v5181_v53, %s9533_s25  ;;  %v2446_v1 = vadd.f32 %v2422_v54, %v8221_v4 }
 0x68d   : > { %v2515_v41 = vpop.permute.xlu0 %2514 }
 0x68e   : > { %v2529_v50 = vsel %vm2518_vm10, %v2513_v28, %v2515_v41  ;;  %v2610_v36 = vpop.permute.xlu1 %2609  ;;  %v2526_v28 = vsel %vm2518_vm10, %v2507_v20, %v8225_v22 }
 0x68f   : > { %v2553_v5 = vadd.f32 %v2529_v50, %v2452_v56  ;;  %v2627_v31 = vsel %vm2619_vm11, %v2608_v58, %v2610_v36  ;;  %v2628_v32 = vsel %vm2619_vm11, %v2610_v36, %v2612_v55  ;;  %v2550_v29 = vadd.f32 %v2526_v28, %v8191_v21 }
 0x690   : > { %v2614_v14 = vpop.permute.xlu2 %2613  ;;  %v2652_v22 = vadd.f32 %v2628_v32, %v8232_v19 }
 0x691   : > { %v2629_v7 = vsel %vm2619_vm11, %v2612_v55, %v2614_v14  ;;  %v2651_v51 = vadd.f32 %v2627_v31, %v2550_v29 }
 0x692   : > { %v2653_v20 = vadd.f32 %v2629_v7, %v8238_v15 }
 0x695   : > { %v2602_v49 = vpop.permute.xlu0 %2601 }
 0x696   : > { %v2315_v35 = vpop.permute.xlu1 %2314 }
 0x697   : > { %v2328_v59 = vsel %vm2316_vm13, %v2313_v16, %v2315_v35  ;;  %vm3579_vm13 = vcmask 949248  }
 0x698   : > { %v2402_v44 = vpop.permute.xlu2 %2401  ;;  %v2352_v46 = vadd.f32 %v2328_v59, %v2251_v47  ;;  %v2646_v47 = vadd.f32 %v2622_v43, %v8246_v13 }
 0x699   : > { %v2423_v52 = vsel %vm2417_vm9, %v2400_v2, %v2402_v44 }
 0x69a   : > { %v8309_v3 = vadd.f32 %v8276_v61, %v2646_v47  ;;  %v2447_v40 = vadd.f32 %v2423_v52, %v8264_v25 }
 0x69d   : > { %v2618_v30 = vpop.permute.xlu0 %2617 }
 0x69e   : > { %v2600_v8 = vpop.permute.xlu1 %2599 }
 0x69f   : > { %v2623_v37 = vsel %vm2619_vm11, %v2598_v39, %v2600_v8  ;;  %v2624_v56 = vsel %vm2619_vm11, %v2600_v8, %v2602_v49 }
 0x6a0   : > { %v2501_v38 = vpop.permute.xlu2 %2500  ;;  %v2647_v4 = vadd.f32 %v2623_v37, %v2546_v6 }
 0x6a1   : > { %v2523_v11 = vsel %vm2518_vm10, %v2499_v10, %v2501_v38 }
 0x6a2   : > { %v2547_v27 = vadd.f32 %v2523_v11, %v2446_v1  ;;  %v8306_v10 = vadd.f32 %v8276_v61, %v2647_v4 }
 0x6a4   : > { %v2648_v42 = vadd.f32 %v2624_v56, %v2547_v27 }
 0x6a6   : > { %v2666_v13 = vpop.permute.xlu1 %2665  ;;  %v8339_v36 = vadd.f32 %v8276_v61, %v2648_v42  ;;  %v4957_v42 = vld [vmem:[%s9316_s3 + $0x174] sm:$0xf0] }
 0x6a7   : > { %v8311_v58 = vadd.f32 %v2666_v13, %v2650_v18  ;;  %v8313_v33 = vadd.f32 %v2666_v13, %v2651_v51  ;;  %v8315_v6 = vadd.f32 %v2666_v13, %v2652_v22  ;;  %v8317_v21 = vadd.f32 %v2666_v13, %v2653_v20  ;;  %v4941_v18 = vld [vmem:[%s9316_s3 + $0xf4] sm:$0xf0]  ;;  %v4492_v51 = vld [vmem:[%s9316_s3 + $0x70] sm:$0xf] }
 0x6a8   : > { %v2517_v57 = vpop.permute.xlu2 %2516 }
 0x6a9   : > { %v5186_v19 = vpack.i.bf16 %v8311_v58, %v8309_v3  ;;  %v5191_v15 = vpack.i.bf16 %v8315_v6, %v8313_v33  ;;  %v5196_v26 = vpack.i.bf16 %v8317_v21, %v8306_v10  ;;  %v2530_v55 = vsel %vm2518_vm10, %v2515_v41, %v2517_v57 }
 0x6ab   : > { %5187 = vrot.lane.b32.xlu2 %v5186_v19, %s9533_s25  ;;  %5192 = vrot.lane.b32.xlu0 %v5191_v15, %s9533_s25  ;;  %v4925_v15 = vld [vmem:[%s9316_s3 + $0x74] sm:$0xf0] }
 0x6ac   : > { %5197 = vrot.lane.b32.xlu1 %v5196_v26, %s9533_s25 }
 0x6ae   : > { %v2416_v48 = vpop.permute.xlu1 %2415 }
 0x6af   : > { %v2429_v16 = vsel %vm2417_vm9, %v8269_v0, %v2416_v48  ;;  %vm4060_vm9 = vcmask 392192  }
 0x6b0   : > { %v2453_v17 = vadd.f32 %v2429_v16, %v2352_v46  ;;  %v2604_v24 = vpop.permute.xlu2 %2603  ;;  %v4923_v16 = vld [vmem:[%s9316_s3 + $0x64] sm:$0xf0] }
 0x6b1   : > { %v2625_v34 = vsel %vm2619_vm11, %v2602_v49, %v2604_v24  ;;  %v4939_v49 = vld [vmem:[%s9316_s3 + $0xe4] sm:$0xf0] }
 0x6b2   : > { %v2554_v2 = vadd.f32 %v2530_v55, %v2453_v17  ;;  %v4540_v55 = vld [vmem:[%s9316_s3 + $0xd0] sm:$0xf] }
 0x6b6   : > { %v2503_v63 = vpop.permute.xlu1 %2502 }
 0x6b7   : > { %v2524_v60 = vsel %vm2518_vm10, %v2501_v38, %v2503_v63  ;;  %v4493_v63 = vor.u32 %v4925_v15, %v4492_v51  ;;  %v4917_v51 = vld [vmem:[%s9316_s3 + $0x34] sm:$0xf0]  ;;  %vm4062_vm10 = vcmask 523264  }
 0x6b8   : > { %v2548_v12 = vadd.f32 %v2524_v60, %v2447_v40 }
 0x6b9   : > { %3301 = vmatpush.bf16.msra.mxu0 %v4493_v63 }
 0x6ba   : > { %v2649_v9 = vadd.f32 %v2625_v34, %v2548_v12  ;;  %v4937_v34 = vld [vmem:[%s9316_s3 + $0xd4] sm:$0xf0] }
 0x6bc   : > { %v8342_v35 = vadd.f32 %v8276_v61, %v2649_v9 }
 0x6be   : > { %v2616_v39 = vpop.permute.xlu1 %2615 }
 0x6bf   : > { %v2630_v0 = vsel %vm2619_vm11, %v2614_v14, %v2616_v39  ;;  %v2631_v53 = vsel %vm2619_vm11, %v2616_v39, %v2618_v30  ;;  %v4684_v30 = vld [vmem:[%s9316_s3 + $0x1f0] sm:$0xf]  ;;  %vm4066_vm11 = vcmask 916480  }
 0x6c0   : > { %v2654_v50 = vadd.f32 %v2630_v0, %v2553_v5  ;;  %v2655_v25 = vadd.f32 %v2631_v53, %v2554_v2  ;;  %v4476_v39 = vld [vmem:[%s9316_s3 + $0x50] sm:$0xf]  ;;  %v4921_v2 = vld [vmem:[%s9316_s3 + $0x54] sm:$0xf0] }
 0x6c1   : > { %v4973_v53 = vld [vmem:[%s9316_s3 + $0x1f4] sm:$0xf0] }
 0x6c2   : > { %v8344_v41 = vadd.f32 %v2666_v13, %v2654_v50  ;;  %v8346_v59 = vadd.f32 %v2666_v13, %v2655_v25  ;;  %v4685_v50 = vor.u32 %v4973_v53, %v4684_v30  ;;  %v4612_v25 = vld [vmem:[%s9316_s3 + $0x160] sm:$0xf] }
 0x6c4   : > { %v5201_v44 = vpack.i.bf16 %v8344_v41, %v8339_v36  ;;  %v5206_v14 = vpack.i.bf16 %v8346_v59, %v8342_v35  ;;  %3343 = vmatpush.bf16.msra.mxu3 %v4685_v50  ;;  %v4660_v50 = vld [vmem:[%s9316_s3 + $0x1c0] sm:$0xf] }
 0x6c6   : > { %5202 = vrot.lane.b32.xlu2 %v5201_v44, %s9533_s25  ;;  %5207 = vrot.lane.b32.xlu0 %v5206_v14, %s9533_s25  ;;  %v4541_v44 = vor.u32 %v4937_v34, %v4540_v55  ;;  %v4955_v14 = vld [vmem:[%s9316_s3 + $0x164] sm:$0xf0]  ;;  %s5611_s25 = smov 114  }
 0x6fc   : > { %v5183_v5 = vpop.permute.xlu1 %5182 }
 0x6fd   : > { %v5185_v46 = vunpack.i.h.bf16 %v5183_v5  ;;  %v5184_v54 = vunpack.i.l.bf16 %v5183_v5  ;;  %v4676_v5 = vld [vmem:[%s9316_s3 + $0x1e0] sm:$0xf] }
 0x6ff   : > { %v2716_v61 = vsel %vm476_vm0, %v5184_v54, %v5185_v46  ;;  %v4477_v54 = vor.u32 %v4921_v2, %v4476_v39  ;;  %v4951_v2 = vld [vmem:[%s9316_s3 + $0x144] sm:$0xf0] }
 0x700   : > { %v8357_v37 = vmax.f32 %v8279_v45, %v2716_v61  ;;  %v4935_v61 = vld [vmem:[%s9316_s3 + $0xc4] sm:$0xf0] }
 0x705   : > { %v5188_v43 = vpop.permute.xlu2 %5187 }
 0x706   : > { %v5189_v8 = vunpack.i.l.bf16 %v5188_v43  ;;  %v5190_v23 = vunpack.i.h.bf16 %v5188_v43  ;;  %v4532_v43 = vld [vmem:[%s9316_s3 + $0xc0] sm:$0xf] }
 0x708   : > { %v2717_v1 = vsel %vm476_vm0, %v5185_v46, %v5189_v8  ;;  %v4971_v46 = vld [vmem:[%s9316_s3 + $0x1e4] sm:$0xf0] }
 0x709   : > { %v8360_v38 = vmax.f32 %v8282_v62, %v2717_v1  ;;  %v4556_v62 = vld [vmem:[%s9316_s3 + $0xf0] sm:$0xf]  ;;  %v4613_v1 = vor.u32 %v4955_v14, %v4612_v25  ;;  %v4967_v25 = vld [vmem:[%s9316_s3 + $0x1c4] sm:$0xf0] }
 0x70a   : > { %v4661_v14 = vor.u32 %v4967_v25, %v4660_v50  ;;  %v4985_v50 = vld [vmem:[%s9316_s3 + $0x254] sm:$0xf0] }
 0x70b   : > { %v5211_v28 = vpack.i.bf16 %v8360_v38, %v8357_v37 }
 0x70d   : > { %5212 = vrot.lane.b32.xlu1 %v5211_v28, %s9539_s13  ;;  %v4919_v28 = vld [vmem:[%s9316_s3 + $0x44] sm:$0xf0] }
 0x71d   : > { %v5193_v11 = vpop.permute.xlu0 %5192 }
 0x71e   : > { %v5195_v47 = vunpack.i.h.bf16 %v5193_v11  ;;  %v5194_v27 = vunpack.i.l.bf16 %v5193_v11  ;;  %v5198_v31 = vpop.permute.xlu1 %5197  ;;  %v4677_v11 = vor.u32 %v4971_v46, %v4676_v5  ;;  %v4494_v5 = vld [vmem:[%s9316_s3 + $0x78] sm:$0xf0]  ;;  %v4436_v46 = vld [vmem:[%s9316_s3] sm:$0xf] }
 0x71f   : > { %v5200_v32 = vunpack.i.h.bf16 %v5198_v31  ;;  %v5199_v7 = vunpack.i.l.bf16 %v5198_v31  ;;  %v4969_v31 = vld [vmem:[%s9316_s3 + $0x1d4] sm:$0xf0] }
 0x720   : > { %v2721_v4 = vsel %vm476_vm0, %v5190_v23, %v5194_v27  ;;  %v2722_v45 = vsel %vm476_vm0, %v5194_v27, %v5195_v47  ;;  %v8367_v29 = vpop.permute.xlu2 %5202  ;;  %v4604_v23 = vld [vmem:[%s9316_s3 + $0x150] sm:$0xf]  ;;  %3344 = vmatpush.bf16.msra.mxu3 %v4677_v11 }
 0x721   : > { %v8379_v22 = vmax.f32 %v8311_v58, %v2721_v4  ;;  %v8382_v20 = vmax.f32 %v8313_v33, %v2722_v45  ;;  %v2723_v13 = vsel %vm476_vm0, %v5195_v47, %v5200_v32  ;;  %v2718_v19 = vsel %vm476_vm0, %v5189_v8, %v5199_v7  ;;  %v4548_v33 = vld [vmem:[%s9316_s3 + $0xe0] sm:$0xf]  ;;  %v4953_v47 = vld [vmem:[%s9316_s3 + $0x154] sm:$0xf0]  ;;  %v4668_v27 = vld [vmem:[%s9316_s3 + $0x1d0] sm:$0xf] }
 0x722   : > { %v8390_v26 = vmax.f32 %v8315_v6, %v2723_v13  ;;  %v8393_v48 = vmax.f32 %v8309_v3, %v2718_v19  ;;  %v5205_v58 = vunpack.i.h.bf16 %v8367_v29  ;;  %v5204_v57 = vunpack.i.l.bf16 %v8367_v29  ;;  %v4484_v3 = vld [vmem:[%s9316_s3 + $0x60] sm:$0xf]  ;;  %v4524_v4 = vld [vmem:[%s9316_s3 + $0xb0] sm:$0xf]  ;;  %v4933_v45 = vld [vmem:[%s9316_s3 + $0xb4] sm:$0xf0] }
 0x723   : > { %v5216_v52 = vpack.i.bf16 %v8382_v20, %v8379_v22  ;;  %v4557_v6 = vor.u32 %v4941_v18, %v4556_v62  ;;  %v4549_v56 = vor.u32 %v4939_v49, %v4548_v33  ;;  %v4468_v8 = vld [vmem:[%s9316_s3 + $0x40] sm:$0xf]  ;;  %v4605_v62 = vor.u32 %v4953_v47, %v4604_v23  ;;  %v4460_v18 = vld [vmem:[%s9316_s3 + $0x30] sm:$0xf]  ;;  %v4931_v49 = vld [vmem:[%s9316_s3 + $0xa4] sm:$0xf0] }
 0x724   : > { %v2724_v60 = vsel %vm476_vm0, %v5200_v32, %v5205_v58  ;;  %v2719_v40 = vsel %vm476_vm0, %v5199_v7, %v5204_v57  ;;  %v5221_v17 = vpack.i.bf16 %v8390_v26, %v8393_v48  ;;  %v4533_v32 = vor.u32 %v4935_v61, %v4532_v43  ;;  %v4516_v33 = vld [vmem:[%s9316_s3 + $0xa0] sm:$0xf]  ;;  %v4965_v23 = vld [vmem:[%s9316_s3 + $0x1b4] sm:$0xf0] }
 0x725   : > { %v8420_v24 = vmax.f32 %v8317_v21, %v2724_v60  ;;  %v8423_v12 = vmax.f32 %v8306_v10, %v2719_v40  ;;  %5217 = vrot.lane.b32.xlu2 %v5216_v52, %s9539_s13  ;;  %3315 = vmatpush.bf16.msra.mxu1 %v4557_v6  ;;  %v4485_v21 = vor.u32 %v4923_v16, %v4484_v3  ;;  %v4620_v10 = vld [vmem:[%s9316_s3 + $0x170] sm:$0xf]  ;;  %v4452_v52 = vld [vmem:[%s9316_s3 + $0x20] sm:$0xf]  ;;  %v4915_v6 = vld [vmem:[%s9316_s3 + $0x24] sm:$0xf0] }
 0x726   : > { %5222 = vrot.lane.b32.xlu0 %v5221_v17, %s9539_s13  ;;  %v4621_v0 = vor.u32 %v4957_v42, %v4620_v10  ;;  %v4469_v7 = vor.u32 %v4919_v28, %v4468_v8  ;;  %v4669_v13 = vor.u32 %v4969_v31, %v4668_v27  ;;  %v4525_v19 = vor.u32 %v4933_v45, %v4524_v4  ;;  %v4508_v16 = vld [vmem:[%s9316_s3 + $0x90] sm:$0xf]  ;;  %v4929_v60 = vld [vmem:[%s9316_s3 + $0x94] sm:$0xf0]  ;;  %v4922_v27 = vld [vmem:[%s9316_s3 + $0x64] sm:$0xf] }
 0x727   : > { %v5226_v9 = vpack.i.bf16 %v8420_v24, %v8423_v12  ;;  %3302 = vmatpush.bf16.msra.mxu0 %v4485_v21  ;;  %v4461_v15 = vor.u32 %v4917_v51, %v4460_v18  ;;  %v4517_v63 = vor.u32 %v4931_v49, %v4516_v33  ;;  %v4453_v3 = vor.u32 %v4915_v6, %v4452_v52  ;;  %v4588_v8 = vld [vmem:[%s9316_s3 + $0x130] sm:$0xf]  ;;  %v4486_v31 = vld [vmem:[%s9316_s3 + $0x68] sm:$0xf0]  ;;  %v4947_v4 = vld [vmem:[%s9316_s3 + $0x124] sm:$0xf0] }
 0x728   : > { %3329 = vmatpush.bf16.msra.mxu2 %v4621_v0  ;;  %3345 = vmatpush.bf16.msra.mxu3 %v4669_v13  ;;  %v4509_v55 = vor.u32 %v4929_v60, %v4508_v16  ;;  %v4652_v28 = vld [vmem:[%s9316_s3 + $0x1b0] sm:$0xf]  ;;  %v4644_v45 = vld [vmem:[%s9316_s3 + $0x1a0] sm:$0xf]  ;;  %v4920_v13 = vld [vmem:[%s9316_s3 + $0x54] sm:$0xf] }
 0x729   : > { %5227 = vrot.lane.b32.xlu1 %v5226_v9, %s9539_s13  ;;  %3316 = vmatpush.bf16.msra.mxu1 %v4549_v56  ;;  %v4653_v47 = vor.u32 %v4965_v23, %v4652_v28  ;;  %v4989_v49 = vld [vmem:[%s9316_s3 + $0x274] sm:$0xf0]  ;;  %v4572_v52 = vld [vmem:[%s9316_s3 + $0x110] sm:$0xf]  ;;  %v4918_v60 = vld [vmem:[%s9316_s3 + $0x44] sm:$0xf] }
 0x72a   : > { %v4945_v6 = vld [vmem:[%s9316_s3 + $0x114] sm:$0xf0]  ;;  %v4614_v28 = vld [vmem:[%s9316_s3 + $0x168] sm:$0xf0] }
 0x72b   : > { %3303 = vmatpush.bf16.msra.mxu0 %v4477_v54  ;;  %v4911_v54 = vld [vmem:[%s9316_s3 + $0x4] sm:$0xf0]  ;;  %v4961_v16 = vld [vmem:[%s9316_s3 + $0x194] sm:$0xf0] }
 0x72c   : > { %3330 = vmatpush.bf16.msra.mxu2 %v4613_v1  ;;  %v4437_v61 = vor.u32 %v4911_v54, %v4436_v46  ;;  %v4949_v1 = vld [vmem:[%s9316_s3 + $0x134] sm:$0xf0]  ;;  %3346 = vmatpush.bf16.msra.mxu3 %v4661_v14  ;;  %v4914_v46 = vld [vmem:[%s9316_s3 + $0x24] sm:$0xf] }
 0x72d   : > { %3317 = vmatpush.bf16.msra.mxu1 %v4541_v44  ;;  %v4924_v44 = vld [vmem:[%s9316_s3 + $0x74] sm:$0xf]  ;;  %v4589_v11 = vor.u32 %v4949_v1, %v4588_v8  ;;  %v4938_v54 = vld [vmem:[%s9316_s3 + $0xe4] sm:$0xf]  ;;  %v4454_v8 = vld [vmem:[%s9316_s3 + $0x28] sm:$0xf0] }
 0x72e   : > { %v4497_v43 = vor.u32 %v4924_v44, %v4494_v5  ;;  %v4954_v1 = vld [vmem:[%s9316_s3 + $0x164] sm:$0xf]  ;;  %v4457_v23 = vor.u32 %v4914_v46, %v4454_v8  ;;  %v4582_v8 = vld [vmem:[%s9316_s3 + $0x128] sm:$0xf0] }
 0x72f   : > { %3304 = vmatpush.bf16.msra.mxu0 %v4469_v7  ;;  %v4489_v7 = vor.u32 %v4922_v27, %v4486_v31  ;;  %v4724_v27 = vld [vmem:[%s9316_s3 + $0x240] sm:$0xf]  ;;  %v4983_v31 = vld [vmem:[%s9316_s3 + $0x244] sm:$0xf0]  ;;  %v4930_v46 = vld [vmem:[%s9316_s3 + $0xa4] sm:$0xf] }
 0x730   : > { %3331 = vmatpush.bf16.msra.mxu2 %v4605_v62  ;;  %v4963_v62 = vld [vmem:[%s9316_s3 + $0x1a4] sm:$0xf0]  ;;  %3347 = vmatpush.bf16.msra.mxu3 %v4653_v47  ;;  %v4617_v47 = vor.u32 %v4954_v1, %v4614_v28 }
 0x731   : > { %3318 = vmatpush.bf16.msra.mxu1 %v4533_v32  ;;  %v4580_v32 = vld [vmem:[%s9316_s3 + $0x120] sm:$0xf]  ;;  %v4645_v51 = vor.u32 %v4963_v62, %v4644_v45  ;;  %v4936_v45 = vld [vmem:[%s9316_s3 + $0xd4] sm:$0xf] }
 0x732   : > { %v4581_v18 = vor.u32 %v4947_v4, %v4580_v32  ;;  %v4725_v32 = vor.u32 %v4983_v31, %v4724_v27  ;;  %v4446_v4 = vld [vmem:[%s9316_s3 + $0x18] sm:$0xf0] }
 0x733   : > { %3305 = vmatpush.bf16.msra.mxu0 %v4461_v15  ;;  %v4748_v15 = vld [vmem:[%s9316_s3 + $0x270] sm:$0xf]  ;;  %v4686_v31 = vld [vmem:[%s9316_s3 + $0x1f8] sm:$0xf0] }
 0x734   : > { %3348 = vmatpush.bf16.msra.mxu3 %v4645_v51  ;;  %v4952_v51 = vld [vmem:[%s9316_s3 + $0x154] sm:$0xf] }
 0x735   : > { %3319 = vmatpush.bf16.msra.mxu1 %v4525_v19  ;;  %v4478_v19 = vld [vmem:[%s9316_s3 + $0x58] sm:$0xf0] }
 0x736   : > { %v4481_v33 = vor.u32 %v4920_v13, %v4478_v19  ;;  %v4606_v13 = vld [vmem:[%s9316_s3 + $0x158] sm:$0xf0] }
 0x737   : > { %3306 = vmatpush.bf16.msra.mxu0 %v4453_v3  ;;  %v4636_v3 = vld [vmem:[%s9316_s3 + $0x190] sm:$0xf] }
 0x738   : > { %v5208_v40 = vpop.permute.xlu0 %5207 }
 0x739   : > { %v5210_v17 = vunpack.i.h.bf16 %v5208_v40  ;;  %v5209_v56 = vunpack.i.l.bf16 %v5208_v40  ;;  %3320 = vmatpush.bf16.msra.mxu1 %v4517_v63  ;;  %v4749_v63 = vor.u32 %v4989_v49, %v4748_v15  ;;  %v4573_v40 = vor.u32 %v4945_v6, %v4572_v52  ;;  %v4981_v49 = vld [vmem:[%s9316_s3 + $0x234] sm:$0xf0] }
 0x73a   : > { %v4609_v15 = vor.u32 %v4952_v51, %v4606_v13  ;;  %v4970_v13 = vld [vmem:[%s9316_s3 + $0x1e4] sm:$0xf] }
 0x73b   : > { %v2749_v34 = vmax.f32 %v8346_v59, %v5210_v17  ;;  %v2748_v21 = vmax.f32 %v8342_v35, %v5209_v56  ;;  %v2720_v10 = vsel %vm476_vm0, %v5204_v57, %v5209_v56  ;;  %v2725_v42 = vsel %vm476_vm0, %v5205_v58, %v5210_v17  ;;  %v4444_v35 = vld [vmem:[%s9316_s3 + $0x10] sm:$0xf]  ;;  %v4927_v58 = vld [vmem:[%s9316_s3 + $0x84] sm:$0xf0]  ;;  %v4596_v57 = vld [vmem:[%s9316_s3 + $0x140] sm:$0xf] }
 0x73c   : > { %v8529_v30 = vmax.f32 %v8339_v36, %v2720_v10  ;;  %v8532_v9 = vmax.f32 %v8344_v41, %v2725_v42  ;;  %v4913_v36 = vld [vmem:[%s9316_s3 + $0x14] sm:$0xf0]  ;;  %v4500_v41 = vld [vmem:[%s9316_s3 + $0x80] sm:$0xf]  ;;  %v4597_v53 = vor.u32 %v4951_v2, %v4596_v57  ;;  %v4470_v17 = vld [vmem:[%s9316_s3 + $0x48] sm:$0xf0] }
 0x73d   : > { %v5236_v39 = vpack.i.bf16 %v2749_v34, %v2748_v21  ;;  %3321 = vmatpush.bf16.msra.mxu1 %v4509_v55  ;;  %v4445_v29 = vor.u32 %v4913_v36, %v4444_v35  ;;  %v4501_v0 = vor.u32 %v4927_v58, %v4500_v41  ;;  %v4740_v56 = vld [vmem:[%s9316_s3 + $0x260] sm:$0xf]  ;;  %v4987_v55 = vld [vmem:[%s9316_s3 + $0x264] sm:$0xf0]  ;;  %v4637_v34 = vor.u32 %v4961_v16, %v4636_v3  ;;  %v4916_v36 = vld [vmem:[%s9316_s3 + $0x34] sm:$0xf] }
 0x73e   : > { %v5231_v59 = vpack.i.bf16 %v8532_v9, %v8529_v30  ;;  %3332 = vmatpush.bf16.msra.mxu2 %v4597_v53  ;;  %v4741_v21 = vor.u32 %v4987_v55, %v4740_v56  ;;  %v4564_v10 = vld [vmem:[%s9316_s3 + $0x100] sm:$0xf]  ;;  %v4943_v42 = vld [vmem:[%s9316_s3 + $0x104] sm:$0xf0]  ;;  %v4462_v41 = vld [vmem:[%s9316_s3 + $0x38] sm:$0xf0] }
 0x73f   : > { %5237 = vrot.lane.b32.xlu0 %v5236_v39, %s9539_s13  ;;  %3307 = vmatpush.bf16.msra.mxu0 %v4445_v29  ;;  %v4628_v39 = vld [vmem:[%s9316_s3 + $0x180] sm:$0xf]  ;;  %v4959_v35 = vld [vmem:[%s9316_s3 + $0x184] sm:$0xf0]  ;;  %v4940_v29 = vld [vmem:[%s9316_s3 + $0xf4] sm:$0xf]  ;;  %v4565_v2 = vor.u32 %v4943_v42, %v4564_v10  ;;  %v4465_v14 = vor.u32 %v4916_v36, %v4462_v41 }
 0x740   : > { %5232 = vrot.lane.b32.xlu2 %v5231_v59, %s9539_s13  ;;  %v4473_v59 = vor.u32 %v4918_v60, %v4470_v17  ;;  %v4558_v58 = vld [vmem:[%s9316_s3 + $0xf8] sm:$0xf0]  ;;  %v4956_v57 = vld [vmem:[%s9316_s3 + $0x174] sm:$0xf]  ;;  %v4732_v53 = vld [vmem:[%s9316_s3 + $0x250] sm:$0xf]  ;;  %3349 = vmatpush.bf16.msra.mxu3 %v4637_v34  ;;  %v4629_v25 = vor.u32 %v4959_v35, %v4628_v39 }
 0x741   : > { %3322 = vmatpush.bf16.msra.mxu1 %v4501_v0  ;;  %v4622_v0 = vld [vmem:[%s9316_s3 + $0x178] sm:$0xf0]  ;;  %v4561_v44 = vor.u32 %v4940_v29, %v4558_v58  ;;  %v4910_v17 = vld [vmem:[%s9316_s3 + $0x4] sm:$0xf]  ;;  %v4438_v56 = vld [vmem:[%s9316_s3 + $0x8] sm:$0xf0] }
 0x742   : > { %3333 = vmatpush.bf16.msra.mxu2 %v4589_v11  ;;  %v4625_v5 = vor.u32 %v4956_v57, %v4622_v0  ;;  %v4934_v55 = vld [vmem:[%s9316_s3 + $0xc4] sm:$0xf]  ;;  %v4441_v34 = vor.u32 %v4910_v17, %v4438_v56  ;;  %v4598_v42 = vld [vmem:[%s9316_s3 + $0x148] sm:$0xf0]  ;;  %v4708_v41 = vld [vmem:[%s9316_s3 + $0x220] sm:$0xf] }
 0x743   : > { %3308 = vmatpush.bf16.msra.mxu0 %v4437_v61  ;;  %v4733_v61 = vor.u32 %v4985_v50, %v4732_v53  ;;  %v4950_v10 = vld [vmem:[%s9316_s3 + $0x144] sm:$0xf]  ;;  %v4979_v57 = vld [vmem:[%s9316_s3 + $0x224] sm:$0xf0]  ;;  %v4932_v0 = vld [vmem:[%s9316_s3 + $0xb4] sm:$0xf] }
 0x744   : > { %3350 = vmatpush.bf16.msra.mxu3 %v4629_v25  ;;  %v4601_v36 = vor.u32 %v4950_v10, %v4598_v42  ;;  %v4526_v53 = vld [vmem:[%s9316_s3 + $0xb8] sm:$0xf0]  ;;  %v4968_v56 = vld [vmem:[%s9316_s3 + $0x1d4] sm:$0xf]  ;;  %v4662_v10 = vld [vmem:[%s9316_s3 + $0x1c8] sm:$0xf0] }
 0x745   : > { %3371 = vmatpush.bf16.msrb.mxu1 %v4497_v43  ;;  %v4550_v43 = vld [vmem:[%s9316_s3 + $0xe8] sm:$0xf0]  ;;  %v4529_v50 = vor.u32 %v4932_v0, %v4526_v53  ;;  %v4590_v25 = vld [vmem:[%s9316_s3 + $0x138] sm:$0xf0]  ;;  %s5617_s13 = smov 91  }
 0x746   : > { %3334 = vmatpush.bf16.msra.mxu2 %v4581_v18  ;;  %v4553_v11 = vor.u32 %v4938_v54, %v4550_v43  ;;  %v4542_v18 = vld [vmem:[%s9316_s3 + $0xd8] sm:$0xf0]  ;;  %v4518_v43 = vld [vmem:[%s9316_s3 + $0xa8] sm:$0xf0] }
 0x747   : > { %3357 = vmatpush.bf16.msrb.mxu0 %v4749_v63  ;;  %v4545_v19 = vor.u32 %v4936_v45, %v4542_v18  ;;  %v4521_v1 = vor.u32 %v4930_v46, %v4518_v43  ;;  %v4944_v45 = vld [vmem:[%s9316_s3 + $0x114] sm:$0xf]  ;;  %v4962_v43 = vld [vmem:[%s9316_s3 + $0x1a4] sm:$0xf] }
 0x748   : > { %3399 = vmatpush.bf16.msrb.mxu3 %v4625_v5  ;;  %v4977_v5 = vld [vmem:[%s9316_s3 + $0x214] sm:$0xf0] }
 0x749   : > { %3372 = vmatpush.bf16.msrb.mxu1 %v4489_v7  ;;  %v4912_v7 = vld [vmem:[%s9316_s3 + $0x14] sm:$0xf] }
 0x74a   : > { %3335 = vmatpush.bf16.msra.mxu2 %v4573_v40  ;;  %v4449_v62 = vor.u32 %v4912_v7, %v4446_v4  ;;  %v4510_v7 = vld [vmem:[%s9316_s3 + $0x98] sm:$0xf0] }
 0x74b   : > { %3358 = vmatpush.bf16.msrb.mxu0 %v4741_v21  ;;  %v4534_v21 = vld [vmem:[%s9316_s3 + $0xc8] sm:$0xf0] }
 0x74c   : > { %3400 = vmatpush.bf16.msrb.mxu3 %v4617_v47  ;;  %v4537_v35 = vor.u32 %v4934_v55, %v4534_v21  ;;  %v4972_v47 = vld [vmem:[%s9316_s3 + $0x1f4] sm:$0xf]  ;;  %v4670_v55 = vld [vmem:[%s9316_s3 + $0x1d8] sm:$0xf0]  ;;  %v4966_v21 = vld [vmem:[%s9316_s3 + $0x1c4] sm:$0xf] }
 0x74d   : > { %3373 = vmatpush.bf16.msrb.mxu1 %v4481_v33  ;;  %v4716_v33 = vld [vmem:[%s9316_s3 + $0x230] sm:$0xf]  ;;  %v4689_v4 = vor.u32 %v4972_v47, %v4686_v31  ;;  %v4665_v42 = vor.u32 %v4966_v21, %v4662_v10  ;;  %v4702_v21 = vld [vmem:[%s9316_s3 + $0x218] sm:$0xf0] }
 0x74e   : > { %3336 = vmatpush.bf16.msra.mxu2 %v4565_v2  ;;  %v4717_v63 = vor.u32 %v4981_v49, %v4716_v33  ;;  %v4709_v2 = vor.u32 %v4979_v57, %v4708_v41  ;;  %v4926_v33 = vld [vmem:[%s9316_s3 + $0x84] sm:$0xf]  ;;  %v4502_v49 = vld [vmem:[%s9316_s3 + $0x88] sm:$0xf0]  ;;  %v4654_v41 = vld [vmem:[%s9316_s3 + $0x1b8] sm:$0xf0] }
 0x74f   : > { %3359 = vmatpush.bf16.msrb.mxu0 %v4733_v61  ;;  %v4946_v61 = vld [vmem:[%s9316_s3 + $0x124] sm:$0xf]  ;;  %v4750_v57 = vld [vmem:[%s9316_s3 + $0x278] sm:$0xf0] }
 0x750   : > { %3401 = vmatpush.bf16.msrb.mxu3 %v4609_v15  ;;  %v4585_v28 = vor.u32 %v4946_v61, %v4582_v8  ;;  %v4742_v61 = vld [vmem:[%s9316_s3 + $0x268] sm:$0xf0] }
 0x751   : > { %3374 = vmatpush.bf16.msrb.mxu1 %v4473_v59 }
 0x752   : > { %3385 = vmatpush.bf16.msrb.mxu2 %v4561_v44 }
 0x753   : > { %3360 = vmatpush.bf16.msrb.mxu0 %v4725_v32  ;;  %v4928_v32 = vld [vmem:[%s9316_s3 + $0x94] sm:$0xf] }
 0x754   : > { %3402 = vmatpush.bf16.msrb.mxu3 %v4601_v36  ;;  %v4513_v18 = vor.u32 %v4928_v32, %v4510_v7  ;;  %v4964_v36 = vld [vmem:[%s9316_s3 + $0x1b4] sm:$0xf] }
 0x755   : > { %3375 = vmatpush.bf16.msrb.mxu1 %v4465_v14  ;;  %v4700_v14 = vld [vmem:[%s9316_s3 + $0x210] sm:$0xf] }
 0x756   : > { %3386 = vmatpush.bf16.msrb.mxu2 %v4553_v11  ;;  %v4701_v54 = vor.u32 %v4977_v5, %v4700_v14  ;;  %v4692_v11 = vld [vmem:[%s9316_s3 + $0x200] sm:$0xf] }
 0x757   : > { %3361 = vmatpush.bf16.msrb.mxu0 %v4717_v63  ;;  %v4942_v63 = vld [vmem:[%s9316_s3 + $0x104] sm:$0xf] }
 0x759   : > { %3376 = vmatpush.bf16.msrb.mxu1 %v4457_v23  ;;  %v4975_v23 = vld [vmem:[%s9316_s3 + $0x204] sm:$0xf0] }
 0x75a   : > { %3387 = vmatpush.bf16.msrb.mxu2 %v4545_v19  ;;  %v4693_v27 = vor.u32 %v4975_v23, %v4692_v11  ;;  %v4678_v19 = vld [vmem:[%s9316_s3 + $0x1e8] sm:$0xf0] }
 0x75b   : > { %3362 = vmatpush.bf16.msrb.mxu0 %v4709_v2  ;;  %v4681_v15 = vor.u32 %v4970_v13, %v4678_v19  ;;  %v4657_v2 = vor.u32 %v4964_v36, %v4654_v41  ;;  %v4694_v36 = vld [vmem:[%s9316_s3 + $0x208] sm:$0xf0] }
 0x75d   : > { %3377 = vmatpush.bf16.msrb.mxu1 %v4449_v62  ;;  %v4574_v62 = vld [vmem:[%s9316_s3 + $0x118] sm:$0xf0] }
 0x75e   : > { %3388 = vmatpush.bf16.msrb.mxu2 %v4537_v35  ;;  %v4577_v51 = vor.u32 %v4944_v45, %v4574_v62  ;;  %v4630_v45 = vld [vmem:[%s9316_s3 + $0x188] sm:$0xf0] }
 0x75f   : > { %3363 = vmatpush.bf16.msrb.mxu0 %v4701_v54 }
 0x761   : > { %3378 = vmatpush.bf16.msrb.mxu1 %v4441_v34  ;;  %v4673_v34 = vor.u32 %v4968_v56, %v4670_v55 }
 0x762   : > { %3389 = vmatpush.bf16.msrb.mxu2 %v4529_v50 }
 0x763   : > { %3364 = vmatpush.bf16.msrb.mxu0 %v4693_v27  ;;  %v4960_v27 = vld [vmem:[%s9316_s3 + $0x194] sm:$0xf] }
 0x766   : > { %3390 = vmatpush.bf16.msrb.mxu2 %v4521_v1 }
 0x76a   : > { %3391 = vmatpush.bf16.msrb.mxu2 %v4513_v18  ;;  %v4982_v18 = vld [vmem:[%s9316_s3 + $0x244] sm:$0xf] }
 0x77f   : > { %v8724_v52 = vpop.permute.xlu2 %5217  ;;  %v8726_v6 = vpop.permute.xlu1 %5212 }
 0x780   : > { %v5220_v3 = vunpack.i.h.bf16 %v8724_v52  ;;  %v5219_v16 = vunpack.i.l.bf16 %v8724_v52  ;;  %v5215_v60 = vunpack.i.h.bf16 %v8726_v6  ;;  %v5214_v40 = vunpack.i.l.bf16 %v8726_v6  ;;  %v4646_v6 = vld [vmem:[%s9316_s3 + $0x1a8] sm:$0xf0] }
 0x781   : > { %v4649_v47 = vor.u32 %v4962_v43, %v4646_v6 }
 0x782   : > { %v2786_v39 = vsel %vm840_vm4, %v5214_v40, %v5215_v60  ;;  %v2791_v59 = vsel %vm840_vm4, %v5219_v16, %v5220_v3  ;;  %v4505_v16 = vor.u32 %v4926_v33, %v4502_v49  ;;  %v4566_v40 = vld [vmem:[%s9316_s3 + $0x108] sm:$0xf0]  ;;  %v4718_v33 = vld [vmem:[%s9316_s3 + $0x238] sm:$0xf0] }
 0x783   : > { %v2806_v29 = vmax.f32 %v8357_v37, %v2786_v39  ;;  %v2811_v58 = vmax.f32 %v8379_v22, %v2791_v59  ;;  %v4948_v37 = vld [vmem:[%s9316_s3 + $0x134] sm:$0xf]  ;;  %v4569_v17 = vor.u32 %v4942_v63, %v4566_v40  ;;  %v4978_v63 = vld [vmem:[%s9316_s3 + $0x224] sm:$0xf] }
 0x784   : > { %v4593_v44 = vor.u32 %v4948_v37, %v4590_v25  ;;  %3392 = vmatpush.bf16.msrb.mxu2 %v4505_v16  ;;  %v4710_v16 = vld [vmem:[%s9316_s3 + $0x228] sm:$0xf0] }
 0x785   : > { %v8773_v22 = vpack.c.bf16 %v2811_v58, %v2806_v29  ;;  %v4988_v58 = vld [vmem:[%s9316_s3 + $0x274] sm:$0xf] }
 0x786   : > { %3403 = vmatpush.bf16.msrb.mxu3 %v4593_v44  ;;  %v4753_v54 = vor.u32 %v4988_v58, %v4750_v57 }
 0x787   : > { %3309 = vmatmul.bf16.vlgmr.msra.gmra.mxu0 %v8773_v22 }
 0x788   : > { %3413 = vmatpush.bf16.msra.mxu0 %v4689_v4  ;;  %v4958_v4 = vld [vmem:[%s9316_s3 + $0x184] sm:$0xf] }
 0x789   : > { %v4633_v13 = vor.u32 %v4958_v4, %v4630_v45 }
 0x78a   : > { %3404 = vmatpush.bf16.msrb.mxu3 %v4585_v28 }
 0x78c   : > { %3414 = vmatpush.bf16.msra.mxu0 %v4681_v15  ;;  %v4980_v15 = vld [vmem:[%s9316_s3 + $0x234] sm:$0xf] }
 0x78d   : > { %v4721_v49 = vor.u32 %v4980_v15, %v4718_v33 }
 0x78e   : > { %3405 = vmatpush.bf16.msrb.mxu3 %v4577_v51  ;;  %v4726_v51 = vld [vmem:[%s9316_s3 + $0x248] sm:$0xf0] }
 0x78f   : > { %v4729_v19 = vor.u32 %v4982_v18, %v4726_v51 }
 0x790   : > { %3415 = vmatpush.bf16.msra.mxu0 %v4673_v34  ;;  %v4976_v34 = vld [vmem:[%s9316_s3 + $0x214] sm:$0xf] }
 0x792   : > { %3406 = vmatpush.bf16.msrb.mxu3 %v4569_v17  ;;  %v4713_v17 = vor.u32 %v4978_v63, %v4710_v16 }
 0x794   : > { %3416 = vmatpush.bf16.msra.mxu0 %v4665_v42  ;;  %v4705_v42 = vor.u32 %v4976_v34, %v4702_v21 }
 0x798   : > { %v5223_v39 = vpop.permute.xlu0 %5222  ;;  %3417 = vmatpush.bf16.msra.mxu0 %v4657_v2 }
 0x799   : > { %v5225_v59 = vunpack.i.h.bf16 %v5223_v39  ;;  %v5224_v35 = vunpack.i.l.bf16 %v5223_v39 }
 0x79a   : > { %v8857_v29 = vpop.permute.xlu2 %5232 }
 0x79b   : > { %v5235_v0 = vunpack.i.h.bf16 %v8857_v29  ;;  %v5234_v53 = vunpack.i.l.bf16 %v8857_v29  ;;  %v5228_v37 = vpop.permute.xlu1 %5227  ;;  %v2787_v50 = vsel %vm840_vm4, %v5215_v60, %v5224_v35  ;;  %v2792_v25 = vsel %vm840_vm4, %v5220_v3, %v5225_v59 }
 0x79c   : > { %v5230_v44 = vunpack.i.h.bf16 %v5228_v37  ;;  %v5229_v14 = vunpack.i.l.bf16 %v5228_v37  ;;  %v2807_v5 = vmax.f32 %v8360_v38, %v2787_v50  ;;  %v2812_v46 = vmax.f32 %v8382_v20, %v2792_v25  ;;  %v4986_v20 = vld [vmem:[%s9316_s3 + $0x264] sm:$0xf]  ;;  %3418 = vmatpush.bf16.msra.mxu0 %v4649_v47 }
 0x79d   : > { %v4745_v31 = vor.u32 %v4986_v20, %v4742_v61 }
 0x79e   : > { %v2817_v60 = vpack.c.bf16 %v2812_v46, %v2807_v5  ;;  %v2788_v52 = vsel %vm840_vm4, %v5224_v35, %v5229_v14  ;;  %v2793_v3 = vsel %vm840_vm4, %v5225_v59, %v5230_v44  ;;  %v2789_v38 = vsel %vm840_vm4, %v5229_v14, %v5234_v53  ;;  %v4974_v35 = vld [vmem:[%s9316_s3 + $0x204] sm:$0xf] }
 0x79f   : > { %v2808_v8 = vmax.f32 %v8393_v48, %v2788_v52  ;;  %v2813_v1 = vmax.f32 %v8390_v26, %v2793_v3  ;;  %v2794_v28 = vsel %vm840_vm4, %v5230_v44, %v5235_v0  ;;  %v2809_v11 = vmax.f32 %v8423_v12, %v2789_v38  ;;  %v4638_v48 = vld [vmem:[%s9316_s3 + $0x198] sm:$0xf0]  ;;  %v4984_v12 = vld [vmem:[%s9316_s3 + $0x254] sm:$0xf] }
 0x7a0   : > { %3323 = vmatmul.bf16.vlgmr.msra.gmra.mxu1 %v2817_v60  ;;  %v2814_v23 = vmax.f32 %v8420_v24, %v2794_v28  ;;  %v4734_v24 = vld [vmem:[%s9316_s3 + $0x258] sm:$0xf0]  ;;  %v4641_v7 = vor.u32 %v4960_v27, %v4638_v48  ;;  %v4697_v29 = vor.u32 %v4974_v35, %v4694_v36 }
 0x7a1   : > { %3427 = vmatpush.bf16.msra.mxu1 %v4753_v54  ;;  %v2818_v26 = vpack.c.bf16 %v2813_v1, %v2808_v8  ;;  %v4737_v62 = vor.u32 %v4984_v12, %v4734_v24 }
 0x7a2   : > { %v2819_v32 = vpack.c.bf16 %v2814_v23, %v2809_v11  ;;  %3419 = vmatpush.bf16.msra.mxu0 %v4641_v7 }
 0x7a3   : > { %3337 = vmatmul.bf16.vlgmr.msra.gmra.mxu2 %v2818_v26 }
 0x7a4   : > { %3351 = vmatmul.bf16.vlgmr.msra.gmra.mxu3 %v2819_v32 }
 0x7a5   : > { %3428 = vmatpush.bf16.msra.mxu1 %v4745_v31 }
 0x7a6   : > { %3420 = vmatpush.bf16.msra.mxu0 %v4633_v13 }
 0x7a9   : > { %3429 = vmatpush.bf16.msra.mxu1 %v4737_v62 }
 0x7ad   : > { %3430 = vmatpush.bf16.msra.mxu1 %v4729_v19 }
 0x7b0   : > { %3379 = vmatmul.bf16.vlgmr.msrb.gmra.mxu1 %v8773_v22 }
 0x7b1   : > { %3431 = vmatpush.bf16.msra.mxu1 %v4721_v49  ;;  %v5238_v40 = vpop.permute.xlu0 %5237 }
 0x7b2   : > { %v5240_v56 = vunpack.i.h.bf16 %v5238_v40  ;;  %v5239_v55 = vunpack.i.l.bf16 %v5238_v40 }
 0x7b3   : > { %3393 = vmatmul.bf16.vlgmr.msrb.gmra.mxu2 %v2817_v60 }
 0x7b4   : > { %v2795_v10 = vsel %vm840_vm4, %v5235_v0, %v5240_v56  ;;  %v2790_v22 = vsel %vm840_vm4, %v5234_v53, %v5239_v55  ;;  %3407 = vmatmul.bf16.vlgmr.msrb.gmra.mxu3 %v2818_v26  ;;  %vm3593_vm4 = vcmask 932864  }
 0x7b5   : > { %3432 = vmatpush.bf16.msra.mxu1 %v4713_v17  ;;  %v2810_v39 = vmax.f32 %v8529_v30, %v2790_v22  ;;  %v2815_v59 = vmax.f32 %v8532_v9, %v2795_v10 }
 0x7b7   : > { %v2820_v41 = vpack.c.bf16 %v2815_v59, %v2810_v39 }
 0x7b9   : > { %3433 = vmatpush.bf16.msra.mxu1 %v4705_v42  ;;  %3365 = vmatmul.bf16.vlgmr.msrb.gmra.mxu0 %v2820_v41 }
 0x7bd   : > { %3434 = vmatpush.bf16.msra.mxu1 %v4697_v29 }
 0x7c0   : > { %3435 = vmatmul.bf16.vlgmr.msra.gmra.mxu1 %v2820_v41 }
 0x7c9   : > { %3421 = vmatmul.bf16.vlgmr.msra.gmra.mxu0 %v2819_v32 }
 0x804   : > { %v3310_v57 = vpop.f32.mrf.mxu0 }
 0x80c   : > { %v3312_v9 = vpop.f32.mrf.mxu0 }
 0x81d   : > { %v3324_v58 = vpop.f32.mrf.mxu1 }
 0x81e   : > { %v3325_v50 = vadd.f32 %v3324_v58, %v3310_v57 }
 0x825   : > { %v3326_v30 = vpop.f32.mrf.mxu1 }
 0x826   : > { %v3338_v2 = vpop.f32.mrf.mxu2  ;;  %v3327_v44 = vadd.f32 %v3326_v30, %v3312_v9 }
 0x827   : > { %v3352_v0 = vpop.f32.mrf.mxu3  ;;  %v3339_v14 = vadd.f32 %v3338_v2, %v3325_v50 }
 0x829   : > { %v3353_v54 = vadd.f32 %v3352_v0, %v3339_v14 }
 0x82d   : > { %v3380_v53 = vpop.f32.mrf.mxu1 }
 0x82e   : > { %v3340_v37 = vpop.f32.mrf.mxu2 }
 0x82f   : > { %v3354_v5 = vpop.f32.mrf.mxu3  ;;  %v3341_v46 = vadd.f32 %v3340_v37, %v3327_v44 }
 0x831   : > { %v3355_v60 = vadd.f32 %v3354_v5, %v3341_v46 }
 0x835   : > { %v3382_v43 = vpop.f32.mrf.mxu1 }
 0x836   : > { %v3366_v25 = vpop.f32.mrf.mxu0  ;;  %v3394_v6 = vpop.f32.mrf.mxu2 }
 0x837   : > { %v3367_v52 = vadd.f32 %v3366_v25, %v3353_v54  ;;  %v3395_v20 = vadd.f32 %v3394_v6, %v3380_v53  ;;  %v3408_v1 = vpop.f32.mrf.mxu3 }
 0x839   : > { %v8956_v61 = vmax.f32 %v3367_v52, 0.0  ;;  %v3409_v11 = vadd.f32 %v3408_v1, %v3395_v20 }
 0x83d   : > { %v3436_v23 = vpop.f32.mrf.mxu1 }
 0x83e   : > { %v3368_v3 = vpop.f32.mrf.mxu0  ;;  %v3396_v47 = vpop.f32.mrf.mxu2 }
 0x83f   : > { %v3369_v38 = vadd.f32 %v3368_v3, %v3355_v60  ;;  %v3397_v31 = vadd.f32 %v3396_v47, %v3382_v43  ;;  %v3410_v24 = vpop.f32.mrf.mxu3 }
 0x841   : > { %v8958_v8 = vmax.f32 %v3369_v38, 0.0  ;;  %v3411_v7 = vadd.f32 %v3410_v24, %v3397_v31 }
 0x843   : > { %v8962_v28 = vpack.i.bf16 %v8958_v8, %v8956_v61  ;;  %v3712_v48 = vpack.c.bf16 %v8958_v8, %v8956_v61 }
 0x845   : > { %5252 = vrot.lane.b32.xlu0 %v8962_v28, %s5610_s16  ;;  %5242 = vrot.lane.b32.xlu1 %v8962_v28, %s5611_s25  ;;  %v3438_v18 = vpop.f32.mrf.mxu1 }
 0x846   : > { %v3422_v27 = vpop.f32.mrf.mxu0 }
 0x847   : > { %v3423_v26 = vadd.f32 %v3422_v27, %v3409_v11 }
 0x849   : > { %v3437_v32 = vadd.f32 %v3436_v23, %v3423_v26 }
 0x84b   : > { %v3442_v12 = vmax.f32 %v3437_v32, 0.0 }
 0x84d   : > { %v8969_v4 = vpack.i.bf16 %v3442_v12, %v8956_v61 }
 0x84e   : > { %v3424_v45 = vpop.f32.mrf.mxu0 }
 0x84f   : > { %v3425_v62 = vadd.f32 %v3424_v45, %v3411_v7 }
 0x851   : > { %v3439_v51 = vadd.f32 %v3438_v18, %v3425_v62 }
 0x853   : > { %v3444_v13 = vmax.f32 %v3439_v51, 0.0 }
 0x855   : > { %v5246_v19 = vpack.i.bf16 %v3444_v13, %v3442_v12  ;;  %v8973_v15 = vpack.i.bf16 %v3444_v13, %v8958_v8 }
 0x857   : > { %5247 = vrot.lane.b32.xlu2 %v5246_v19, %s5611_s25  ;;  %5267 = vrot.lane.b32.xlu0 %v5246_v19, %s5612_s29  ;;  %s5618_s25 = smov 102  }
 0x858   : > { %5257 = vrot.lane.b32.xlu1 %v5246_v19, %s5610_s16  ;;  %s10091_s16 = smov 124  }
 0x85f   : > { %5262 = vrot.lane.b32.xlu2 %v8962_v28, %s5612_s29  ;;  %5282 = vrot.lane.b32.xlu0 %v8962_v28, %s10087_s22 }
 0x860   : > { %5272 = vrot.lane.b32.xlu1 %v8969_v4, %s5613_s1 }
 0x867   : > { %5277 = vrot.lane.b32.xlu2 %v8973_v15, %s5613_s1  ;;  %5297 = vrot.lane.b32.xlu0 %v5246_v19, %s10088_s24  ;;  %s5620_s1 = smov 104  }
 0x868   : > { %5287 = vrot.lane.b32.xlu1 %v5246_v19, %s10087_s22  ;;  %s5619_s22 = smov 103  }
 0x86f   : > { %5292 = vrot.lane.b32.xlu2 %v8962_v28, %s10088_s24  ;;  %5312 = vrot.lane.b32.xlu0 %v8962_v28, %s5614_s14  ;;  %s5621_s24 = smov 112  }
 0x870   : > { %5302 = vrot.lane.b32.xlu1 %v8962_v28, %s10089_s15 }
 0x877   : > { %5307 = vrot.lane.b32.xlu2 %v5246_v19, %s10089_s15  ;;  %5327 = vrot.lane.b32.xlu0 %v8973_v15, %s5615_s12 }
 0x878   : > { %5317 = vrot.lane.b32.xlu1 %v5246_v19, %s5614_s14 }
 0x87f   : > { %5322 = vrot.lane.b32.xlu2 %v8969_v4, %s5615_s12 }
 0x880   : > { %5332 = vrot.lane.b32.xlu1 %v8962_v28, %s10090_s0  ;;  %s5517_s0 = scalar_lea.hbm %s9324_s11, 2 }
 0x888   : > { %5347 = vrot.lane.b32.xlu1 %v8962_v28, %s5616_s30  ;;  %s375_s30 = sand.u32 1, %s5551_s18  }
 0x8b1   : > { %v5248_v33 = vpop.permute.xlu2 %5247 }
 0x8b2   : > { %v5250_v16 = vunpack.i.h.bf16 %v5248_v33  ;;  %v5249_v40 = vunpack.i.l.bf16 %v5248_v33 }
 0x8b7   : > { %v5253_v49 = vpop.permute.xlu0 %5252  ;;  %v5243_v63 = vpop.permute.xlu1 %5242 }
 0x8b8   : > { %v5245_v17 = vunpack.i.h.bf16 %v5243_v63  ;;  %v5244_v56 = vunpack.i.l.bf16 %v5243_v63  ;;  %v5255_v55 = vunpack.i.h.bf16 %v5253_v49  ;;  %v5254_v34 = vunpack.i.l.bf16 %v5253_v49 }
 0x8b9   : > { %v5263_v59 = vpop.permute.xlu2 %5262 }
 0x8ba   : > { %v3595_v21 = vsel %vm3593_vm4, %v5245_v17, %v5250_v16  ;;  %v3594_v10 = vsel %vm3593_vm4, %v5244_v56, %v5249_v40  ;;  %v3719_v22 = vpack.c.bf16 %v5245_v17, %v5244_v56  ;;  %v3718_v35 = vpack.c.bf16 %v5255_v55, %v5254_v34 }
 0x8bb   : > { %v5341_v42 = vpack.i.bf16 %v5250_v16, %v3595_v21  ;;  %v5336_v39 = vpack.i.bf16 %v5249_v40, %v3594_v10  ;;  %v5265_v36 = vunpack.i.h.bf16 %v5263_v59  ;;  %v5264_v41 = vunpack.i.l.bf16 %v5263_v59 }
 0x8bc   : > { %3813 = vmatpush.bf16.msra.mxu2 %v3719_v22 }
 0x8bd   : > { %5342 = vrot.lane.b32.xlu0 %v5341_v42, %s5617_s13  ;;  %5337 = vrot.lane.b32.xlu2 %v5336_v39, %s5617_s13  ;;  %v3717_v29 = vpack.c.bf16 %v5265_v36, %v5264_v41 }
 0x8c0   : > { %3814 = vmatpush.bf16.msra.mxu2 %v3718_v35 }
 0x8c1   : > { %v5278_v58 = vpop.permute.xlu2 %5277 }
 0x8c2   : > { %v5280_v20 = vunpack.i.h.bf16 %v5278_v58  ;;  %v5279_v1 = vunpack.i.l.bf16 %v5278_v58 }
 0x8c4   : > { %3815 = vmatpush.bf16.msra.mxu2 %v3717_v29  ;;  %v3574_v26 = vsel %vm3572_vm14, %v5279_v1, %v5280_v20 }
 0x8c5   : > { %5352 = vrot.lane.b32.xlu2 %v8962_v28, %s10091_s16  ;;  %v5391_v12 = vpack.i.bf16 %v5280_v20, %v3574_v26  ;;  %s5624_s16 = smov 32  }
 0x8c9   : > { %v5268_v57 = vpop.permute.xlu0 %5267  ;;  %v9001_v14 = vpop.permute.xlu2 %5292 }
 0x8ca   : > { %v5258_v30 = vpop.permute.xlu1 %5257  ;;  %v5270_v25 = vunpack.i.h.bf16 %v5268_v57  ;;  %v5269_v44 = vunpack.i.l.bf16 %v5268_v57  ;;  %v5295_v42 = vunpack.i.h.bf16 %v9001_v14  ;;  %v5294_v39 = vunpack.i.l.bf16 %v9001_v14 }
 0x8cb   : > { %v5260_v2 = vunpack.i.h.bf16 %v5258_v30  ;;  %v5259_v9 = vunpack.i.l.bf16 %v5258_v30 }
 0x8cc   : > { %v3581_v6 = vsel %vm3579_vm13, %v5265_v36, %v5270_v25  ;;  %v3580_v60 = vsel %vm3579_vm13, %v5264_v41, %v5269_v44 }
 0x8cd   : > { %v3588_v0 = vsel %vm3586_vm12, %v5255_v55, %v5260_v2  ;;  %v3587_v53 = vsel %vm3586_vm12, %v5254_v34, %v5259_v9  ;;  %5367 = vrot.lane.b32.xlu2 %v8962_v28, %s5618_s25  ;;  %v5376_v3 = vpack.i.bf16 %v5270_v25, %v3581_v6  ;;  %v5371_v38 = vpack.i.bf16 %v5269_v44, %v3580_v60  ;;  %s10094_s25 = smov 96  }
 0x8ce   : > { %v5361_v37 = vpack.i.bf16 %v5260_v2, %v3588_v0  ;;  %v5356_v50 = vpack.i.bf16 %v5259_v9, %v3587_v53 }
 0x8d0   : > { %5362 = vrot.lane.b32.xlu1 %v5361_v37, %s5617_s13  ;;  %5357 = vrot.lane.b32.xlu0 %v5356_v50, %s5617_s13 }
 0x8d1   : > { %v5283_v5 = vpop.permute.xlu0 %5282  ;;  %v5308_v31 = vpop.permute.xlu2 %5307 }
 0x8d2   : > { %v5285_v46 = vunpack.i.h.bf16 %v5283_v5  ;;  %v5284_v54 = vunpack.i.l.bf16 %v5283_v5  ;;  %v5273_v43 = vpop.permute.xlu1 %5272  ;;  %v5309_v40 = vunpack.i.l.bf16 %v5308_v31  ;;  %v5310_v37 = vunpack.i.h.bf16 %v5308_v31 }
 0x8d3   : > { %v5275_v11 = vunpack.i.h.bf16 %v5273_v43  ;;  %v5274_v23 = vunpack.i.l.bf16 %v5273_v43 }
 0x8d4   : > { %v9003_v52 = vpack.c.bf16 %v5285_v46, %v5284_v54 }
 0x8d5   : > { %5382 = vrot.lane.b32.xlu2 %v8962_v28, %s5619_s22  ;;  %v3573_v32 = vsel %vm3572_vm14, %v5274_v23, %v5275_v11  ;;  %s5625_s22 = smov 80  }
 0x8d6   : > { %v5386_v24 = vpack.i.bf16 %v5275_v11, %v3573_v32 }
 0x8d8   : > { %5377 = vrot.lane.b32.xlu1 %v5376_v3, %s5617_s13  ;;  %5372 = vrot.lane.b32.xlu0 %v5371_v38, %s5617_s13 }
 0x8d9   : > { %v5298_v47 = vpop.permute.xlu0 %5297  ;;  %v5323_v16 = vpop.permute.xlu2 %5322 }
 0x8da   : > { %v5288_v27 = vpop.permute.xlu1 %5287  ;;  %v5300_v55 = vunpack.i.h.bf16 %v5298_v47  ;;  %v5299_v34 = vunpack.i.l.bf16 %v5298_v47  ;;  %v5325_v21 = vunpack.i.h.bf16 %v5323_v16  ;;  %v5324_v10 = vunpack.i.l.bf16 %v5323_v16 }
 0x8db   : > { %v5290_v7 = vunpack.i.h.bf16 %v5288_v27  ;;  %v5289_v45 = vunpack.i.l.bf16 %v5288_v27 }
 0x8dc   : > { %v3557_v41 = vsel %vm10092_vm15, %v5295_v42, %v5300_v55  ;;  %v3556_v29 = vsel %vm10093_vm3, %v5294_v39, %v5299_v34 }
 0x8dd   : > { %5397 = vrot.lane.b32.xlu2 %v8962_v28, %s5620_s1  ;;  %v3563_v19 = vsel %vm658_vm2, %v5285_v46, %v5290_v7  ;;  %v3562_v33 = vsel %vm658_vm2, %v5284_v54, %v5289_v45  ;;  %vm3541_vm2 = vcmask 752640   ;;  %v5421_v9 = vpack.i.bf16 %v5300_v55, %v3557_v41  ;;  %v4996_v41 = vld [vmem:[%s9317_s4 + $0x2c] sm:$0xf0]  ;;  %s10095_s1 = smov 16  }
 0x8de   : > { %v5406_v17 = vpack.i.bf16 %v5290_v7, %v3563_v19  ;;  %v5401_v56 = vpack.i.bf16 %v5289_v45, %v3562_v33  ;;  %v3542_v57 = vsel %vm3541_vm2, %v5324_v10, %v5325_v21  ;;  %v5416_v0 = vpack.i.bf16 %v5299_v34, %v3556_v29  ;;  %v4992_v34 = vld [vmem:[%s9317_s4 + $0xc] sm:$0xf0] }
 0x8df   : > { %v3714_v45 = vpack.c.bf16 %v5295_v42, %v5294_v39 }
 0x8e0   : > { %5392 = vrot.lane.b32.xlu1 %v5391_v12, %s5617_s13  ;;  %5387 = vrot.lane.b32.xlu0 %v5386_v24, %s5617_s13 }
 0x8e1   : > { %v5313_v62 = vpop.permute.xlu0 %5312 }
 0x8e2   : > { %v5315_v18 = vunpack.i.h.bf16 %v5313_v62  ;;  %v5314_v51 = vunpack.i.l.bf16 %v5313_v62  ;;  %v9011_v13 = vpop.permute.xlu1 %5302 }
 0x8e3   : > { %v5304_v63 = vunpack.i.l.bf16 %v9011_v13  ;;  %v5305_v53 = vunpack.i.h.bf16 %v9011_v13 }
 0x8e4   : > { %v9015_v49 = vpack.c.bf16 %v5315_v18, %v5314_v51 }
 0x8e5   : > { %5412 = vrot.lane.b32.xlu2 %v8962_v28, %s5621_s24  ;;  %v3550_v22 = vsel %vm476_vm0, %v5304_v63, %v5309_v40  ;;  %v3551_v25 = vsel %vm476_vm0, %v5305_v53, %v5310_v37  ;;  %vm3675_vm0 = vcmask 744448  }
 0x8e6   : > { %v5426_v58 = vpack.i.bf16 %v5309_v40, %v3550_v22  ;;  %v5431_v46 = vpack.i.bf16 %v5310_v37, %v3551_v25  ;;  %v4758_v37 = vld [vmem:[%s9317_s4 + $0x10] sm:$0xf0] }
 0x8e8   : > { %5407 = vrot.lane.b32.xlu1 %v5406_v17, %s5617_s13  ;;  %5402 = vrot.lane.b32.xlu0 %v5401_v56, %s5617_s13 }
 0x8e9   : > { %v5328_v28 = vpop.permute.xlu0 %5327 }
 0x8ea   : > { %v5330_v59 = vunpack.i.h.bf16 %v5328_v28  ;;  %v5329_v35 = vunpack.i.l.bf16 %v5328_v28  ;;  %v5318_v36 = vpop.permute.xlu1 %5317 }
 0x8eb   : > { %v5320_v54 = vunpack.i.h.bf16 %v5318_v36  ;;  %v5319_v43 = vunpack.i.l.bf16 %v5318_v36  ;;  %v4772_v36 = vld [vmem:[%s9317_s4 + $0x20] sm:$0xf] }
 0x8ec   : > { %v3543_v30 = vsel %vm3541_vm2, %v5329_v35, %v5330_v59 }
 0x8ed   : > { %v3727_v2 = vpack.c.bf16 %v3543_v30, %v3542_v57  ;;  %5427 = vrot.lane.b32.xlu2 %v5426_v58, %s5617_s13  ;;  %v3602_v60 = vsel %vm3600_vm5, %v5315_v18, %v5320_v54  ;;  %v3601_v3 = vsel %vm3600_vm5, %v5314_v51, %v5319_v43  ;;  %v3713_v18 = vpack.c.bf16 %v5305_v53, %v5304_v63  ;;  %v4990_v53 = vld [vmem:[%s9317_s4 + $0x4] sm:$0xf] }
 0x8ee   : > { %v5451_v11 = vpack.i.bf16 %v5320_v54, %v3602_v60  ;;  %v5446_v23 = vpack.i.bf16 %v5319_v43, %v3601_v3  ;;  %v4773_v57 = vor.u32 %v4996_v41, %v4772_v36 }
 0x8ef   : > { %3832 = vmatpush.bf16.msra.mxu3 %v3727_v2 }
 0x8f0   : > { %5422 = vrot.lane.b32.xlu1 %v5421_v9, %s5617_s13  ;;  %5417 = vrot.lane.b32.xlu0 %v5416_v0, %s5617_s13 }
 0x8f2   : > { %v5333_v50 = vpop.permute.xlu1 %5332 }
 0x8f3   : > { %v5335_v44 = vunpack.i.h.bf16 %v5333_v50  ;;  %v5334_v14 = vunpack.i.l.bf16 %v5333_v50 }
 0x8f5   : > { %v3726_v5 = vpack.c.bf16 %v5335_v44, %v5334_v14  ;;  %5442 = vrot.lane.b32.xlu2 %v8973_v15, %s5617_s13  ;;  %v3747_v15 = vld [vmem:[%s9318_s5 + $0x10] sm:$0xff]  ;;  %v4761_v14 = vor.u32 %v4990_v53, %v4758_v37  ;;  %v3748_v37 = vld [vmem:[%s9318_s5 + $0x18] sm:$0xff] }
 0x8f7   : > { %3833 = vmatpush.bf16.msra.mxu3 %v3726_v5 }
 0x8f8   : > { %5437 = vrot.lane.b32.xlu1 %v8969_v4, %s5617_s13  ;;  %5432 = vrot.lane.b32.xlu0 %v5431_v46, %s5617_s13  ;;  %v3746_v4 = vld [vmem:[%s9318_s5 + $0x8] sm:$0xff] }
 0x8fa   : > { %v5348_v6 = vpop.permute.xlu1 %5347 }
 0x8fb   : > { %v5350_v38 = vunpack.i.h.bf16 %v5348_v6  ;;  %v5349_v20 = vunpack.i.l.bf16 %v5348_v6 }
 0x8fd   : > { %v3725_v1 = vpack.c.bf16 %v5350_v38, %v5349_v20 }
 0x8ff   : > { %3834 = vmatpush.bf16.msra.mxu3 %v3725_v1 }
 0x900   : > { %5452 = vrot.lane.b32.xlu1 %v5451_v11, %s5617_s13  ;;  %5447 = vrot.lane.b32.xlu0 %v5446_v23, %s5617_s13  ;;  %s5623_s13 = smov 48  }
 0x908   : > { %3761 = vperm.xlu1 %5180, %v3747_v15   ;;  %3756 = vperm.xlu0 %5179, %v3746_v4  }
 0x917   : > { %v5338_v47 = vpop.permute.xlu2 %5337 }
 0x918   : > { %v5340_v51 = vunpack.i.h.bf16 %v5338_v47  ;;  %v5339_v19 = vunpack.i.l.bf16 %v5338_v47 }
 0x91a   : > { %v3690_v13 = vsel %vm3675_vm0, %v5339_v19, %v5340_v51 }
 0x91f   : > { %v5353_v27 = vpop.permute.xlu2 %5352 }
 0x920   : > { %v5355_v26 = vunpack.i.h.bf16 %v5353_v27  ;;  %v5354_v31 = vunpack.i.l.bf16 %v5353_v27  ;;  %v4774_v27 = vld [vmem:[%s9317_s4 + $0x30] sm:$0xf0] }
 0x922   : > { %v3716_v32 = vpack.c.bf16 %v5355_v26, %v5354_v31 }
 0x924   : > { %3816 = vmatpush.bf16.msra.mxu2 %v3716_v32 }
 0x927   : > { %v5368_v12 = vpop.permute.xlu2 %5367 }
 0x928   : > { %v5370_v24 = vunpack.i.h.bf16 %v5368_v12  ;;  %v5369_v7 = vunpack.i.l.bf16 %v5368_v12  ;;  %3817 = vmatpush.bf16.msra.mxu2 %v9003_v52  ;;  %v4756_v52 = vld [vmem:[%s9317_s4] sm:$0xf] }
 0x929   : > { %v4757_v22 = vor.u32 %v4992_v34, %v4756_v52 }
 0x92a   : > { %v3724_v62 = vpack.c.bf16 %v5370_v24, %v5369_v7 }
 0x92c   : > { %3818 = vmatpush.bf16.msra.mxu2 %v3714_v45  ;;  %3835 = vmatpush.bf16.msra.mxu3 %v3724_v62 }
 0x92f   : > { %v5343_v33 = vpop.permute.xlu0 %5342  ;;  %v5383_v16 = vpop.permute.xlu2 %5382 }
 0x930   : > { %v5345_v40 = vunpack.i.h.bf16 %v5343_v33  ;;  %v5344_v17 = vunpack.i.l.bf16 %v5343_v33  ;;  %v5385_v56 = vunpack.i.h.bf16 %v5383_v16  ;;  %v5384_v55 = vunpack.i.l.bf16 %v5383_v16  ;;  %3819 = vmatpush.bf16.msra.mxu2 %v3713_v18 }
 0x932   : > { %v3691_v63 = vsel %vm3675_vm0, %v5344_v17, %v5345_v40  ;;  %v3723_v21 = vpack.c.bf16 %v5385_v56, %v5384_v55 }
 0x933   : > { %v3735_v10 = vpack.c.bf16 %v3691_v63, %v3690_v13 }
 0x934   : > { %3820 = vmatpush.bf16.msra.mxu2 %v3712_v48  ;;  %3836 = vmatpush.bf16.msra.mxu3 %v3723_v21 }
 0x935   : > { %3851 = vmatpush.bf16.msrb.mxu0 %v3735_v10 }
 0x937   : > { %v5398_v42 = vpop.permute.xlu2 %5397  ;;  %3821 = vmatmul.bf16.vlgmr.msra.gmra.mxu2 %v4757_v22 }
 0x938   : > { %v5400_v39 = vunpack.i.h.bf16 %v5398_v42  ;;  %v5399_v28 = vunpack.i.l.bf16 %v5398_v42 }
 0x93a   : > { %v3722_v59 = vpack.c.bf16 %v5400_v39, %v5399_v28 }
 0x93c   : > { %3837 = vmatpush.bf16.msra.mxu3 %v3722_v59 }
 0x93f   : > { %v5413_v35 = vpop.permute.xlu2 %5412 }
 0x940   : > { %v5415_v29 = vunpack.i.h.bf16 %v5413_v35  ;;  %v5414_v61 = vunpack.i.l.bf16 %v5413_v35 }
 0x942   : > { %v3721_v8 = vpack.c.bf16 %v5415_v29, %v5414_v61  ;;  %v5363_v48 = vpop.permute.xlu1 %5362  ;;  %v5358_v58 = vpop.permute.xlu0 %5357  ;;  %v3745_v61 = vld [vmem:[%s9318_s5] sm:$0xff] }
 0x943   : > { %v5365_v30 = vunpack.i.h.bf16 %v5363_v48  ;;  %v5364_v2 = vunpack.i.l.bf16 %v5363_v48  ;;  %v5360_v9 = vunpack.i.h.bf16 %v5358_v58  ;;  %v5359_v0 = vunpack.i.l.bf16 %v5358_v58  ;;  %3751 = vperm.xlu2 %5456, %v3745_v61  }
 0x944   : > { %3838 = vmatpush.bf16.msra.mxu3 %v3721_v8 }
 0x945   : > { %v3688_v50 = vsel %vm3675_vm0, %v5359_v0, %v5360_v9  ;;  %v3689_v25 = vsel %vm3675_vm0, %v5364_v2, %v5365_v30  ;;  %v4764_v9 = vld [vmem:[%s9317_s4 + $0x8] sm:$0xf]  ;;  %v4993_v0 = vld [vmem:[%s9317_s4 + $0x14] sm:$0xf0] }
 0x946   : > { %v3734_v44 = vpack.c.bf16 %v3689_v25, %v3688_v50 }
 0x947   : > { %3826 = vmatmul.bf16.gmra.mxu2 %v4773_v57  ;;  %v5428_v40 = vpop.permute.xlu2 %5427 }
 0x948   : > { %3852 = vmatpush.bf16.msrb.mxu0 %v3734_v44  ;;  %3839 = vmatpush.bf16.msra.mxu3 %v9015_v49  ;;  %v4994_v49 = vld [vmem:[%s9317_s4 + $0x24] sm:$0xf]  ;;  %v5430_v22 = vunpack.i.h.bf16 %v5428_v40  ;;  %v5429_v42 = vunpack.i.l.bf16 %v5428_v40 }
 0x949   : > { %v4777_v12 = vor.u32 %v4994_v49, %v4774_v27 }
 0x94a   : > { %v5378_v5 = vpop.permute.xlu1 %5377  ;;  %v5373_v46 = vpop.permute.xlu0 %5372  ;;  %v3678_v58 = vsel %vm3675_vm0, %v5429_v42, %v5430_v22 }
 0x94b   : > { %v5380_v54 = vunpack.i.h.bf16 %v5378_v5  ;;  %v5379_v43 = vunpack.i.l.bf16 %v5378_v5  ;;  %v5375_v6 = vunpack.i.h.bf16 %v5373_v46  ;;  %v5374_v60 = vunpack.i.l.bf16 %v5373_v46  ;;  %3840 = vmatmul.bf16.vlgmr.msra.gmra.mxu3 %v4761_v14  ;;  %3766 = vperm.xlu2 %5456, %v3748_v37  }
 0x94c   : > { %v4765_v14 = vor.u32 %v4993_v0, %v4764_v9  ;;  %v5000_v9 = vld [vmem:[%s9319_s6 + $0x10] sm:$0xff] }
 0x94d   : > { %v3686_v3 = vsel %vm3675_vm0, %v5374_v60, %v5375_v6  ;;  %v3687_v38 = vsel %vm3675_vm0, %v5379_v43, %v5380_v54  ;;  %v4991_v6 = vld [vmem:[%s9317_s4 + $0xc] sm:$0xf]  ;;  %v4766_v60 = vld [vmem:[%s9317_s4 + $0x18] sm:$0xf0] }
 0x94e   : > { %v3733_v20 = vpack.c.bf16 %v3687_v38, %v3686_v3 }
 0x94f   : > { %v5443_v39 = vpop.permute.xlu2 %5442 }
 0x950   : > { %3853 = vmatpush.bf16.msrb.mxu0 %v3733_v20  ;;  %v5445_v8 = vunpack.i.h.bf16 %v5443_v39  ;;  %v5444_v48 = vunpack.i.l.bf16 %v5443_v39 }
 0x952   : > { %v5393_v1 = vpop.permute.xlu1 %5392  ;;  %v5388_v11 = vpop.permute.xlu0 %5387  ;;  %v3677_v53 = vsel %vm3675_vm0, %v5444_v48, %v5445_v8 }
 0x953   : > { %v5395_v23 = vunpack.i.h.bf16 %v5393_v1  ;;  %v5394_v15 = vunpack.i.l.bf16 %v5393_v1  ;;  %v5390_v4 = vunpack.i.h.bf16 %v5388_v11  ;;  %v5389_v47 = vunpack.i.l.bf16 %v5388_v11  ;;  %v4780_v11 = vld [vmem:[%s9317_s4 + $0x28] sm:$0xf] }
 0x954   : > { %v4769_v1 = vor.u32 %v4991_v6, %v4766_v60 }
 0x955   : > { %v3684_v26 = vsel %vm3675_vm0, %v5389_v47, %v5390_v4  ;;  %v3685_v31 = vsel %vm3675_vm0, %v5394_v15, %v5395_v23  ;;  %v4997_v23 = vld [vmem:[%s9317_s4 + $0x34] sm:$0xf0]  ;;  %v4995_v4 = vld [vmem:[%s9317_s4 + $0x2c] sm:$0xf]  ;;  %v4782_v47 = vld [vmem:[%s9317_s4 + $0x38] sm:$0xf0] }
 0x956   : > { %v3732_v32 = vpack.c.bf16 %v3685_v31, %v3684_v26  ;;  %v4781_v15 = vor.u32 %v4997_v23, %v4780_v11  ;;  %v4785_v49 = vor.u32 %v4995_v4, %v4782_v47 }
 0x958   : > { %3854 = vmatpush.bf16.msrb.mxu0 %v3732_v32 }
 0x95a   : > { %v5408_v24 = vpop.permute.xlu1 %5407  ;;  %v5403_v7 = vpop.permute.xlu0 %5402 }
 0x95b   : > { %v5410_v45 = vunpack.i.h.bf16 %v5408_v24  ;;  %v5409_v62 = vunpack.i.l.bf16 %v5408_v24  ;;  %v5405_v18 = vunpack.i.h.bf16 %v5403_v7  ;;  %v5404_v51 = vunpack.i.l.bf16 %v5403_v7  ;;  %3845 = vmatmul.bf16.gmra.mxu3 %v4777_v12 }
 0x95d   : > { %v3682_v19 = vsel %vm3675_vm0, %v5404_v51, %v5405_v18  ;;  %v3683_v33 = vsel %vm3675_vm0, %v5409_v62, %v5410_v45 }
 0x95e   : > { %v3731_v16 = vpack.c.bf16 %v3683_v33, %v3682_v19 }
 0x960   : > { %3855 = vmatpush.bf16.msrb.mxu0 %v3731_v16 }
 0x962   : > { %v5423_v17 = vpop.permute.xlu1 %5422  ;;  %v5418_v56 = vpop.permute.xlu0 %5417 }
 0x963   : > { %v5425_v55 = vunpack.i.h.bf16 %v5423_v17  ;;  %v5424_v52 = vunpack.i.l.bf16 %v5423_v17  ;;  %v5420_v34 = vunpack.i.h.bf16 %v5418_v56  ;;  %v5419_v13 = vunpack.i.l.bf16 %v5418_v56 }
 0x965   : > { %v3680_v63 = vsel %vm3675_vm0, %v5419_v13, %v5420_v34  ;;  %v3681_v21 = vsel %vm3675_vm0, %v5424_v52, %v5425_v55 }
 0x966   : > { %v3730_v10 = vpack.c.bf16 %v3681_v21, %v3680_v63 }
 0x968   : > { %3856 = vmatpush.bf16.msrb.mxu0 %v3730_v10 }
 0x96a   : > { %v5438_v28 = vpop.permute.xlu1 %5437  ;;  %v5433_v59 = vpop.permute.xlu0 %5432 }
 0x96b   : > { %v5440_v35 = vunpack.i.h.bf16 %v5438_v28  ;;  %v5439_v36 = vunpack.i.l.bf16 %v5438_v28  ;;  %v5435_v41 = vunpack.i.h.bf16 %v5433_v59  ;;  %v5434_v29 = vunpack.i.l.bf16 %v5433_v59 }
 0x96d   : > { %v3679_v57 = vsel %vm3675_vm0, %v5434_v29, %v5435_v41  ;;  %v3676_v2 = vsel %vm3675_vm0, %v5439_v36, %v5440_v35 }
 0x96e   : > { %v3729_v30 = vpack.c.bf16 %v3679_v57, %v3678_v58  ;;  %v3728_v44 = vpack.c.bf16 %v3677_v53, %v3676_v2  ;;  %v5001_v2 = vld [vmem:[%s9319_s6 + $0x18] sm:$0xff] }
 0x970   : > { %3857 = vmatpush.bf16.msrb.mxu0 %v3729_v30  ;;  %v5002_v30 = vld [vmem:[%s9319_s6 + $0x20] sm:$0xff] }
 0x971   : > { %3981 = vmatpush.bf16.msrb.mxu2 %v5002_v30  ;;  %v5018_v30 = vld [vmem:[%s9320_s7 + $0x78] sm:$0xff] }
 0x972   : > { %v5453_v50 = vpop.permute.xlu1 %5452  ;;  %v5448_v25 = vpop.permute.xlu0 %5447 }
 0x973   : > { %v5455_v5 = vunpack.i.h.bf16 %v5453_v50  ;;  %v5454_v46 = vunpack.i.l.bf16 %v5453_v50  ;;  %v5450_v54 = vunpack.i.h.bf16 %v5448_v25  ;;  %v5449_v43 = vunpack.i.l.bf16 %v5448_v25  ;;  %v4999_v50 = vld [vmem:[%s9319_s6 + $0x8] sm:$0xff] }
 0x974   : > { %3858 = vmatpush.bf16.msrb.mxu0 %v3728_v44 }
 0x975   : > { %v3693_v3 = vsel %vm3675_vm0, %v5454_v46, %v5455_v5  ;;  %v3692_v38 = vsel %vm3675_vm0, %v5449_v43, %v5450_v54  ;;  %3982 = vmatpush.bf16.msrb.mxu2 %v5001_v2  ;;  %v5022_v2 = vld [vmem:[%s9320_s7 + $0x98] sm:$0xff] }
 0x976   : > { %v3736_v20 = vpack.c.bf16 %v3693_v3, %v3692_v38  ;;  %v4998_v3 = vld [vmem:[%s9319_s6] sm:$0xff] }
 0x977   : > { %3859 = vmatmul.bf16.vlgmr.msrb.gmra.mxu0 %v4765_v14 }
 0x978   : > { %3877 = vmatpush.bf16.msrb.mxu1 %v3736_v20 }
 0x979   : > { %3983 = vmatpush.bf16.msrb.mxu2 %v5000_v9  ;;  %v5017_v9 = vld [vmem:[%s9320_s7 + $0x70] sm:$0xff] }
 0x97a   : > { %v3757_v18 = vpop.permute.xlu0 %3756  ;;  %v3762_v39 = vpop.permute.xlu1 %3761 }
 0x97b   : > { %4786 = vmatmul.msk.bf16.vlgmr.msrb.gmra.mxu1 %vm2215_vm1, %v4769_v1 }
 0x97c   : > { %4271 = vmatpush.bf16.msra.mxu1 %v5018_v30 }
 0x97d   : > { %3984 = vmatpush.bf16.msrb.mxu2 %v4999_v50 }
 0x980   : > { %4272 = vmatpush.bf16.msra.mxu1 %v5017_v9 }
 0x981   : > { %3985 = vmatpush.bf16.msrb.mxu2 %v4998_v3  ;;  %v5013_v3 = vld [vmem:[%s9320_s7 + $0x50] sm:$0xff] }
 0x987   : > { %3864 = vmatmul.bf16.gmra.mxu0 %v4781_v15 }
 0x98b   : > { %4787 = vmatmul.msk.bf16.gmra.mxu1 %vm2215_vm1, %v4785_v49 }
 0x99d   : > { %v3752_v31 = vpop.permute.xlu2 %3751 }
 0x9a5   : > { %v3767_v21 = vpop.permute.xlu2 %3766 }
 0x9ba   : > { %v3822_v27 = vpop.f32.mrf.mxu2 }
 0x9bb   : > { %v3823_v24 = vadd.f32 %v3822_v27, %v3752_v31 }
 0x9c2   : > { %v3824_v32 = vpop.f32.mrf.mxu2 }
 0x9c3   : > { %v3825_v51 = vadd.f32 %v3824_v32, %v3757_v18 }
 0x9ca   : > { %v3827_v40 = vpop.f32.mrf.mxu2 }
 0x9cb   : > { %v3828_v59 = vadd.f32 %v3827_v40, %v3762_v39 }
 0x9ce   : > { %v3841_v26 = vpop.f32.mrf.mxu3 }
 0x9cf   : > { %v3842_v62 = vadd.f32 %v3841_v26, %v3823_v24 }
 0x9d2   : > { %v3829_v10 = vpop.f32.mrf.mxu2 }
 0x9d3   : > { %v3830_v42 = vadd.f32 %v3829_v10, %v3767_v21 }
 0x9d6   : > { %v3843_v7 = vpop.f32.mrf.mxu3 }
 0x9d7   : > { %v3844_v33 = vadd.f32 %v3843_v7, %v3825_v51 }
 0x9de   : > { %v3846_v34 = vpop.f32.mrf.mxu3 }
 0x9df   : > { %v3847_v36 = vadd.f32 %v3846_v34, %v3828_v59 }
 0x9e6   : > { %v3848_v28 = vpop.f32.mrf.mxu3 }
 0x9e7   : > { %v3849_v41 = vadd.f32 %v3848_v28, %v3830_v42 }
 0x9f4   : > { %v3860_v12 = vpop.f32.mrf.mxu0 }
 0x9f5   : > { %v3861_v16 = vadd.f32 %v3860_v12, %v3842_v62 }
 0x9f8   : > { %v3879_v45 = vpop.f32.mrf.mxu1 }
 0x9f9   : > { %v3880_v55 = vadd.f32 %v3879_v45, %v3861_v16 }
 0x9fc   : > { %v3862_v19 = vpop.f32.mrf.mxu0 }
 0x9fd   : > { %v3863_v17 = vadd.f32 %v3862_v19, %v3844_v33 }
 0xa00   : > { %v3881_v56 = vpop.f32.mrf.mxu1 }
 0xa01   : > { %v3882_v52 = vadd.f32 %v3881_v56, %v3863_v17 }
 0xa03   : > { %v5457_v13 = vpack.i.bf16 %v3882_v52, %v3880_v55 }
 0xa04   : > { %v3865_v63 = vpop.f32.mrf.mxu0 }
 0xa05   : > { %5458 = vrot.lane.b32.xlu0 %v5457_v13, %s10089_s15  ;;  %v3866_v29 = vadd.f32 %v3865_v63, %v3847_v36  ;;  %v5010_v36 = vld [vmem:[%s9320_s7 + $0x38] sm:$0xff] }
 0xa06   : > { %4258 = vmatpush.bf16.msrb.mxu3 %v5010_v36  ;;  %v5023_v36 = vld [vmem:[%s9322_s9] sm:$0xff] }
 0xa08   : > { %v3884_v22 = vpop.f32.mrf.mxu1 }
 0xa09   : > { %v3885_v48 = vadd.f32 %v3884_v22, %v3866_v29  ;;  %v5008_v29 = vld [vmem:[%s9320_s7 + $0x28] sm:$0xff] }
 0xa0c   : > { %v3867_v35 = vpop.f32.mrf.mxu0 }
 0xa0d   : > { %v3868_v61 = vadd.f32 %v3867_v35, %v3849_v41  ;;  %v5009_v41 = vld [vmem:[%s9320_s7 + $0x30] sm:$0xff] }
 0xa0e   : > { %4259 = vmatpush.bf16.msrb.mxu3 %v5009_v41 }
 0xa10   : > { %v3886_v8 = vpop.f32.mrf.mxu1 }
 0xa11   : > { %v3887_v58 = vadd.f32 %v3886_v8, %v3868_v61  ;;  %v5007_v61 = vld [vmem:[%s9320_s7 + $0x20] sm:$0xff]  ;;  %v5006_v8 = vld [vmem:[%s9320_s7 + $0x18] sm:$0xff] }
 0xa12   : > { %4260 = vmatpush.bf16.msrb.mxu3 %v5008_v29  ;;  %v4134_v29 = vld [vmem:[%s9321_s8] sm:$0x1] }
 0xa13   : > { %v5462_v57 = vpack.i.bf16 %v3887_v58, %v3885_v48 }
 0xa15   : > { %5463 = vrot.lane.b32.xlu1 %v5462_v57, %s10089_s15  ;;  %v5003_v57 = vld [vmem:[%s9320_s7] sm:$0xff] }
 0xa16   : > { %4261 = vmatpush.bf16.msrb.mxu3 %v5007_v61 }
 0xa1a   : > { %4262 = vmatpush.bf16.msrb.mxu3 %v5006_v8 }
 0xa77   : > { %v5459_v0 = vpop.permute.xlu0 %5458 }
 0xa78   : > { %v5461_v53 = vunpack.i.h.bf16 %v5459_v0  ;;  %v5460_v37 = vunpack.i.l.bf16 %v5459_v0  ;;  %v5021_v0 = vld [vmem:[%s9320_s7 + $0x90] sm:$0xff] }
 0xa7a   : > { %v3906_v25 = vmax.f32 %v3882_v52, %v5461_v53  ;;  %v3905_v44 = vmax.f32 %v3880_v55, %v5460_v37  ;;  %v5016_v53 = vld [vmem:[%s9320_s7 + $0x68] sm:$0xff] }
 0xa7b   : > { %v5020_v37 = vld [vmem:[%s9320_s7 + $0x88] sm:$0xff]  ;;  %4273 = vmatpush.bf16.msra.mxu1 %v5016_v53  ;;  %v4307_v53 = vld [vmem:[%s9323_s10] sm:$0x1] }
 0xa7c   : > { %v5467_v14 = vpack.i.bf16 %v3906_v25, %v3905_v44 }
 0xa7e   : > { %5468 = vrot.lane.b32.xlu2 %v5467_v14, %s5612_s29  ;;  %v5014_v14 = vld [vmem:[%s9320_s7 + $0x58] sm:$0xff] }
 0xa87   : > { %v5464_v5 = vpop.permute.xlu1 %5463 }
 0xa88   : > { %v5466_v46 = vunpack.i.h.bf16 %v5464_v5  ;;  %v5465_v54 = vunpack.i.l.bf16 %v5464_v5 }
 0xa8a   : > { %v3908_v43 = vmax.f32 %v3887_v58, %v5466_v46  ;;  %v3907_v6 = vmax.f32 %v3885_v48, %v5465_v54  ;;  %v5005_v48 = vld [vmem:[%s9320_s7 + $0x10] sm:$0xff]  ;;  %v5004_v58 = vld [vmem:[%s9320_s7 + $0x8] sm:$0xff] }
 0xa8b   : > { %4263 = vmatpush.bf16.msrb.mxu3 %v5005_v48 }
 0xa8c   : > { %v5472_v60 = vpack.i.bf16 %v3908_v43, %v3907_v6 }
 0xa8e   : > { %5473 = vrot.lane.b32.xlu0 %v5472_v60, %s5612_s29  ;;  %s5622_s29 = smov 64  }
 0xa8f   : > { %4264 = vmatpush.bf16.msrb.mxu3 %v5004_v58 }
 0xa93   : > { %4265 = vmatpush.bf16.msrb.mxu3 %v5003_v57 }
 0xa97   : > { %4288 = vmatpush.bf16.msra.mxu3 %v5022_v2 }
 0xa9b   : > { %4289 = vmatpush.bf16.msra.mxu3 %v5021_v0 }
 0xa9f   : > { %4290 = vmatpush.bf16.msra.mxu3 %v5020_v37 }
 0xad8   : > { %v5469_v38 = vpop.permute.xlu2 %5468 }
 0xad9   : > { %v5471_v20 = vunpack.i.h.bf16 %v5469_v38  ;;  %v5470_v1 = vunpack.i.l.bf16 %v5469_v38  ;;  %v5019_v38 = vld [vmem:[%s9320_s7 + $0x80] sm:$0xff] }
 0xada   : > { %4291 = vmatpush.bf16.msra.mxu3 %v5019_v38 }
 0xadb   : > { %v3926_v11 = vmax.f32 %v3906_v25, %v5471_v20  ;;  %v3925_v23 = vmax.f32 %v3905_v44, %v5470_v1  ;;  %v5015_v25 = vld [vmem:[%s9320_s7 + $0x60] sm:$0xff] }
 0xadc   : > { %4274 = vmatpush.bf16.msra.mxu1 %v5015_v25 }
 0xadd   : > { %v3929_v15 = vpack.c.bf16 %v3926_v11, %v3925_v23 }
 0xadf   : > { %4808 = vmatmul.msk.bf16.vlgmr.msrb.gmra.mxu2 %vm3971_vm6, %v3929_v15  ;;  %v5012_v15 = vld [vmem:[%s9320_s7 + $0x48] sm:$0xff] }
 0xae0   : > { %4275 = vmatpush.bf16.msra.mxu1 %v5014_v14 }
 0xae4   : > { %4276 = vmatpush.bf16.msra.mxu1 %v5013_v3 }
 0xae8   : > { %4277 = vmatpush.bf16.msra.mxu1 %v5012_v15 }
 0xb00   : > { %v5474_v4 = vpop.permute.xlu0 %5473 }
 0xb01   : > { %v5476_v47 = vunpack.i.h.bf16 %v5474_v4  ;;  %v5475_v49 = vunpack.i.l.bf16 %v5474_v4 }
 0xb03   : > { %v3928_v27 = vmax.f32 %v3908_v43, %v5476_v47  ;;  %v3927_v26 = vmax.f32 %v3907_v6, %v5475_v49 }
 0xb05   : > { %v3930_v31 = vpack.c.bf16 %v3928_v27, %v3927_v26  ;;  %v5011_v26 = vld [vmem:[%s9320_s7 + $0x40] sm:$0xff] }
 0xb06   : > { %4278 = vmatpush.bf16.msra.mxu1 %v5011_v26 }
 0xb07   : > { %4809 = vmatmul.msk.bf16.gmra.mxu2 %vm3971_vm6, %v3930_v31 }
 0xb62   : > { %v3987_v32 = vpop.f32.mrf.mxu2 }
 0xb63   : > { %v9149_v12 = vmax.f32 %v3987_v32, 0.0 }
 0xb65   : > { %v4012_v24 = vrot.slane %v9149_v12, 4  ;;  %v4008_v7 = vrot.slane %v9149_v12, 3  ;;  %v4004_v45 = vrot.slane %v9149_v12, 2  ;;  %v4020_v51 = vrot.slane %v9149_v12, 6 }
 0xb66   : > { %v4000_v19 = vrot.slane %v9149_v12, 1  ;;  %v4016_v16 = vrot.slane %v9149_v12, 5  ;;  %v4024_v56 = vrot.slane %v9149_v12, 7 }
 0xb67   : > { %4013 = vrot.lane.b32.xlu1 %v4012_v24, %s5622_s29  ;;  %4009 = vrot.lane.b32.xlu0 %v4008_v7, %s5623_s13 }
 0xb68   : > { %4005 = vrot.lane.b32.xlu2 %v4004_v45, %s5624_s16 }
 0xb6a   : > { %v3989_v62 = vpop.f32.mrf.mxu2 }
 0xb6b   : > { %v9154_v18 = vmax.f32 %v3989_v62, 0.0 }
 0xb6d   : > { %v4029_v33 = vrot.slane %v9154_v18, 1  ;;  %v4041_v17 = vrot.slane %v9154_v18, 4  ;;  %v4037_v34 = vrot.slane %v9154_v18, 3  ;;  %v4033_v10 = vrot.slane %v9154_v18, 2 }
 0xb6e   : > { %v4053_v28 = vrot.slane %v9154_v18, 7  ;;  %v4049_v59 = vrot.slane %v9154_v18, 6  ;;  %v4045_v35 = vrot.slane %v9154_v18, 5 }
 0xb6f   : > { %4021 = vrot.lane.b32.xlu0 %v4020_v51, %s10094_s25  ;;  %v5477_v40 = vpack.i.bf16 %v4029_v33, %v4000_v19 }
 0xb70   : > { %4017 = vrot.lane.b32.xlu2 %v4016_v16, %s5625_s22 }
 0xb71   : > { %5478 = vrot.lane.b32.xlu1 %v5477_v40, %s10095_s1 }
 0xb78   : > { %4042 = vrot.lane.b32.xlu2 %v4041_v17, %s5622_s29 }
 0xb79   : > { %4025 = vrot.lane.b32.xlu1 %v4024_v56, %s5621_s24 }
 0xb8a   : > { %v3992_v55 = vpop.f32.mrf.mxu2 }
 0xb8b   : > { %v9165_v52 = vmax.f32 %v3992_v55, 0.0 }
 0xb8d   : > { %v4080_v13 = vrot.slane %v9165_v52, 2  ;;  %v4084_v63 = vrot.slane %v9165_v52, 3  ;;  %v4076_v21 = vrot.slane %v9165_v52, 1 }
 0xb8f   : > { %4077 = vrot.lane.b32.xlu2 %v4076_v21, %s10095_s1  ;;  %v5487_v22 = vpack.i.bf16 %v4084_v63, %v4037_v34  ;;  %v5482_v42 = vpack.i.bf16 %v4080_v13, %v4033_v10  ;;  %s4363_s1 = scalar_lea.sflag [#allocation3], %s375_s30 }
 0xb91   : > { %5488 = vrot.lane.b32.xlu1 %v5487_v22, %s5623_s13  ;;  %5483 = vrot.lane.b32.xlu0 %v5482_v42, %s5624_s16  ;;  %s4371_s13 = scalar_lea.hbm %s9324_s11, %s5707_s21  ;;  %s376_s16 = scalar_lea.vmem [#allocation2], %s375_s30 }
 0xb92   : > { %v3994_v39 = vpop.f32.mrf.mxu2 }
 0xb93   : > { %v5026_v39 = vld [vmem:[%s9322_s9 + $0x18] sm:$0xff] }
 0xb94   : > { %4339 = vmatpush.bf16.msra.mxu0 %v5026_v39 }
 0xb97   : > { %4054 = vrot.lane.b32.xlu2 %v4053_v28, %s5621_s24  ;;  %v5025_v28 = vld [vmem:[%s9322_s9 + $0x10] sm:$0xff] }
 0xb98   : > { %4340 = vmatpush.bf16.msra.mxu0 %v5025_v28 }
 0xb99   : > { %4050 = vrot.lane.b32.xlu1 %v4049_v59, %s10094_s25  ;;  %4046 = vrot.lane.b32.xlu0 %v4045_v35, %s5625_s22  ;;  %v5024_v35 = vld [vmem:[%s9322_s9 + $0x8] sm:$0xff]  ;;  %s4373_s25 = sshll.u32 %s376_s16, 4  ;;  %s4375_s22 = sshll.u32 %s4371_s13, 4  ;;  %s4374_s25 = int_to_ptr.vmem [resolvable:$true] %s4373_s25  ;;  %s4376_s22 = int_to_ptr.hbm [resolvable:$true] %s4375_s22 }
 0xb9a   : > { %s5511_s14 = sshra.s32 %s4376_s22, 4  ;;  %s5512_s14 = int_to_ptr.hbm [resolvable:$true] %s5511_s14 }
 0xb9b   : > { %s5513_s12 = scalar_lea.hbm %s5512_s14, 1  ;;  %p5518_p0 = scmp.lt.s32.totalorder %s5512_s14, %s9324_s11 }
 0xb9c   : > { %4341 = vmatpush.bf16.msra.mxu0 %v5024_v35  ;;  %p5514_p11 = scmp.ne.s32.totalorder %s5512_s14, %s5513_s12  ;;  %p5519_p1 = scmp.lt.s32.totalorder %s5517_s0, %s5513_s12 }
 0xb9e   : > { %p5515_p12 = pnand %p5514_p11, %p5724_p5  ;;  %p5520_p2 = por %p5519_p1, %p5518_p0 }
 0xba0   : > { %4342 = vmatpush.bf16.msra.mxu0 %v5023_v36  ;;  %p5516_p13 = pneg %p5515_p12 }
 0xba2   : > { %p5521_p3 = pnand %p5520_p2, %p5516_p13 }
 0xbc2   : > { %v4006_v44 = vpop.permute.xlu2 %4005 }
 0xbca   : > { %v4018_v20 = vpop.permute.xlu2 %4017 }
 0xbd2   : > { %v4043_v31 = vpop.permute.xlu2 %4042 }
 0xbd9   : > { %v4014_v50 = vpop.permute.xlu1 %4013  ;;  %v4010_v5 = vpop.permute.xlu0 %4009 }
 0xbe1   : > { %v4022_v11 = vpop.permute.xlu0 %4021 }
 0xbe3   : > { %v5479_v46 = vpop.permute.xlu1 %5478 }
 0xbe4   : > { %v5480_v54 = vunpack.i.l.bf16 %v5479_v46  ;;  %v5481_v32 = vunpack.i.h.bf16 %v5479_v46 }
 0xbe6   : > { %v4057_v43 = vsel %vm2215_vm1, %v9149_v12, %v5480_v54  ;;  %v4068_v33 = vsel %vm2215_vm1, %v9154_v18, %v5481_v32 }
 0xbe7   : > { %v4059_v6 = vsel %vm4058_vm7, %v4057_v43, %v4006_v44 }
 0xbe8   : > { %v4061_v60 = vsel %vm4060_vm9, %v4059_v6, %v4010_v5 }
 0xbe9   : > { %v4063_v1 = vsel %vm4062_vm10, %v4061_v60, %v4014_v50  ;;  %v4078_v12 = vpop.permute.xlu2 %4077 }
 0xbea   : > { %v4064_v23 = vsel %vm3971_vm6, %v4063_v1, %v4018_v20  ;;  %v4088_v16 = vsel %vm2215_vm1, %v9165_v52, %v4078_v12  ;;  %vm4348_vm1 = vcmask 73728  }
 0xbeb   : > { %v4026_v4 = vpop.permute.xlu1 %4025  ;;  %v4065_v47 = vsel %vm1204_vm8, %v4064_v23, %v4022_v11 }
 0xbec   : > { %v4067_v49 = vsel %vm4066_vm11, %v4065_v47, %v4026_v4 }
 0xbed   : > { %v4091_v27 = vpack.c.bf16 %v4067_v49, %v4067_v49 }
 0xbef   : > { %4266 = vmatmul.bf16.vlgmr.msrb.gmra.mxu3 %v4091_v27 }
 0xbf1   : > { %v4055_v10 = vpop.permute.xlu2 %4054 }
 0xc03   : > { %v5489_v24 = vpop.permute.xlu1 %5488  ;;  %v5484_v7 = vpop.permute.xlu0 %5483 }
 0xc04   : > { %v5491_v45 = vunpack.i.h.bf16 %v5489_v24  ;;  %v5490_v62 = vunpack.i.l.bf16 %v5489_v24  ;;  %v5486_v51 = vunpack.i.h.bf16 %v5484_v7  ;;  %v5485_v19 = vunpack.i.l.bf16 %v5484_v7 }
 0xc06   : > { %v4069_v40 = vsel %vm4058_vm7, %v4068_v33, %v5485_v19  ;;  %v4089_v17 = vsel %vm4058_vm7, %v4088_v16, %v5486_v51 }
 0xc07   : > { %v4090_v56 = vsel %vm4060_vm9, %v4089_v17, %v5491_v45  ;;  %v4070_v34 = vsel %vm4060_vm9, %v4069_v40, %v5490_v62 }
 0xc08   : > { %v4093_v55 = vpack.c.bf16 %v4090_v56, %v4090_v56  ;;  %v4071_v21 = vsel %vm4062_vm10, %v4070_v34, %v4043_v31 }
 0xc0a   : > { %4890 = vmatmul.msk.bf16.vlgmr.msra.gmra.mxu3 %vm4062_vm10, %v4093_v55 }
 0xc0b   : > { %v4051_v13 = vpop.permute.xlu1 %4050  ;;  %v4047_v63 = vpop.permute.xlu0 %4046 }
 0xc0c   : > { %v4072_v18 = vsel %vm3971_vm6, %v4071_v21, %v4047_v63 }
 0xc0d   : > { %v4073_v52 = vsel %vm1204_vm8, %v4072_v18, %v4051_v13 }
 0xc0e   : > { %v4074_v22 = vsel %vm4066_vm11, %v4073_v52, %v4055_v10 }
 0xc0f   : > { %v4092_v42 = vpack.c.bf16 %v4074_v22, %v4074_v22 }
 0xc11   : > { %4279 = vmatmul.bf16.vlgmr.msra.gmra.mxu1 %v4092_v42 }
 0xc72   : > { %v4267_v59 = vpop.f32.mrf.mxu3 }
 0xc73   : > { %v4268_v61 = vadd.f32 %v4267_v59, %v4134_v29 }
 0xc7a   : > { %v4269_v41 = vpop.f32.mrf.mxu3 }
 0xc8d   : > { %v4293_v8 = vpop.f32.mrf.mxu3 }
 0xc8e   : > { %v4280_v48 = vpop.f32.mrf.mxu1 }
 0xc8f   : > { %v4281_v58 = vadd.f32 %v4280_v48, %v4268_v61 }
 0xc91   : > { %v4294_v57 = vadd.f32 %v4293_v8, %v4281_v58 }
 0xc93   : > { %v4297_v30 = vmax.f32 %v4294_v57, 0.0 }
 0xc95   : > { %v4298_v2 = vpack.c.bf16 %v4297_v30, %v4297_v30  ;;  %v4295_v9 = vpop.f32.mrf.mxu3 }
 0xc96   : > { %v4282_v0 = vpop.f32.mrf.mxu1 }
 0xc97   : > { %4907 = vmatmul.msk.bf16.vlgmr.msra.gmra.mxu0 %vm4062_vm10, %v4298_v2 }
 0xd14   : > { %v4344_v37 = vpop.f32.mrf.mxu0 }
 0xd15   : > { %v4345_v50 = vadd.f32 %v4344_v37, %v4307_v53 }
 0xd17   : > { %v4349_v25 = vsel %vm4348_vm1, %v4345_v50, -inf }
 0xd18   : > { %4350 = vmax.xlane.f32.xlu0 %v4349_v25 }
 0xd1c   : > { %v4346_v44 = vpop.f32.mrf.mxu0 }
 0xd8b   : > { %v4351_v14 = vpop.xlane.xlu0 %4350 }
 0xd8c   : > { %v4352_v5 = vsub.f32 %v4345_v50, %v4351_v14 }
 0xd8e   : > { %v4353_v46 = vmul.f32 1.442695, %v4352_v5 }
 0xd90   : > { %5492 = vpow2.f32 %v4353_v46 }
 0xd96   : > { %v5493_v54 = vpop.eup %5492 }
 0xd97   : > { %v4355_v43 = vsel %vm4348_vm1, %v5493_v54, 0.0 }
 0xd98   : > { %4356 = vadd.xlane.f32.xlu1 %v4355_v43 }
 0xe0b   : > { %v4357_v6 = vpop.xlane.xlu1 %4356 }
 0xe0c   : > { %5494 = vlog2.f32 %v4357_v6 }
 0xe12   : > { %v5495_v60 = vpop.eup %5494 }
 0xe13   : > { %v4359_v3 = vmul.f32 0.6931472, %v5495_v60 }
 0xe15   : > { %v4360_v38 = vsub.f32 %v4352_v5, %v4359_v3 }
 0xe17   : > { %4361 = vst.msk [vmem:[%s376_s16] sm:$0x1] %vm4348_vm1, %v4360_v38 }
 0xe18   : > { %5524 = shalt.err (!%p5521_p3)
}
 0xe19   : > { %5028 = dma.vmem_to_hbm [thread:$0]  (%p5724_p5), %s4374_s25, 16, %s4376_s22, %s4363_s1  }
 0xe1a PF: > { %p5034_p4 = scmp.ge.s32.totalorder %s5559_s20, 2  ;;  %s4387_s30 = sand.u32 1, %s5547_s17  }
 0xe1b   : > { %s4388_s13 = scalar_lea.sflag [#allocation3], %s4387_s30 }
 0xe1c   : > { %p5031_p7 = pnand %p5034_p4, %p5728_p6 }
 0xe1e   : > { %p5032_p8 = pneg %p5031_p7 }
 0xe20   : > { %5542 = dma.done.wait (%p5032_p8), %s4388_s13, 16  }
 0xe21   : > { %5544 = vsyncadd (%p5032_p8), %s4388_s13, 4294967280  ;;  %p21_p9 = scmp.ge.s32.totalorder %s5711_s23, 4   ;;  %s10096_s17 = smov %s5551_s18 }
 0xe22   : > { %s10097_s18 = smov %s5555_s19  ;;  %s10098_s19 = smov %s5722_s26 }
 0xe23   : > { %s10099_s20 = smov %s5711_s23  ;;  %23 = sbr.rel (!%p21_p9) target bundleno = 6 (0x6), region = 99 }
 0xe28   :  { %4393 = vsyncpa [#allocation3], 1 }
 0xe29   :  { %4395 = vsyncpa [#allocation3 + $0x1], 1 }

</bundles_post_ra>
